<compile_context>
chip_gen: v5e
topology: v5e:2x2
jax: 0.10.0
libtpu: 0.0.40
codegen_flags: <defaults>
</compile_context>

<pallas_src>
import math
import jax
import jax.numpy as jnp
from jax.experimental import pallas as pl
from jax.experimental.pallas import tpu as pltpu

LANE = 128


# ----------------------------------------------------------------------------
# small helpers
# ----------------------------------------------------------------------------
def _rup(n, m=LANE):
    return ((n + m - 1) // m) * m


def _pad2(a, rows, cols):
    r, c = a.shape
    return jnp.pad(a, ((0, rows - r), (0, cols - c)))


def get_sinusoidal_embedding(t, embedding_dim):
    t = t.astype(jnp.float32)[:, None]
    half = embedding_dim // 2
    emb_scale = math.log(10000.0) / (half - 1) if half > 1 else 1.0
    freq = jnp.exp(jnp.arange(half, dtype=jnp.float32) * -emb_scale)
    emb = t * freq[None, :]
    emb = jnp.concatenate([jnp.sin(emb), jnp.cos(emb)], axis=1)
    if embedding_dim % 2 == 1:
        emb = jnp.pad(emb, ((0, 0), (0, 1)))
    return emb


# ----------------------------------------------------------------------------
# parameter init (PyTorch-Linear-like, W stored (in, out), b stored (1, out))
# ----------------------------------------------------------------------------
def _init_linear(key, fan_in, fan_out):
    kw, kb = jax.random.split(key)
    bound = 1.0 / math.sqrt(fan_in)
    w = jax.random.uniform(kw, (fan_in, fan_out), jnp.float32, -bound, bound)
    b = jax.random.uniform(kb, (1, fan_out), jnp.float32, -bound, bound)
    return w, b


def init_params(key, *, num_features, cond_dims, cond_embedding_dims,
                initial_size, bottleneck_size, n_layers, time_embedding_dim):
    total_cond = sum(cond_embedding_dims)          # fusion_method == 'concat'
    enc_sizes = [int(initial_size * (bottleneck_size / initial_size) ** (i / float(n_layers)))
                 for i in range(n_layers)]
    keys = iter(jax.random.split(key, 256))
    p = {"enc_sizes": enc_sizes}

    p["cond_emb"] = [_init_linear(next(keys), d, e)
                     for d, e in zip(cond_dims, cond_embedding_dims)]
    p["time_dense"] = _init_linear(next(keys), time_embedding_dim, time_embedding_dim)

    enc_in = num_features + time_embedding_dim + total_cond
    p["enc"] = [_init_linear(next(keys), enc_in, enc_sizes[0])]
    for i in range(1, n_layers):
        p["enc"].append(_init_linear(next(keys), enc_sizes[i - 1], enc_sizes[i]))
    p["enc_tproj"] = [_init_linear(next(keys), time_embedding_dim, enc_sizes[i])
                      for i in range(1, n_layers)]
    p["enc_cproj"] = [_init_linear(next(keys), total_cond, enc_sizes[i])
                      for i in range(1, n_layers)]

    p["bott_tproj"] = _init_linear(next(keys), time_embedding_dim, enc_sizes[-1])
    p["bott_cproj"] = _init_linear(next(keys), total_cond, enc_sizes[-1])
    p["bottleneck"] = _init_linear(next(keys), enc_sizes[-1], bottleneck_size)

    rev = list(reversed(enc_sizes))
    p["dec"], p["dec_tproj"], p["dec_cproj"] = [], [], []
    d_in = bottleneck_size
    for i in range(n_layers):
        skip_dim = rev[i]
        dec_in_dim = d_in + skip_dim
        p["dec_tproj"].append(_init_linear(next(keys), time_embedding_dim, dec_in_dim))
        p["dec_cproj"].append(_init_linear(next(keys), total_cond, dec_in_dim))
        p["dec"].append(_init_linear(next(keys), dec_in_dim, skip_dim))
        d_in = skip_dim

    final_in = rev[-1] + num_features
    p["final_tproj"] = _init_linear(next(keys), time_embedding_dim, final_in)
    p["final_cproj"] = _init_linear(next(keys), total_cond, final_in)
    p["out"] = _init_linear(next(keys), final_in, num_features)
    return p


# ----------------------------------------------------------------------------
# weight packing:
#   * pad every weight to 128-lane multiples (padded rows/cols are exact zeros),
#   * fuse both cond-embedding Linears into one block-diagonal weight,
#   * stack time/cond projections row-wise into (256, N) operands (tc16 K=256),
#   * split concat-weights row/column-wise (split-K handling of torch.cat),
#   * group all bf16 weights by padded column width into a few flat slabs and
#     all f32 biases into ONE slab; record static (slab, row, rows/cols) addrs.
# ----------------------------------------------------------------------------
def pack_params(p, *, num_features, cond_dims, cond_embedding_dims,
                bottleneck_size, n_layers, time_embedding_dim):
    nf = num_features
    T = time_embedding_dim
    enc_sizes = p["enc_sizes"]

    nf_pad = _rup(nf)
    t_pad = _rup(T)
    cd_total = sum(cond_dims)
    ce_total = sum(cond_embedding_dims)
    cd_pad = _rup(cd_total)                 # packed raw-cond width
    ce_pad = _rup(ce_total)                 # packed cond-embedding width
    tc_width = t_pad + ce_pad               # K of every time/cond projection
    enc_pads = [_rup(s) for s in enc_sizes]
    bott_pad = _rup(bottleneck_size)
    nf_out_pad = _rup(nf)

    weights = []   # (name, padded f32 array) -> bf16 slabs at the end
    biases = []    # (name, (1, cols) f32 array)

    def add_w(name, arr, rows, cols):
        weights.append((name, _pad2(arr, rows, cols)))

    def add_b(name, arr, cols):
        biases.append((name, _pad2(arr, 1, cols)))

    def stack_tc_rows(wt, wc):
        # wt: (T, N) time proj, wc: (ce_total, N) cond proj -> (tc_width, N)
        return jnp.concatenate(
            [_pad2(wt, t_pad, wt.shape[1]), _pad2(wc, ce_pad, wc.shape[1])], axis=0)

    def split_cols(a, d_top, top_pad, bot_pad):
        # rearrange columns [0:d_top | d_top:] into [top slab | bot slab], zero-padded
        top, bot = a[:, :d_top], a[:, d_top:]
        return jnp.concatenate(
            [jnp.pad(top, ((0, 0), (0, top_pad - top.shape[1]))),
             jnp.pad(bot, ((0, 0), (0, bot_pad - bot.shape[1])))], axis=1)

    # --- time embedding dense -------------------------------------------------
    wt_d, bt_d = p["time_dense"]
    add_w("time_w", wt_d, t_pad, t_pad)
    add_b("time_b", bt_d, t_pad)

    # --- condition embeddings fused into ONE block-diagonal matmul -----------
    cond_w = jnp.zeros((cd_pad, ce_pad), jnp.float32)
    cond_b = jnp.zeros((1, ce_pad), jnp.float32)
    ro = co = 0
    for (w, b), d, e in zip(p["cond_emb"], cond_dims, cond_embedding_dims):
        cond_w = cond_w.at[ro:ro + d, co:co + e].set(w)
        cond_b = cond_b.at[:, co:co + e].set(b)
        ro += d
        co += e
    add_w("cond_w", cond_w, cd_pad, ce_pad)
    add_b("cond_b", cond_b, ce_pad)

    # --- encoder layer 0 : split-K over concat([x, t_emb, cond_emb]) ---------
    w0, b0 = p["enc"][0]
    add_w("enc0_x", w0[:nf], nf_pad, enc_pads[0])
    add_w("enc0_tc", stack_tc_rows(w0[nf:nf + T], w0[nf + T:]), tc_width, enc_pads[0])
    add_b("enc0_b", b0, enc_pads[0])

    # --- encoder layers 1..n-1 (fold the three biases into one) --------------
    for i in range(1, n_layers):
        w, b = p["enc"][i]
        wt, bt = p["enc_tproj"][i - 1]
        wc, bc = p["enc_cproj"][i - 1]
        add_w(f"enc{i}_w", w, enc_pads[i - 1], enc_pads[i])
        add_w(f"enc{i}_tc", stack_tc_rows(wt, wc), tc_width, enc_pads[i])
        add_b(f"enc{i}_b", b + bt + bc, enc_pads[i])

    # --- bottleneck -----------------------------------------------------------
    wt, bt = p["bott_tproj"]
    wc, bc = p["bott_cproj"]
    wb, bb = p["bottleneck"]
    add_w("bott_tc", stack_tc_rows(wt, wc), tc_width, enc_pads[-1])
    add_b("bott_pb", bt + bc, enc_pads[-1])
    add_w("bott_w", wb, enc_pads[-1], bott_pad)
    add_b("bott_b", bb, bott_pad)

    # --- decoder (concat([h, skip]) via column/row splits) --------------------
    rev_sizes = list(reversed(enc_sizes))
    dec_h_pads = []
    d_in, d_in_pad = bottleneck_size, bott_pad
    for i in range(n_layers):
        skip = rev_sizes[i]
        skip_pad = _rup(skip)
        wt, bt = p["dec_tproj"][i]
        wc, bc = p["dec_cproj"][i]
        wd, bd = p["dec"][i]
        add_w(f"dec{i}_tc", split_cols(stack_tc_rows(wt, wc), d_in, d_in_pad, skip_pad),
              tc_width, d_in_pad + skip_pad)
        add_b(f"dec{i}_pb", split_cols(bt + bc, d_in, d_in_pad, skip_pad),
              d_in_pad + skip_pad)
        add_w(f"dec{i}_top", wd[:d_in], d_in_pad, skip_pad)
        add_w(f"dec{i}_bot", wd[d_in:], skip_pad, skip_pad)
        add_b(f"dec{i}_b", bd, skip_pad)
        dec_h_pads.append(d_in_pad)
        d_in, d_in_pad = skip, skip_pad

    # --- final layer (concat([h, x])) ------------------------------------------
    wt, bt = p["final_tproj"]
    wc, bc = p["final_cproj"]
    wo, bo = p["out"]
    h_fin, h_fin_pad = d_in, d_in_pad
    add_w("fin_tc", split_cols(stack_tc_rows(wt, wc), h_fin, h_fin_pad, nf_pad),
          tc_width, h_fin_pad + nf_pad)
    add_b("fin_pb", split_cols(bt + bc, h_fin, h_fin_pad, nf_pad), h_fin_pad + nf_pad)
    add_w("fin_top", wo[:h_fin], h_fin_pad, nf_out_pad)
    add_w("fin_bot", wo[h_fin:], nf_pad, nf_out_pad)
    add_b("fin_b", bo, nf_out_pad)

    # --- group weights by padded column width into a few flat bf16 slabs ------
    # NOTE: all padded regions above are exact zeros by construction (jnp.pad /
    # zeros scatter); this invariant is what makes the split-K padding inert.
    by_width = {}
    for name, arr in weights:
        by_width.setdefault(int(arr.shape[1]), []).append((name, arr))
    w_slabs, w_addr = [], {}
    for sid, width in enumerate(sorted(by_width)):
        off, parts = 0, []
        for name, arr in by_width[width]:
            w_addr[name] = (sid, off, int(arr.shape[0]))   # static addressing
            parts.append(arr)
            off += int(arr.shape[0])
        w_slabs.append(jnp.concatenate(parts, axis=0).astype(jnp.bfloat16))

    # --- stack every f32 bias into ONE slab ------------------------------------
    b_width = max(int(arr.shape[1]) for _, arr in biases)
    b_addr, rows = {}, []
    for r, (name, arr) in enumerate(biases):
        b_addr[name] = (r, int(arr.shape[1]))
        rows.append(_pad2(arr, 1, b_width))
    n_rows = len(rows)
    n_rows_pad = _rup(n_rows, 8)
    if n_rows_pad > n_rows:
        rows.append(jnp.zeros((n_rows_pad - n_rows, b_width), jnp.float32))
    b_slab = jnp.concatenate(rows, axis=0)

    meta = dict(nf=nf, nf_pad=nf_pad, t_pad=t_pad, cd_pad=cd_pad, ce_pad=ce_pad,
                nf_out_pad=nf_out_pad, n_layers=n_layers,
                dec_h_pads=tuple(dec_h_pads), h_fin_pad=h_fin_pad,
                cond_dims=tuple(cond_dims),
                cond_embedding_dims=tuple(cond_embedding_dims),
                w_addr=w_addr, b_addr=b_addr, n_slabs=len(w_slabs))
    return w_slabs, b_slab, meta


# ----------------------------------------------------------------------------
# fused forward: a single pallas_call, everything resident in VMEM.
# grid = batch tiles (parallel); weight slabs use a constant index_map so they
# stay resident across batch tiles and across both v7x TensorCores.
# ----------------------------------------------------------------------------
def forward_pallas(w_slabs, b_slab, meta, x, t, conds, cond_masks, *,
                   time_embedding_dim, batch_tile=256):
    B = x.shape[0]
    nf_pad, t_pad = meta["nf_pad"], meta["t_pad"]
    cd_pad, ce_pad = meta["cd_pad"], meta["ce_pad"]
    nf_out_pad = meta["nf_out_pad"]
    n_layers = meta["n_layers"]
    dec_h_pads = meta["dec_h_pads"]
    h_fin_pad = meta["h_fin_pad"]
    w_addr, b_addr = meta["w_addr"], meta["b_addr"]
    n_slabs = meta["n_slabs"]
    cond_dims = meta["cond_dims"]
    cond_emb_dims = meta["cond_embedding_dims"]

    # batch tiling (degenerates to a single tile at small B)
    B_pad = _rup(B, 8)
    tile_b = B_pad if B_pad <= batch_tile else batch_tile
    B_pad = _rup(B_pad, tile_b)
    nb = B_pad // tile_b

    # --- tiny host-side glue (one XLA fusion): sinusoid + packing/padding -----
    t_sin = _pad2(get_sinusoidal_embedding(t, time_embedding_dim), B_pad, t_pad)
    x_pad = _pad2(x, B_pad, nf_pad)

    cond_packed = jnp.zeros((B_pad, cd_pad), jnp.float32)
    off = 0
    for c, d in zip(conds, cond_dims):
        cond_packed = cond_packed.at[:B, off:off + d].set(c)
        off += d

    mask_packed = jnp.zeros((B_pad, ce_pad), jnp.float32)
    off = 0
    for i, e in enumerate(cond_emb_dims):
        if cond_masks is None:
            seg = jnp.ones((B, 1), jnp.float32)
        else:
            seg = cond_masks[i].reshape(B, 1).astype(jnp.float32)
        mask_packed = mask_packed.at[:B, off:off + e].set(jnp.broadcast_to(seg, (B, e)))
        off += e

    bf16 = jnp.bfloat16

    def kernel(*refs):
        x_ref, ts_ref, cond_ref, mask_ref = refs[0:4]
        wref = refs[4:4 + n_slabs]
        b_ref = refs[4 + n_slabs]
        out_ref = refs[-1]

        def W(name):                     # static, 128-aligned slab slice (free)
            sid, roff, rows = w_addr[name]
            return wref[sid][roff:roff + rows, :]

        def Bv(name):                    # one bias row, static slice
            r, cols = b_addr[name]
            return b_ref[r:r + 1, :cols]

        def mm(a, w):                    # bf16 MXU dot, f32 accumulation
            return jnp.dot(a.astype(bf16), w, preferred_element_type=jnp.float32)

        x_v = x_ref[...]

        # time embedding dense + ReLU
        t_emb = jnp.maximum(mm(ts_ref[...], W("time_w")) + Bv("time_b"), 0.0)

        # fused condition embeddings (one block-diagonal matmul) + ReLU + mask
        c_emb = jnp.maximum(mm(cond_ref[...], W("cond_w")) + Bv("cond_b"), 0.0)
        c_emb = c_emb * mask_ref[...]

        # stacked conditioning operand (B, 256), concatenated in bf16
        tc16 = jnp.concatenate([t_emb.astype(bf16), c_emb.astype(bf16)], axis=-1)

        # encoder layer 0 : split-K over concat([x, t_emb, cond_emb])
        h = jnp.maximum(mm(x_v, W("enc0_x")) + mm(tc16, W("enc0_tc"))
                        + Bv("enc0_b"), 0.0)
        skips = [h]
        for i in range(1, n_layers):
            h = jnp.maximum(mm(h, W(f"enc{i}_w")) + mm(tc16, W(f"enc{i}_tc"))
                            + Bv(f"enc{i}_b"), 0.0)
            skips.append(h)

        # bottleneck : additive time/cond projection, then dense + ReLU
        u = h + mm(tc16, W("bott_tc")) + Bv("bott_pb")
        h = jnp.maximum(mm(u, W("bott_w")) + Bv("bott_b"), 0.0)

        # decoder : concat([h, skip]) replaced by adjacent split-K partial dots
        for i in range(n_layers):
            skip = skips[n_layers - 1 - i]
            proj = mm(tc16, W(f"dec{i}_tc")) + Bv(f"dec{i}_pb")
            dh = dec_h_pads[i]
            u = h + proj[:, :dh]
            v = skip + proj[:, dh:]
            h = jnp.maximum(mm(u, W(f"dec{i}_top")) + mm(v, W(f"dec{i}_bot"))
                            + Bv(f"dec{i}_b"), 0.0)

        # final : concat([h, x]) via split-K, no ReLU
        proj = mm(tc16, W("fin_tc")) + Bv("fin_pb")
        u = h + proj[:, :h_fin_pad]
        v = x_v + proj[:, h_fin_pad:]
        out_ref[...] = mm(u, W("fin_top")) + mm(v, W("fin_bot")) + Bv("fin_b")

    def act_spec(width):
        return pl.BlockSpec((tile_b, width), lambda i: (i, 0))

    def const_spec(a):
        return pl.BlockSpec(a.shape, lambda i: (0,) * a.ndim)

    inputs = [x_pad, t_sin, cond_packed, mask_packed] + list(w_slabs) + [b_slab]
    in_specs = ([act_spec(nf_pad), act_spec(t_pad), act_spec(cd_pad), act_spec(ce_pad)]
                + [const_spec(a) for a in w_slabs] + [const_spec(b_slab)])

    out_pad = pl.pallas_call(
        kernel,
        grid=(nb,),
        out_shape=jax.ShapeDtypeStruct((B_pad, nf_out_pad), jnp.float32),
        in_specs=in_specs,
        out_specs=pl.BlockSpec((tile_b, nf_out_pad), lambda i: (i, 0)),
        compiler_params=pltpu.CompilerParams(
            dimension_semantics=("parallel",),
            vmem_limit_bytes=32 * 1024 * 1024),
    )(*inputs)

    return out_pad[:B, :meta["nf"]]


# ----------------------------------------------------------------------------
# pure-JAX reference mirroring the PyTorch forward (for verification)
# ----------------------------------------------------------------------------
def forward_ref(p, x, t, conds, cond_masks, *, n_layers, time_embedding_dim,
                bf16_dots=False):
    def lin(x_, wb, relu=False):
        w, b = wb
        if bf16_dots:
            y = jnp.dot(x_.astype(jnp.bfloat16), w.astype(jnp.bfloat16),
                        preferred_element_type=jnp.float32) + b
        else:
            y = jnp.dot(x_, w, preferred_element_type=jnp.float32) + b
        return jnp.maximum(y, 0.0) if relu else y

    t_emb = get_sinusoidal_embedding(t, time_embedding_dim)
    t_emb = lin(t_emb, p["time_dense"], relu=True)
    embs = []
    for i, cond in enumerate(conds):
        e = lin(cond, p["cond_emb"][i], relu=True)
        if cond_masks is not None:
            m = cond_masks[i]
            if m.ndim == 1:
                m = m[:, None]
            e = e * m
        embs.append(e)
    cond_emb = jnp.concatenate(embs, axis=-1)
    h = jnp.concatenate([x, t_emb, cond_emb], axis=-1)
    h = lin(h, p["enc"][0], relu=True)
    skips = [h]
    for i in range(1, n_layers):
        h = jnp.maximum(lin(h, p["enc"][i]) + lin(t_emb, p["enc_tproj"][i - 1])
                        + lin(cond_emb, p["enc_cproj"][i - 1]), 0.0)
        skips.append(h)
    h = h + lin(t_emb, p["bott_tproj"]) + lin(cond_emb, p["bott_cproj"])
    h = lin(h, p["bottleneck"], relu=True)
    for i in range(n_layers):
        skip = skips[-(i + 1)]
        dec_in = jnp.concatenate([h, skip], axis=-1)
        dec_in = dec_in + lin(t_emb, p["dec_tproj"][i]) + lin(cond_emb, p["dec_cproj"][i])
        h = lin(h_ := dec_in, p["dec"][i], relu=True)
    fin = jnp.concatenate([h, x], axis=-1)
    fin = fin + lin(t_emb, p["final_tproj"]) + lin(cond_emb, p["final_cproj"])
    return lin(fin, p["out"])


# ----------------------------------------------------------------------------
# main
# ----------------------------------------------------------------------------
if __name__ == "__main__":
    B = 8
    NUM_FEATURES = 24
    COND_DIMS = [16, 10]
    COND_EMB_DIMS = [32, 32]          # fusion 'concat' -> total 64 (one 128-lane slab)
    INITIAL_SIZE = 256
    BOTTLENECK_SIZE = 32
    N_LAYERS = 4
    TIME_DIM = 128

    key = jax.random.PRNGKey(0)
    kp, kx, kt, kc1, kc2, km = jax.random.split(key, 6)

    params = init_params(
        kp, num_features=NUM_FEATURES, cond_dims=COND_DIMS,
        cond_embedding_dims=COND_EMB_DIMS, initial_size=INITIAL_SIZE,
        bottleneck_size=BOTTLENECK_SIZE, n_layers=N_LAYERS,
        time_embedding_dim=TIME_DIM)

    w_slabs, b_slab, meta = pack_params(
        params, num_features=NUM_FEATURES, cond_dims=COND_DIMS,
        cond_embedding_dims=COND_EMB_DIMS, bottleneck_size=BOTTLENECK_SIZE,
        n_layers=N_LAYERS, time_embedding_dim=TIME_DIM)

    x = jax.random.normal(kx, (B, NUM_FEATURES), jnp.float32)
    t = jax.random.randint(kt, (B,), 0, 1000)
    conds = [jax.random.normal(kc1, (B, COND_DIMS[0]), jnp.float32),
             jax.random.normal(kc2, (B, COND_DIMS[1]), jnp.float32)]
    cond_masks = [jnp.ones((B,), jnp.float32),
                  (jax.random.uniform(km, (B,)) > 0.5).astype(jnp.float32)]

    fwd = jax.jit(lambda ws, bs, x_, t_, conds_, masks_: forward_pallas(
        ws, bs, meta, x_, t_, conds_, masks_, time_embedding_dim=TIME_DIM))

    out = fwd(w_slabs, b_slab, x, t, conds, cond_masks)
    out = jax.block_until_ready(out)

    # reference with matching bf16 matmul precision (tight check)
    ref16 = forward_ref(params, x, t, conds, cond_masks,
                        n_layers=N_LAYERS, time_embedding_dim=TIME_DIM,
                        bf16_dots=True)
    # full-f32 reference (loose sanity check; only bf16 rounding differs)
    ref32 = forward_ref(params, x, t, conds, cond_masks,
                        n_layers=N_LAYERS, time_embedding_dim=TIME_DIM,
                        bf16_dots=False)

    assert out.shape == (B, NUM_FEATURES)
    assert jnp.allclose(out, ref16, rtol=1e-2, atol=1e-2), "mismatch vs bf16 reference"
    assert jnp.allclose(out, ref32, rtol=2e-1, atol=2e-1), "mismatch vs f32 reference"

    print("KERNEL_OK")
</pallas_src>

<mosaic_0001>
module attributes {stable_mosaic.version = 11 : i64} {
  func.func @kernel(%arg0: i32, %arg1: memref<8x128xf32, #tpu.memory_space<vmem>>, %arg2: memref<8x128xf32, #tpu.memory_space<vmem>>, %arg3: memref<8x128xf32, #tpu.memory_space<vmem>>, %arg4: memref<8x128xf32, #tpu.memory_space<vmem>>, %arg5: memref<2432x128xbf16, #tpu.memory_space<vmem>>, %arg6: memref<2304x256xbf16, #tpu.memory_space<vmem>>, %arg7: memref<512x384xbf16, #tpu.memory_space<vmem>>, %arg8: memref<256x512xbf16, #tpu.memory_space<vmem>>, %arg9: memref<24x512xf32, #tpu.memory_space<vmem>>, %arg10: memref<8x128xf32, #tpu.memory_space<vmem>>) attributes {dimension_semantics = [#tpu.dimension_semantics<parallel>], iteration_bounds = array<i64: 1>, scalar_prefetch = 0 : i64, scratch_operands = 0 : i64, tpu.core_type = #tpu.core_type<tc>, window_params = [{transform_indices = @transform_0, window_bounds = array<i64: 8, 128>}, {transform_indices = @transform_1, window_bounds = array<i64: 8, 128>}, {transform_indices = @transform_2, window_bounds = array<i64: 8, 128>}, {transform_indices = @transform_3, window_bounds = array<i64: 8, 128>}, {pipeline_mode = #tpu.pipeline_mode<synchronous>, transform_indices = @transform_4, window_bounds = array<i64: 2432, 128>}, {pipeline_mode = #tpu.pipeline_mode<synchronous>, transform_indices = @transform_5, window_bounds = array<i64: 2304, 256>}, {pipeline_mode = #tpu.pipeline_mode<synchronous>, transform_indices = @transform_6, window_bounds = array<i64: 512, 384>}, {pipeline_mode = #tpu.pipeline_mode<synchronous>, transform_indices = @transform_7, window_bounds = array<i64: 256, 512>}, {pipeline_mode = #tpu.pipeline_mode<synchronous>, transform_indices = @transform_8, window_bounds = array<i64: 24, 512>}, {transform_indices = @transform_9, window_bounds = array<i64: 8, 128>}]} {
    %c0 = arith.constant 0 : index
    %c0_0 = arith.constant 0 : index
    %0 = vector.load %arg1[%c0, %c0_0] : memref<8x128xf32, #tpu.memory_space<vmem>>, vector<8x128xf32>
    %c0_1 = arith.constant 0 : index
    %c0_2 = arith.constant 0 : index
    %1 = vector.load %arg2[%c0_1, %c0_2] : memref<8x128xf32, #tpu.memory_space<vmem>>, vector<8x128xf32>
    %c0_3 = arith.constant 0 : index
    %c0_4 = arith.constant 0 : index
    %2 = vector.load %arg5[%c0_3, %c0_4] : memref<2432x128xbf16, #tpu.memory_space<vmem>>, vector<128x128xbf16>
    %3 = arith.truncf %1 : vector<8x128xf32> to vector<8x128xbf16>
    %cst = arith.constant dense<0.000000e+00> : vector<8x128xf32>
    %4 = tpu.matmul %3, %2, %cst {dimension_numbers = #tpu.dot_dimension_numbers<[1], [0], [0], [1], [0, 0, 1, 1], [], []>} : vector<8x128xbf16>, vector<128x128xbf16>, vector<8x128xf32> -> vector<8x128xf32>
    %c0_5 = arith.constant 0 : index
    %c0_6 = arith.constant 0 : index
    %5 = vector.load %arg9[%c0_5, %c0_6] : memref<24x512xf32, #tpu.memory_space<vmem>>, vector<1x128xf32>
    %6 = vector.broadcast %5 : vector<1x128xf32> to vector<8x128xf32>
    %7 = arith.addf %4, %6 : vector<8x128xf32>
    %cst_7 = arith.constant 0.000000e+00 : f32
    %8 = vector.broadcast %cst_7 : f32 to vector<8x128xf32>
    %9 = arith.maximumf %7, %8 : vector<8x128xf32>
    %c0_8 = arith.constant 0 : index
    %c0_9 = arith.constant 0 : index
    %10 = vector.load %arg3[%c0_8, %c0_9] : memref<8x128xf32, #tpu.memory_space<vmem>>, vector<8x128xf32>
    %c128 = arith.constant 128 : index
    %c0_10 = arith.constant 0 : index
    %11 = vector.load %arg5[%c128, %c0_10] : memref<2432x128xbf16, #tpu.memory_space<vmem>>, vector<128x128xbf16>
    %12 = arith.truncf %10 : vector<8x128xf32> to vector<8x128xbf16>
    %cst_11 = arith.constant dense<0.000000e+00> : vector<8x128xf32>
    %13 = tpu.matmul %12, %11, %cst_11 {dimension_numbers = #tpu.dot_dimension_numbers<[1], [0], [0], [1], [0, 0, 1, 1], [], []>} : vector<8x128xbf16>, vector<128x128xbf16>, vector<8x128xf32> -> vector<8x128xf32>
    %c1 = arith.constant 1 : index
    %c0_12 = arith.constant 0 : index
    %14 = vector.load %arg9[%c1, %c0_12] : memref<24x512xf32, #tpu.memory_space<vmem>>, vector<1x128xf32>
    %15 = vector.broadcast %14 : vector<1x128xf32> to vector<8x128xf32>
    %16 = arith.addf %13, %15 : vector<8x128xf32>
    %cst_13 = arith.constant 0.000000e+00 : f32
    %17 = vector.broadcast %cst_13 : f32 to vector<8x128xf32>
    %18 = arith.maximumf %16, %17 : vector<8x128xf32>
    %c0_14 = arith.constant 0 : index
    %c0_15 = arith.constant 0 : index
    %19 = vector.load %arg4[%c0_14, %c0_15] : memref<8x128xf32, #tpu.memory_space<vmem>>, vector<8x128xf32>
    %20 = arith.mulf %18, %19 : vector<8x128xf32>
    %21 = arith.truncf %9 : vector<8x128xf32> to vector<8x128xbf16>
    %22 = arith.truncf %20 : vector<8x128xf32> to vector<8x128xbf16>
    %23 = tpu.concatenate %21, %22 in 1 : vector<8x128xbf16>, vector<8x128xbf16> -> vector<8x256xbf16>
    %c0_16 = arith.constant 0 : index
    %c0_17 = arith.constant 0 : index
    %24 = vector.load %arg6[%c0_16, %c0_17] : memref<2304x256xbf16, #tpu.memory_space<vmem>>, vector<128x256xbf16>
    %25 = arith.truncf %0 : vector<8x128xf32> to vector<8x128xbf16>
    %cst_18 = arith.constant dense<0.000000e+00> : vector<8x256xf32>
    %26 = tpu.matmul %25, %24, %cst_18 {dimension_numbers = #tpu.dot_dimension_numbers<[1], [0], [0], [1], [0, 0, 1, 1], [], []>} : vector<8x128xbf16>, vector<128x256xbf16>, vector<8x256xf32> -> vector<8x256xf32>
    %c128_19 = arith.constant 128 : index
    %c0_20 = arith.constant 0 : index
    %27 = vector.load %arg6[%c128_19, %c0_20] : memref<2304x256xbf16, #tpu.memory_space<vmem>>, vector<256x256xbf16>
    %cst_21 = arith.constant dense<0.000000e+00> : vector<8x256xf32>
    %28 = tpu.matmul %23, %27, %cst_21 {dimension_numbers = #tpu.dot_dimension_numbers<[1], [0], [0], [1], [0, 0, 1, 1], [], []>} : vector<8x256xbf16>, vector<256x256xbf16>, vector<8x256xf32> -> vector<8x256xf32>
    %29 = arith.addf %26, %28 : vector<8x256xf32>
    %c2 = arith.constant 2 : index
    %c0_22 = arith.constant 0 : index
    %30 = vector.load %arg9[%c2, %c0_22] : memref<24x512xf32, #tpu.memory_space<vmem>>, vector<1x256xf32>
    %31 = vector.broadcast %30 : vector<1x256xf32> to vector<8x256xf32>
    %32 = arith.addf %29, %31 : vector<8x256xf32>
    %cst_23 = arith.constant 0.000000e+00 : f32
    %33 = vector.broadcast %cst_23 : f32 to vector<8x256xf32>
    %34 = arith.maximumf %32, %33 : vector<8x256xf32>
    %c384 = arith.constant 384 : index
    %c0_24 = arith.constant 0 : index
    %35 = vector.load %arg6[%c384, %c0_24] : memref<2304x256xbf16, #tpu.memory_space<vmem>>, vector<256x256xbf16>
    %36 = arith.truncf %34 : vector<8x256xf32> to vector<8x256xbf16>
    %cst_25 = arith.constant dense<0.000000e+00> : vector<8x256xf32>
    %37 = tpu.matmul %36, %35, %cst_25 {dimension_numbers = #tpu.dot_dimension_numbers<[1], [0], [0], [1], [0, 0, 1, 1], [], []>} : vector<8x256xbf16>, vector<256x256xbf16>, vector<8x256xf32> -> vector<8x256xf32>
    %c640 = arith.constant 640 : index
    %c0_26 = arith.constant 0 : index
    %38 = vector.load %arg6[%c640, %c0_26] : memref<2304x256xbf16, #tpu.memory_space<vmem>>, vector<256x256xbf16>
    %cst_27 = arith.constant dense<0.000000e+00> : vector<8x256xf32>
    %39 = tpu.matmul %23, %38, %cst_27 {dimension_numbers = #tpu.dot_dimension_numbers<[1], [0], [0], [1], [0, 0, 1, 1], [], []>} : vector<8x256xbf16>, vector<256x256xbf16>, vector<8x256xf32> -> vector<8x256xf32>
    %40 = arith.addf %37, %39 : vector<8x256xf32>
    %c3 = arith.constant 3 : index
    %c0_28 = arith.constant 0 : index
    %41 = vector.load %arg9[%c3, %c0_28] : memref<24x512xf32, #tpu.memory_space<vmem>>, vector<1x256xf32>
    %42 = vector.broadcast %41 : vector<1x256xf32> to vector<8x256xf32>
    %43 = arith.addf %40, %42 : vector<8x256xf32>
    %cst_29 = arith.constant 0.000000e+00 : f32
    %44 = vector.broadcast %cst_29 : f32 to vector<8x256xf32>
    %45 = arith.maximumf %43, %44 : vector<8x256xf32>
    %c256 = arith.constant 256 : index
    %c0_30 = arith.constant 0 : index
    %46 = vector.load %arg5[%c256, %c0_30] : memref<2432x128xbf16, #tpu.memory_space<vmem>>, vector<256x128xbf16>
    %47 = arith.truncf %45 : vector<8x256xf32> to vector<8x256xbf16>
    %cst_31 = arith.constant dense<0.000000e+00> : vector<8x128xf32>
    %48 = tpu.matmul %47, %46, %cst_31 {dimension_numbers = #tpu.dot_dimension_numbers<[1], [0], [0], [1], [0, 0, 1, 1], [], []>} : vector<8x256xbf16>, vector<256x128xbf16>, vector<8x128xf32> -> vector<8x128xf32>
    %c512 = arith.constant 512 : index
    %c0_32 = arith.constant 0 : index
    %49 = vector.load %arg5[%c512, %c0_32] : memref<2432x128xbf16, #tpu.memory_space<vmem>>, vector<256x128xbf16>
    %cst_33 = arith.constant dense<0.000000e+00> : vector<8x128xf32>
    %50 = tpu.matmul %23, %49, %cst_33 {dimension_numbers = #tpu.dot_dimension_numbers<[1], [0], [0], [1], [0, 0, 1, 1], [], []>} : vector<8x256xbf16>, vector<256x128xbf16>, vector<8x128xf32> -> vector<8x128xf32>
    %51 = arith.addf %48, %50 : vector<8x128xf32>
    %c4 = arith.constant 4 : index
    %c0_34 = arith.constant 0 : index
    %52 = vector.load %arg9[%c4, %c0_34] : memref<24x512xf32, #tpu.memory_space<vmem>>, vector<1x128xf32>
    %53 = vector.broadcast %52 : vector<1x128xf32> to vector<8x128xf32>
    %54 = arith.addf %51, %53 : vector<8x128xf32>
    %cst_35 = arith.constant 0.000000e+00 : f32
    %55 = vector.broadcast %cst_35 : f32 to vector<8x128xf32>
    %56 = arith.maximumf %54, %55 : vector<8x128xf32>
    %c768 = arith.constant 768 : index
    %c0_36 = arith.constant 0 : index
    %57 = vector.load %arg5[%c768, %c0_36] : memref<2432x128xbf16, #tpu.memory_space<vmem>>, vector<128x128xbf16>
    %58 = arith.truncf %56 : vector<8x128xf32> to vector<8x128xbf16>
    %cst_37 = arith.constant dense<0.000000e+00> : vector<8x128xf32>
    %59 = tpu.matmul %58, %57, %cst_37 {dimension_numbers = #tpu.dot_dimension_numbers<[1], [0], [0], [1], [0, 0, 1, 1], [], []>} : vector<8x128xbf16>, vector<128x128xbf16>, vector<8x128xf32> -> vector<8x128xf32>
    %c896 = arith.constant 896 : index
    %c0_38 = arith.constant 0 : index
    %60 = vector.load %arg5[%c896, %c0_38] : memref<2432x128xbf16, #tpu.memory_space<vmem>>, vector<256x128xbf16>
    %cst_39 = arith.constant dense<0.000000e+00> : vector<8x128xf32>
    %61 = tpu.matmul %23, %60, %cst_39 {dimension_numbers = #tpu.dot_dimension_numbers<[1], [0], [0], [1], [0, 0, 1, 1], [], []>} : vector<8x256xbf16>, vector<256x128xbf16>, vector<8x128xf32> -> vector<8x128xf32>
    %62 = arith.addf %59, %61 : vector<8x128xf32>
    %c5 = arith.constant 5 : index
    %c0_40 = arith.constant 0 : index
    %63 = vector.load %arg9[%c5, %c0_40] : memref<24x512xf32, #tpu.memory_space<vmem>>, vector<1x128xf32>
    %64 = vector.broadcast %63 : vector<1x128xf32> to vector<8x128xf32>
    %65 = arith.addf %62, %64 : vector<8x128xf32>
    %cst_41 = arith.constant 0.000000e+00 : f32
    %66 = vector.broadcast %cst_41 : f32 to vector<8x128xf32>
    %67 = arith.maximumf %65, %66 : vector<8x128xf32>
    %c1152 = arith.constant 1152 : index
    %c0_42 = arith.constant 0 : index
    %68 = vector.load %arg5[%c1152, %c0_42] : memref<2432x128xbf16, #tpu.memory_space<vmem>>, vector<256x128xbf16>
    %cst_43 = arith.constant dense<0.000000e+00> : vector<8x128xf32>
    %69 = tpu.matmul %23, %68, %cst_43 {dimension_numbers = #tpu.dot_dimension_numbers<[1], [0], [0], [1], [0, 0, 1, 1], [], []>} : vector<8x256xbf16>, vector<256x128xbf16>, vector<8x128xf32> -> vector<8x128xf32>
    %70 = arith.addf %67, %69 : vector<8x128xf32>
    %c6 = arith.constant 6 : index
    %c0_44 = arith.constant 0 : index
    %71 = vector.load %arg9[%c6, %c0_44] : memref<24x512xf32, #tpu.memory_space<vmem>>, vector<1x128xf32>
    %72 = vector.broadcast %71 : vector<1x128xf32> to vector<8x128xf32>
    %73 = arith.addf %70, %72 : vector<8x128xf32>
    %c1408 = arith.constant 1408 : index
    %c0_45 = arith.constant 0 : index
    %74 = vector.load %arg5[%c1408, %c0_45] : memref<2432x128xbf16, #tpu.memory_space<vmem>>, vector<128x128xbf16>
    %75 = arith.truncf %73 : vector<8x128xf32> to vector<8x128xbf16>
    %cst_46 = arith.constant dense<0.000000e+00> : vector<8x128xf32>
    %76 = tpu.matmul %75, %74, %cst_46 {dimension_numbers = #tpu.dot_dimension_numbers<[1], [0], [0], [1], [0, 0, 1, 1], [], []>} : vector<8x128xbf16>, vector<128x128xbf16>, vector<8x128xf32> -> vector<8x128xf32>
    %c7 = arith.constant 7 : index
    %c0_47 = arith.constant 0 : index
    %77 = vector.load %arg9[%c7, %c0_47] : memref<24x512xf32, #tpu.memory_space<vmem>>, vector<1x128xf32>
    %78 = vector.broadcast %77 : vector<1x128xf32> to vector<8x128xf32>
    %79 = arith.addf %76, %78 : vector<8x128xf32>
    %cst_48 = arith.constant 0.000000e+00 : f32
    %80 = vector.broadcast %cst_48 : f32 to vector<8x128xf32>
    %81 = arith.maximumf %79, %80 : vector<8x128xf32>
    %c896_49 = arith.constant 896 : index
    %c0_50 = arith.constant 0 : index
    %82 = vector.load %arg6[%c896_49, %c0_50] : memref<2304x256xbf16, #tpu.memory_space<vmem>>, vector<256x256xbf16>
    %cst_51 = arith.constant dense<0.000000e+00> : vector<8x256xf32>
    %83 = tpu.matmul %23, %82, %cst_51 {dimension_numbers = #tpu.dot_dimension_numbers<[1], [0], [0], [1], [0, 0, 1, 1], [], []>} : vector<8x256xbf16>, vector<256x256xbf16>, vector<8x256xf32> -> vector<8x256xf32>
    %c8 = arith.constant 8 : index
    %c0_52 = arith.constant 0 : index
    %84 = vector.load %arg9[%c8, %c0_52] : memref<24x512xf32, #tpu.memory_space<vmem>>, vector<1x256xf32>
    %85 = vector.broadcast %84 : vector<1x256xf32> to vector<8x256xf32>
    %86 = arith.addf %83, %85 : vector<8x256xf32>
    %87 = vector.extract_strided_slice %86 {offsets = [0, 0], sizes = [8, 128], strides = [1, 1]} : vector<8x256xf32> to vector<8x128xf32>
    %88 = arith.addf %81, %87 : vector<8x128xf32>
    %89 = vector.extract_strided_slice %86 {offsets = [0, 128], sizes = [8, 128], strides = [1, 1]} : vector<8x256xf32> to vector<8x128xf32>
    %90 = arith.addf %67, %89 : vector<8x128xf32>
    %c1536 = arith.constant 1536 : index
    %c0_53 = arith.constant 0 : index
    %91 = vector.load %arg5[%c1536, %c0_53] : memref<2432x128xbf16, #tpu.memory_space<vmem>>, vector<128x128xbf16>
    %92 = arith.truncf %88 : vector<8x128xf32> to vector<8x128xbf16>
    %cst_54 = arith.constant dense<0.000000e+00> : vector<8x128xf32>
    %93 = tpu.matmul %92, %91, %cst_54 {dimension_numbers = #tpu.dot_dimension_numbers<[1], [0], [0], [1], [0, 0, 1, 1], [], []>} : vector<8x128xbf16>, vector<128x128xbf16>, vector<8x128xf32> -> vector<8x128xf32>
    %c1664 = arith.constant 1664 : index
    %c0_55 = arith.constant 0 : index
    %94 = vector.load %arg5[%c1664, %c0_55] : memref<2432x128xbf16, #tpu.memory_space<vmem>>, vector<128x128xbf16>
    %95 = arith.truncf %90 : vector<8x128xf32> to vector<8x128xbf16>
    %cst_56 = arith.constant dense<0.000000e+00> : vector<8x128xf32>
    %96 = tpu.matmul %95, %94, %cst_56 {dimension_numbers = #tpu.dot_dimension_numbers<[1], [0], [0], [1], [0, 0, 1, 1], [], []>} : vector<8x128xbf16>, vector<128x128xbf16>, vector<8x128xf32> -> vector<8x128xf32>
    %97 = arith.addf %93, %96 : vector<8x128xf32>
    %c9 = arith.constant 9 : index
    %c0_57 = arith.constant 0 : index
    %98 = vector.load %arg9[%c9, %c0_57] : memref<24x512xf32, #tpu.memory_space<vmem>>, vector<1x128xf32>
    %99 = vector.broadcast %98 : vector<1x128xf32> to vector<8x128xf32>
    %100 = arith.addf %97, %99 : vector<8x128xf32>
    %cst_58 = arith.constant 0.000000e+00 : f32
    %101 = vector.broadcast %cst_58 : f32 to vector<8x128xf32>
    %102 = arith.maximumf %100, %101 : vector<8x128xf32>
    %c1152_59 = arith.constant 1152 : index
    %c0_60 = arith.constant 0 : index
    %103 = vector.load %arg6[%c1152_59, %c0_60] : memref<2304x256xbf16, #tpu.memory_space<vmem>>, vector<256x256xbf16>
    %cst_61 = arith.constant dense<0.000000e+00> : vector<8x256xf32>
    %104 = tpu.matmul %23, %103, %cst_61 {dimension_numbers = #tpu.dot_dimension_numbers<[1], [0], [0], [1], [0, 0, 1, 1], [], []>} : vector<8x256xbf16>, vector<256x256xbf16>, vector<8x256xf32> -> vector<8x256xf32>
    %c10 = arith.constant 10 : index
    %c0_62 = arith.constant 0 : index
    %105 = vector.load %arg9[%c10, %c0_62] : memref<24x512xf32, #tpu.memory_space<vmem>>, vector<1x256xf32>
    %106 = vector.broadcast %105 : vector<1x256xf32> to vector<8x256xf32>
    %107 = arith.addf %104, %106 : vector<8x256xf32>
    %108 = vector.extract_strided_slice %107 {offsets = [0, 0], sizes = [8, 128], strides = [1, 1]} : vector<8x256xf32> to vector<8x128xf32>
    %109 = arith.addf %102, %108 : vector<8x128xf32>
    %110 = vector.extract_strided_slice %107 {offsets = [0, 128], sizes = [8, 128], strides = [1, 1]} : vector<8x256xf32> to vector<8x128xf32>
    %111 = arith.addf %56, %110 : vector<8x128xf32>
    %c1792 = arith.constant 1792 : index
    %c0_63 = arith.constant 0 : index
    %112 = vector.load %arg5[%c1792, %c0_63] : memref<2432x128xbf16, #tpu.memory_space<vmem>>, vector<128x128xbf16>
    %113 = arith.truncf %109 : vector<8x128xf32> to vector<8x128xbf16>
    %cst_64 = arith.constant dense<0.000000e+00> : vector<8x128xf32>
    %114 = tpu.matmul %113, %112, %cst_64 {dimension_numbers = #tpu.dot_dimension_numbers<[1], [0], [0], [1], [0, 0, 1, 1], [], []>} : vector<8x128xbf16>, vector<128x128xbf16>, vector<8x128xf32> -> vector<8x128xf32>
    %c1920 = arith.constant 1920 : index
    %c0_65 = arith.constant 0 : index
    %115 = vector.load %arg5[%c1920, %c0_65] : memref<2432x128xbf16, #tpu.memory_space<vmem>>, vector<128x128xbf16>
    %116 = arith.truncf %111 : vector<8x128xf32> to vector<8x128xbf16>
    %cst_66 = arith.constant dense<0.000000e+00> : vector<8x128xf32>
    %117 = tpu.matmul %116, %115, %cst_66 {dimension_numbers = #tpu.dot_dimension_numbers<[1], [0], [0], [1], [0, 0, 1, 1], [], []>} : vector<8x128xbf16>, vector<128x128xbf16>, vector<8x128xf32> -> vector<8x128xf32>
    %118 = arith.addf %114, %117 : vector<8x128xf32>
    %c11 = arith.constant 11 : index
    %c0_67 = arith.constant 0 : index
    %119 = vector.load %arg9[%c11, %c0_67] : memref<24x512xf32, #tpu.memory_space<vmem>>, vector<1x128xf32>
    %120 = vector.broadcast %119 : vector<1x128xf32> to vector<8x128xf32>
    %121 = arith.addf %118, %120 : vector<8x128xf32>
    %cst_68 = arith.constant 0.000000e+00 : f32
    %122 = vector.broadcast %cst_68 : f32 to vector<8x128xf32>
    %123 = arith.maximumf %121, %122 : vector<8x128xf32>
    %c0_69 = arith.constant 0 : index
    %c0_70 = arith.constant 0 : index
    %124 = vector.load %arg7[%c0_69, %c0_70] : memref<512x384xbf16, #tpu.memory_space<vmem>>, vector<256x384xbf16>
    %cst_71 = arith.constant dense<0.000000e+00> : vector<8x384xf32>
    %125 = tpu.matmul %23, %124, %cst_71 {dimension_numbers = #tpu.dot_dimension_numbers<[1], [0], [0], [1], [0, 0, 1, 1], [], []>} : vector<8x256xbf16>, vector<256x384xbf16>, vector<8x384xf32> -> vector<8x384xf32>
    %c12 = arith.constant 12 : index
    %c0_72 = arith.constant 0 : index
    %126 = vector.load %arg9[%c12, %c0_72] : memref<24x512xf32, #tpu.memory_space<vmem>>, vector<1x384xf32>
    %127 = vector.broadcast %126 : vector<1x384xf32> to vector<8x384xf32>
    %128 = arith.addf %125, %127 : vector<8x384xf32>
    %129 = vector.extract_strided_slice %128 {offsets = [0, 0], sizes = [8, 128], strides = [1, 1]} : vector<8x384xf32> to vector<8x128xf32>
    %130 = arith.addf %123, %129 : vector<8x128xf32>
    %131 = vector.extract_strided_slice %128 {offsets = [0, 128], sizes = [8, 256], strides = [1, 1]} : vector<8x384xf32> to vector<8x256xf32>
    %132 = arith.addf %45, %131 : vector<8x256xf32>
    %c1408_73 = arith.constant 1408 : index
    %c0_74 = arith.constant 0 : index
    %133 = vector.load %arg6[%c1408_73, %c0_74] : memref<2304x256xbf16, #tpu.memory_space<vmem>>, vector<128x256xbf16>
    %134 = arith.truncf %130 : vector<8x128xf32> to vector<8x128xbf16>
    %cst_75 = arith.constant dense<0.000000e+00> : vector<8x256xf32>
    %135 = tpu.matmul %134, %133, %cst_75 {dimension_numbers = #tpu.dot_dimension_numbers<[1], [0], [0], [1], [0, 0, 1, 1], [], []>} : vector<8x128xbf16>, vector<128x256xbf16>, vector<8x256xf32> -> vector<8x256xf32>
    %c1536_76 = arith.constant 1536 : index
    %c0_77 = arith.constant 0 : index
    %136 = vector.load %arg6[%c1536_76, %c0_77] : memref<2304x256xbf16, #tpu.memory_space<vmem>>, vector<256x256xbf16>
    %137 = arith.truncf %132 : vector<8x256xf32> to vector<8x256xbf16>
    %cst_78 = arith.constant dense<0.000000e+00> : vector<8x256xf32>
    %138 = tpu.matmul %137, %136, %cst_78 {dimension_numbers = #tpu.dot_dimension_numbers<[1], [0], [0], [1], [0, 0, 1, 1], [], []>} : vector<8x256xbf16>, vector<256x256xbf16>, vector<8x256xf32> -> vector<8x256xf32>
    %139 = arith.addf %135, %138 : vector<8x256xf32>
    %c13 = arith.constant 13 : index
    %c0_79 = arith.constant 0 : index
    %140 = vector.load %arg9[%c13, %c0_79] : memref<24x512xf32, #tpu.memory_space<vmem>>, vector<1x256xf32>
    %141 = vector.broadcast %140 : vector<1x256xf32> to vector<8x256xf32>
    %142 = arith.addf %139, %141 : vector<8x256xf32>
    %cst_80 = arith.constant 0.000000e+00 : f32
    %143 = vector.broadcast %cst_80 : f32 to vector<8x256xf32>
    %144 = arith.maximumf %142, %143 : vector<8x256xf32>
    %c0_81 = arith.constant 0 : index
    %c0_82 = arith.constant 0 : index
    %145 = vector.load %arg8[%c0_81, %c0_82] : memref<256x512xbf16, #tpu.memory_space<vmem>>, vector<256x512xbf16>
    %cst_83 = arith.constant dense<0.000000e+00> : vector<8x512xf32>
    %146 = tpu.matmul %23, %145, %cst_83 {dimension_numbers = #tpu.dot_dimension_numbers<[1], [0], [0], [1], [0, 0, 1, 1], [], []>} : vector<8x256xbf16>, vector<256x512xbf16>, vector<8x512xf32> -> vector<8x512xf32>
    %c14 = arith.constant 14 : index
    %c0_84 = arith.constant 0 : index
    %147 = vector.load %arg9[%c14, %c0_84] : memref<24x512xf32, #tpu.memory_space<vmem>>, vector<1x512xf32>
    %148 = vector.broadcast %147 : vector<1x512xf32> to vector<8x512xf32>
    %149 = arith.addf %146, %148 : vector<8x512xf32>
    %150 = vector.extract_strided_slice %149 {offsets = [0, 0], sizes = [8, 256], strides = [1, 1]} : vector<8x512xf32> to vector<8x256xf32>
    %151 = arith.addf %144, %150 : vector<8x256xf32>
    %152 = vector.extract_strided_slice %149 {offsets = [0, 256], sizes = [8, 256], strides = [1, 1]} : vector<8x512xf32> to vector<8x256xf32>
    %153 = arith.addf %34, %152 : vector<8x256xf32>
    %c1792_85 = arith.constant 1792 : index
    %c0_86 = arith.constant 0 : index
    %154 = vector.load %arg6[%c1792_85, %c0_86] : memref<2304x256xbf16, #tpu.memory_space<vmem>>, vector<256x256xbf16>
    %155 = arith.truncf %151 : vector<8x256xf32> to vector<8x256xbf16>
    %cst_87 = arith.constant dense<0.000000e+00> : vector<8x256xf32>
    %156 = tpu.matmul %155, %154, %cst_87 {dimension_numbers = #tpu.dot_dimension_numbers<[1], [0], [0], [1], [0, 0, 1, 1], [], []>} : vector<8x256xbf16>, vector<256x256xbf16>, vector<8x256xf32> -> vector<8x256xf32>
    %c2048 = arith.constant 2048 : index
    %c0_88 = arith.constant 0 : index
    %157 = vector.load %arg6[%c2048, %c0_88] : memref<2304x256xbf16, #tpu.memory_space<vmem>>, vector<256x256xbf16>
    %158 = arith.truncf %153 : vector<8x256xf32> to vector<8x256xbf16>
    %cst_89 = arith.constant dense<0.000000e+00> : vector<8x256xf32>
    %159 = tpu.matmul %158, %157, %cst_89 {dimension_numbers = #tpu.dot_dimension_numbers<[1], [0], [0], [1], [0, 0, 1, 1], [], []>} : vector<8x256xbf16>, vector<256x256xbf16>, vector<8x256xf32> -> vector<8x256xf32>
    %160 = arith.addf %156, %159 : vector<8x256xf32>
    %c15 = arith.constant 15 : index
    %c0_90 = arith.constant 0 : index
    %161 = vector.load %arg9[%c15, %c0_90] : memref<24x512xf32, #tpu.memory_space<vmem>>, vector<1x256xf32>
    %162 = vector.broadcast %161 : vector<1x256xf32> to vector<8x256xf32>
    %163 = arith.addf %160, %162 : vector<8x256xf32>
    %cst_91 = arith.constant 0.000000e+00 : f32
    %164 = vector.broadcast %cst_91 : f32 to vector<8x256xf32>
    %165 = arith.maximumf %163, %164 : vector<8x256xf32>
    %c256_92 = arith.constant 256 : index
    %c0_93 = arith.constant 0 : index
    %166 = vector.load %arg7[%c256_92, %c0_93] : memref<512x384xbf16, #tpu.memory_space<vmem>>, vector<256x384xbf16>
    %cst_94 = arith.constant dense<0.000000e+00> : vector<8x384xf32>
    %167 = tpu.matmul %23, %166, %cst_94 {dimension_numbers = #tpu.dot_dimension_numbers<[1], [0], [0], [1], [0, 0, 1, 1], [], []>} : vector<8x256xbf16>, vector<256x384xbf16>, vector<8x384xf32> -> vector<8x384xf32>
    %c16 = arith.constant 16 : index
    %c0_95 = arith.constant 0 : index
    %168 = vector.load %arg9[%c16, %c0_95] : memref<24x512xf32, #tpu.memory_space<vmem>>, vector<1x384xf32>
    %169 = vector.broadcast %168 : vector<1x384xf32> to vector<8x384xf32>
    %170 = arith.addf %167, %169 : vector<8x384xf32>
    %171 = vector.extract_strided_slice %170 {offsets = [0, 0], sizes = [8, 256], strides = [1, 1]} : vector<8x384xf32> to vector<8x256xf32>
    %172 = arith.addf %165, %171 : vector<8x256xf32>
    %173 = vector.extract_strided_slice %170 {offsets = [0, 256], sizes = [8, 128], strides = [1, 1]} : vector<8x384xf32> to vector<8x128xf32>
    %174 = arith.addf %0, %173 : vector<8x128xf32>
    %c2048_96 = arith.constant 2048 : index
    %c0_97 = arith.constant 0 : index
    %175 = vector.load %arg5[%c2048_96, %c0_97] : memref<2432x128xbf16, #tpu.memory_space<vmem>>, vector<256x128xbf16>
    %176 = arith.truncf %172 : vector<8x256xf32> to vector<8x256xbf16>
    %cst_98 = arith.constant dense<0.000000e+00> : vector<8x128xf32>
    %177 = tpu.matmul %176, %175, %cst_98 {dimension_numbers = #tpu.dot_dimension_numbers<[1], [0], [0], [1], [0, 0, 1, 1], [], []>} : vector<8x256xbf16>, vector<256x128xbf16>, vector<8x128xf32> -> vector<8x128xf32>
    %c2304 = arith.constant 2304 : index
    %c0_99 = arith.constant 0 : index
    %178 = vector.load %arg5[%c2304, %c0_99] : memref<2432x128xbf16, #tpu.memory_space<vmem>>, vector<128x128xbf16>
    %179 = arith.truncf %174 : vector<8x128xf32> to vector<8x128xbf16>
    %cst_100 = arith.constant dense<0.000000e+00> : vector<8x128xf32>
    %180 = tpu.matmul %179, %178, %cst_100 {dimension_numbers = #tpu.dot_dimension_numbers<[1], [0], [0], [1], [0, 0, 1, 1], [], []>} : vector<8x128xbf16>, vector<128x128xbf16>, vector<8x128xf32> -> vector<8x128xf32>
    %181 = arith.addf %177, %180 : vector<8x128xf32>
    %c17 = arith.constant 17 : index
    %c0_101 = arith.constant 0 : index
    %182 = vector.load %arg9[%c17, %c0_101] : memref<24x512xf32, #tpu.memory_space<vmem>>, vector<1x128xf32>
    %183 = vector.broadcast %182 : vector<1x128xf32> to vector<8x128xf32>
    %184 = arith.addf %181, %183 : vector<8x128xf32>
    %c0_102 = arith.constant 0 : index
    %c0_103 = arith.constant 0 : index
    %185 = vector.load %arg10[%c0_102, %c0_103] : memref<8x128xf32, #tpu.memory_space<vmem>>, vector<8x128xf32>
    tpu.vector_store %arg10[%c0_102, %c0_103], %184 {strides = array<i32>} : memref<8x128xf32, #tpu.memory_space<vmem>>, vector<8x128xf32>,
    return
  }
  func.func @transform_0(%arg0: i32) -> (i32, i32) {
    %c0_i32 = arith.constant 0 : i32
    %c0_i32_0 = arith.constant 0 : i32
    return %arg0, %c0_i32 : i32, i32
  }
  func.func @transform_1(%arg0: i32) -> (i32, i32) {
    %c0_i32 = arith.constant 0 : i32
    %c0_i32_0 = arith.constant 0 : i32
    return %arg0, %c0_i32 : i32, i32
  }
  func.func @transform_2(%arg0: i32) -> (i32, i32) {
    %c0_i32 = arith.constant 0 : i32
    %c0_i32_0 = arith.constant 0 : i32
    return %arg0, %c0_i32 : i32, i32
  }
  func.func @transform_3(%arg0: i32) -> (i32, i32) {
    %c0_i32 = arith.constant 0 : i32
    %c0_i32_0 = arith.constant 0 : i32
    return %arg0, %c0_i32 : i32, i32
  }
  func.func @transform_4(%arg0: i32) -> (i32, i32) {
    %c0_i32 = arith.constant 0 : i32
    %c0_i32_0 = arith.constant 0 : i32
    %c0_i32_1 = arith.constant 0 : i32
    return %c0_i32, %c0_i32_0 : i32, i32
  }
  func.func @transform_5(%arg0: i32) -> (i32, i32) {
    %c0_i32 = arith.constant 0 : i32
    %c0_i32_0 = arith.constant 0 : i32
    %c0_i32_1 = arith.constant 0 : i32
    return %c0_i32, %c0_i32_0 : i32, i32
  }
  func.func @transform_6(%arg0: i32) -> (i32, i32) {
    %c0_i32 = arith.constant 0 : i32
    %c0_i32_0 = arith.constant 0 : i32
    %c0_i32_1 = arith.constant 0 : i32
    return %c0_i32, %c0_i32_0 : i32, i32
  }
  func.func @transform_7(%arg0: i32) -> (i32, i32) {
    %c0_i32 = arith.constant 0 : i32
    %c0_i32_0 = arith.constant 0 : i32
    %c0_i32_1 = arith.constant 0 : i32
    return %c0_i32, %c0_i32_0 : i32, i32
  }
  func.func @transform_8(%arg0: i32) -> (i32, i32) {
    %c0_i32 = arith.constant 0 : i32
    %c0_i32_0 = arith.constant 0 : i32
    %c0_i32_1 = arith.constant 0 : i32
    return %c0_i32, %c0_i32_0 : i32, i32
  }
  func.func @transform_9(%arg0: i32) -> (i32, i32) {
    %c0_i32 = arith.constant 0 : i32
    %c0_i32_0 = arith.constant 0 : i32
    return %arg0, %c0_i32 : i32, i32
  }
}

</mosaic_0001>

<bundles_post_ra>
// kernel: _lambda_.1
= control target key start
LH: loop header
LB: loop body
LE: loop exit
PB: predicated region body
PF: predicated region fallthrough
CT: control target
= control target key end

     0   :  { %14 = vsyncpa [#allocation3], 0  ;;  %s8667_s0 = inlined_call_operand.vmem [shape: f32[8,128], index: 0, kind: input, shape index: {}]   ;;  %s8668_s1 = inlined_call_operand.vmem [shape: f32[8,128], index: 1, kind: input, shape index: {}]   ;;  %s8669_s2 = inlined_call_operand.vmem [shape: f32[8,128], index: 2, kind: input, shape index: {}]   ;;  %s8670_s3 = inlined_call_operand.vmem [shape: f32[8,128], index: 3, kind: input, shape index: {}]   ;;  %s8671_s4 = inlined_call_operand.hbm [shape: bf16[2432,128], index: 4, kind: input, shape index: {}]   ;;  %s8672_s5 = inlined_call_operand.hbm [shape: bf16[2304,256], index: 5, kind: input, shape index: {}]   ;;  %s8673_s6 = inlined_call_operand.hbm [shape: bf16[512,384], index: 6, kind: input, shape index: {}]   ;;  %s8674_s7 = inlined_call_operand.hbm [shape: bf16[256,512], index: 7, kind: input, shape index: {}]   ;;  %s8675_s8 = inlined_call_operand.hbm [shape: f32[24,512], index: 8, kind: input, shape index: {}]   ;;  %s8676_s9 = inlined_call_operand.hbm [shape: f32[8,128], index: 9, kind: output, shape index: {}]  }
   0x1   :  { %15 = vsyncpa [#allocation6], 0 }
   0x2   :  { %16 = vsyncpa [#allocation9], 0  ;;  %s43_s11 = sshll.u32 %s8672_s5, 4  ;;  %s44_s11 = int_to_ptr.hbm [resolvable:$true] %s43_s11 }
   0x3   :  { %17 = vsyncpa [#allocation4], 0  ;;  %s8397_s12 = smov [#allocation5]   ;;  %s69_s16 = sshll.u32 %s8674_s7, 4  ;;  %s70_s16 = int_to_ptr.hbm [resolvable:$true] %s69_s16 }
   0x4   :  { %s45_s13 = sshll.u32 %s8397_s12, 4  ;;  %s8398_s17 = smov 128   ;;  %s46_s13 = int_to_ptr.vmem [resolvable:$true] %s45_s13 }
   0x5   :  { %s8399_s18 = smov 8   ;;  %s8400_s19 = smov [#allocation8]  }
   0x6   :  { %51 = dma.hbm_to_vmem [thread:$0]  %s44_s11, 36864, %s46_s13, [#allocation6], %s8398_s17, %s8398_s17, %s8399_s18  }
   0x7   :  { %s71_s20 = sshll.u32 %s8400_s19, 4  ;;  %s8401_s21 = smov 256   ;;  %s72_s20 = int_to_ptr.vmem [resolvable:$true] %s71_s20 }
   0x8   :  { %s8402_s22 = smov 16   ;;  %s30_s24 = sshll.u32 %s8671_s4, 4  ;;  %s31_s24 = int_to_ptr.hbm [resolvable:$true] %s30_s24 }
   0x9   :  { %77 = dma.hbm_to_vmem [thread:$0]  %s70_s16, 8192, %s72_s20, [#allocation9], %s8401_s21, %s8401_s21, %s8402_s22  }
   0xa   :  { %s8403_s25 = smov [#allocation2]   ;;  %s56_s28 = sshll.u32 %s8673_s6, 4  ;;  %s57_s28 = int_to_ptr.hbm [resolvable:$true] %s56_s28 }
   0xb   :  { %s32_s26 = sshll.u32 %s8403_s25, 4  ;;  %s8404_s29 = smov 64   ;;  %s33_s26 = int_to_ptr.vmem [resolvable:$true] %s32_s26 }
   0xc   :  { %s8405_s30 = smov 4   ;;  %s8406_s10 = smov [#allocation7]  }
   0xd   :  { %38 = dma.hbm_to_vmem [thread:$0]  %s31_s24, 19456, %s33_s26, [#allocation3], %s8404_s29, %s8404_s29, %s8405_s30  }
   0xe   :  { %s58_s11 = sshll.u32 %s8406_s10, 4  ;;  %s8407_s12 = smov 192   ;;  %s59_s11 = int_to_ptr.vmem [resolvable:$true] %s58_s11 }
   0xf   :  { %s8408_s13 = smov 12   ;;  %s82_s15 = sshll.u32 %s8675_s8, 4  ;;  %s83_s15 = int_to_ptr.hbm [resolvable:$true] %s82_s15 }
  0x10   :  { %64 = dma.hbm_to_vmem [thread:$0]  %s57_s28, 12288, %s59_s11, [#allocation6], %s8407_s12, %s8407_s12, %s8408_s13  }
  0x11   :  { %s8409_s16 = smov [#allocation10]   ;;  %s8410_s18 = smov 512  }
  0x12   :  { %s84_s17 = sshll.u32 %s8409_s16, 4  ;;  %s8411_s6 = smov 32   ;;  %s85_s17 = int_to_ptr.vmem [resolvable:$true] %s84_s17 }
  0x13   :  { %90 = dma.hbm_to_vmem [thread:$0]  %s83_s15, 1536, %s85_s17, [#allocation9], %s8410_s18, %s8410_s18, %s8411_s6  }
  0x14   :  { %8389 = dma.done.wait [#allocation3], 19456  }
  0x15   :  { %8390 = vsyncadd [#allocation3], 4294947840 }
  0x16   :  { %8391 = dma.done.wait [#allocation6], 49152  }
  0x17   :  { %8392 = vsyncadd [#allocation6], 4294918144 }
  0x18   :  { %8393 = dma.done.wait [#allocation9], 9728  }
  0x19   :  { %8394 = vsyncadd [#allocation9], 4294957568  ;;  %v7635_v0 = vld [vmem:[#allocation2 + $0x38] sm:$0xff]  ;;  %v7634_v2 = vld [vmem:[#allocation2 + $0x30] sm:$0xff]  ;;  %s8412_s24 = smov [#allocation11]   ;;  %s5216_s7 = sshll.u32 %s8676_s9, 4  ;;  %s5217_s7 = int_to_ptr.hbm [resolvable:$true] %s5216_s7 }
  0x1a   :  { %v7643_v1 = vld [vmem:[#allocation2 + $0x78] sm:$0xff]  ;;  %179 = vmatpush.bf16.msra.mxu0 %v7635_v0  ;;  %v7642_v3 = vld [vmem:[#allocation2 + $0x70] sm:$0xff]  ;;  %v7633_v4 = vld [vmem:[#allocation2 + $0x28] sm:$0xff]  ;;  %s5214_s25 = sshll.u32 %s8412_s24, 4  ;;  %s5215_s25 = int_to_ptr.vmem [resolvable:$true] %s5214_s25 }
  0x1b   :  { %260 = vmatpush.bf16.msra.mxu1 %v7643_v1  ;;  %v7641_v5 = vld [vmem:[#allocation2 + $0x68] sm:$0xff]  ;;  %v5350_v6 = vld [vmem:[#allocation5 + $0xf0] sm:$0xf]  ;;  %v7675_v7 = vld [vmem:[#allocation5 + $0xf4] sm:$0xf0] }
  0x1c   :  { %v5414_v8 = vld [vmem:[#allocation5 + $0x170] sm:$0xf]  ;;  %v5351_v9 = vor.u32 %v7675_v7, %v5350_v6  ;;  %v7691_v10 = vld [vmem:[#allocation5 + $0x174] sm:$0xf0]  ;;  %v5342_v11 = vld [vmem:[#allocation5 + $0xe0] sm:$0xf] }
  0x1d   :  { %v7673_v12 = vld [vmem:[#allocation5 + $0xe4] sm:$0xf0]  ;;  %v5415_v13 = vor.u32 %v7691_v10, %v5414_v8  ;;  %v5406_v14 = vld [vmem:[#allocation5 + $0x160] sm:$0xf]  ;;  %v5334_v19 = vld [vmem:[#allocation5 + $0xd0] sm:$0xf] }
  0x1e   :  { %180 = vmatpush.bf16.msra.mxu0 %v7634_v2  ;;  %v7689_v15 = vld [vmem:[#allocation5 + $0x164] sm:$0xf0]  ;;  %v7632_v16 = vld [vmem:[#allocation2 + $0x20] sm:$0xff]  ;;  %487 = vmatpush.bf16.msra.mxu2 %v5351_v9  ;;  %v5343_v17 = vor.u32 %v7673_v12, %v5342_v11  ;;  %v7671_v20 = vld [vmem:[#allocation5 + $0xd4] sm:$0xf0] }
  0x1f   :  { %261 = vmatpush.bf16.msra.mxu1 %v7642_v3  ;;  %v7640_v18 = vld [vmem:[#allocation2 + $0x60] sm:$0xff]  ;;  %500 = vmatpush.bf16.msra.mxu3 %v5415_v13  ;;  %v5407_v21 = vor.u32 %v7689_v15, %v5406_v14  ;;  %v5398_v22 = vld [vmem:[#allocation5 + $0x150] sm:$0xf]  ;;  %v7687_v23 = vld [vmem:[#allocation5 + $0x154] sm:$0xf0]  ;;  %v5335_v25 = vor.u32 %v7671_v20, %v5334_v19 }
  0x20   :  { %v7631_v24 = vld [vmem:[#allocation2 + $0x18] sm:$0xff]  ;;  %v5326_v27 = vld [vmem:[#allocation5 + $0xc0] sm:$0xf]  ;;  %v7669_v28 = vld [vmem:[#allocation5 + $0xc4] sm:$0xf0]  ;;  %v5399_v29 = vor.u32 %v7687_v23, %v5398_v22 }
  0x21   :  { %v7639_v26 = vld [vmem:[#allocation2 + $0x58] sm:$0xff]  ;;  %v5390_v30 = vld [vmem:[#allocation5 + $0x140] sm:$0xf]  ;;  %v7685_v31 = vld [vmem:[#allocation5 + $0x144] sm:$0xf0]  ;;  %v5327_v33 = vor.u32 %v7669_v28, %v5326_v27 }
  0x22   :  { %181 = vmatpush.bf16.msra.mxu0 %v7633_v4  ;;  %488 = vmatpush.bf16.msra.mxu2 %v5343_v17  ;;  %v7630_v32 = vld [vmem:[#allocation2 + $0x10] sm:$0xff]  ;;  %v7667_v36 = vld [vmem:[#allocation5 + $0xb4] sm:$0xf0]  ;;  %v5391_v37 = vor.u32 %v7685_v31, %v5390_v30  ;;  %v7629_v40 = vld [vmem:[#allocation2 + $0x8] sm:$0xff] }
  0x23   :  { %262 = vmatpush.bf16.msra.mxu1 %v7641_v5  ;;  %501 = vmatpush.bf16.msra.mxu3 %v5407_v21  ;;  %v7638_v34 = vld [vmem:[#allocation2 + $0x50] sm:$0xff]  ;;  %v7683_v39 = vld [vmem:[#allocation5 + $0x134] sm:$0xf0]  ;;  %v7637_v42 = vld [vmem:[#allocation2 + $0x48] sm:$0xff] }
  0x24   :  { %v5318_v35 = vld [vmem:[#allocation5 + $0xb0] sm:$0xf]  ;;  %v5310_v43 = vld [vmem:[#allocation5 + $0xa0] sm:$0xf]  ;;  %v7665_v44 = vld [vmem:[#allocation5 + $0xa4] sm:$0xf0] }
  0x25   :  { %v5382_v38 = vld [vmem:[#allocation5 + $0x130] sm:$0xf]  ;;  %v5319_v41 = vor.u32 %v7667_v36, %v5318_v35  ;;  %v7674_v45 = vld [vmem:[#allocation5 + $0xf4] sm:$0xf]  ;;  %v5352_v47 = vld [vmem:[#allocation5 + $0xf8] sm:$0xf0]  ;;  %v5311_v51 = vor.u32 %v7665_v44, %v5310_v43 }
  0x26   :  { %182 = vmatpush.bf16.msra.mxu0 %v7632_v16  ;;  %489 = vmatpush.bf16.msra.mxu2 %v5335_v25  ;;  %v5383_v46 = vor.u32 %v7683_v39, %v5382_v38  ;;  %v7690_v48 = vld [vmem:[#allocation5 + $0x174] sm:$0xf]  ;;  %v5416_v49 = vld [vmem:[#allocation5 + $0x178] sm:$0xf0]  ;;  %v7628_v50 = vld [vmem:[#allocation2] sm:$0xff]  ;;  %v5355_v57 = vor.u32 %v7674_v45, %v5352_v47 }
  0x27   :  { %263 = vmatpush.bf16.msra.mxu1 %v7640_v18  ;;  %502 = vmatpush.bf16.msra.mxu3 %v5399_v29  ;;  %v5374_v52 = vld [vmem:[#allocation5 + $0x120] sm:$0xf]  ;;  %v7681_v53 = vld [vmem:[#allocation5 + $0x124] sm:$0xf0]  ;;  %v5419_v58 = vor.u32 %v7690_v48, %v5416_v49  ;;  %v7672_v59 = vld [vmem:[#allocation5 + $0xe4] sm:$0xf] }
  0x28   :  { %v7636_v54 = vld [vmem:[#allocation2 + $0x40] sm:$0xff]  ;;  %v5302_v60 = vld [vmem:[#allocation5 + $0x90] sm:$0xf]  ;;  %v7663_v61 = vld [vmem:[#allocation5 + $0x94] sm:$0xf0]  ;;  %v5375_v1 = vor.u32 %v7681_v53, %v5374_v52 }
  0x29   :  { %v112_v55 = vld [vmem:[%s8668_s1] sm:$0xff]  ;;  %v5344_v62 = vld [vmem:[#allocation5 + $0xe8] sm:$0xf0]  ;;  %v5366_v4 = vld [vmem:[#allocation5 + $0x110] sm:$0xf]  ;;  %v5303_v7 = vor.u32 %v7663_v61, %v5302_v60 }
  0x2a   :  { %183 = vmatpush.bf16.msra.mxu0 %v7631_v24  ;;  %490 = vmatpush.bf16.msra.mxu2 %v5327_v33  ;;  %v193_v56 = vld [vmem:[%s8669_s2] sm:$0xff]  ;;  %v5408_v0 = vld [vmem:[#allocation5 + $0x168] sm:$0xf0]  ;;  %v129_v2 = vpack.c.bf16 %v112_v55, %v112_v55  ;;  %v7679_v5 = vld [vmem:[#allocation5 + $0x114] sm:$0xf0]  ;;  %v5347_v8 = vor.u32 %v7672_v59, %v5344_v62 }
  0x2b   :  { %264 = vmatpush.bf16.msra.mxu1 %v7639_v26  ;;  %503 = vmatpush.bf16.msra.mxu3 %v5391_v37  ;;  %v7688_v63 = vld [vmem:[#allocation5 + $0x164] sm:$0xf]  ;;  %v210_v3 = vpack.c.bf16 %v193_v56, %v193_v56  ;;  %v7670_v6 = vld [vmem:[#allocation5 + $0xd4] sm:$0xf]  ;;  %v5336_v10 = vld [vmem:[#allocation5 + $0xd8] sm:$0xf0]  ;;  %v5367_v15 = vor.u32 %v7679_v5, %v5366_v4 }
  0x2c   :  { %v5411_v9 = vor.u32 %v7688_v63, %v5408_v0  ;;  %v5294_v11 = vld [vmem:[#allocation5 + $0x80] sm:$0xf]  ;;  %v7661_v12 = vld [vmem:[#allocation5 + $0x84] sm:$0xf0]  ;;  %v7686_v13 = vld [vmem:[#allocation5 + $0x154] sm:$0xf]  ;;  %v5339_v23 = vor.u32 %v7670_v6, %v5336_v10 }
  0x2d   :  { %v5400_v14 = vld [vmem:[#allocation5 + $0x158] sm:$0xf0]  ;;  %v5478_v16 = vld [vmem:[#allocation5 + $0x70] sm:$0xf]  ;;  %v7659_v17 = vld [vmem:[#allocation5 + $0x74] sm:$0xf0]  ;;  %v5295_v20 = vor.u32 %v7661_v12, %v5294_v11 }
  0x2e   :  { %184 = vmatpush.bf16.msra.mxu0 %v7630_v32  ;;  %491 = vmatpush.bf16.msra.mxu2 %v5319_v41  ;;  %v5358_v18 = vld [vmem:[#allocation5 + $0x100] sm:$0xf]  ;;  %v7677_v19 = vld [vmem:[#allocation5 + $0x104] sm:$0xf0]  ;;  %v7658_v21 = vld [vmem:[#allocation5 + $0x74] sm:$0xf]  ;;  %v5403_v24 = vor.u32 %v7686_v13, %v5400_v14  ;;  %v5479_v29 = vor.u32 %v7659_v17, %v5478_v16 }
  0x2f   :  { %265 = vmatpush.bf16.msra.mxu1 %v7638_v34  ;;  %504 = vmatpush.bf16.msra.mxu3 %v5383_v46  ;;  %v5480_v22 = vld [vmem:[#allocation5 + $0x78] sm:$0xf0]  ;;  %v7668_v25 = vld [vmem:[#allocation5 + $0xc4] sm:$0xf]  ;;  %v5328_v26 = vld [vmem:[#allocation5 + $0xc8] sm:$0xf0]  ;;  %v5359_v30 = vor.u32 %v7677_v19, %v5358_v18 }
  0x30   :  { %v7684_v27 = vld [vmem:[#allocation5 + $0x144] sm:$0xf]  ;;  %v5392_v28 = vld [vmem:[#allocation5 + $0x148] sm:$0xf0]  ;;  %v5483_v31 = vor.u32 %v7658_v21, %v5480_v22  ;;  %v5470_v32 = vld [vmem:[#allocation5 + $0x60] sm:$0xf]  ;;  %v5331_v36 = vor.u32 %v7668_v25, %v5328_v26 }
  0x31   :  { %v7657_v33 = vld [vmem:[#allocation5 + $0x64] sm:$0xf0]  ;;  %v7656_v34 = vld [vmem:[#allocation5 + $0x64] sm:$0xf]  ;;  %v5472_v35 = vld [vmem:[#allocation5 + $0x68] sm:$0xf0]  ;;  %v5395_v37 = vor.u32 %v7684_v27, %v5392_v28 }
  0x32   :  { %185 = vmatpush.bf16.msra.mxu0 %v7629_v40  ;;  %492 = vmatpush.bf16.msra.mxu2 %v5311_v51  ;;  %v7666_v38 = vld [vmem:[#allocation5 + $0xb4] sm:$0xf]  ;;  %v5320_v39 = vld [vmem:[#allocation5 + $0xb8] sm:$0xf0]  ;;  %v5475_v43 = vor.u32 %v7656_v34, %v5472_v35  ;;  %v5462_v44 = vld [vmem:[#allocation5 + $0x50] sm:$0xf] }
  0x33   :  { %266 = vmatpush.bf16.msra.mxu1 %v7637_v42  ;;  %505 = vmatpush.bf16.msra.mxu3 %v5375_v1  ;;  %v7682_v40 = vld [vmem:[#allocation5 + $0x134] sm:$0xf]  ;;  %v5384_v41 = vld [vmem:[#allocation5 + $0x138] sm:$0xf0]  ;;  %v5471_v42 = vor.u32 %v7657_v33, %v5470_v32  ;;  %v7655_v45 = vld [vmem:[#allocation5 + $0x54] sm:$0xf0]  ;;  %v5323_v48 = vor.u32 %v7666_v38, %v5320_v39 }
  0x34   :  { %v7654_v46 = vld [vmem:[#allocation5 + $0x54] sm:$0xf]  ;;  %v5464_v47 = vld [vmem:[#allocation5 + $0x58] sm:$0xf0]  ;;  %v5387_v49 = vor.u32 %v7682_v40, %v5384_v41  ;;  %v5312_v51 = vld [vmem:[#allocation5 + $0xa8] sm:$0xf0] }
  0x35   :  { %v7680_v52 = vld [vmem:[#allocation5 + $0x124] sm:$0xf]  ;;  %v5376_v53 = vld [vmem:[#allocation5 + $0x128] sm:$0xf0]  ;;  %v5467_v55 = vor.u32 %v7654_v46, %v5464_v47  ;;  %v5454_v56 = vld [vmem:[#allocation5 + $0x40] sm:$0xf] }
  0x36   :  { %186 = vmatpush.bf16.msra.mxu0 %v7628_v50  ;;  %493 = vmatpush.bf16.msra.mxu2 %v5303_v7  ;;  %v7664_v50 = vld [vmem:[#allocation5 + $0xa4] sm:$0xf]  ;;  %v5456_v59 = vld [vmem:[#allocation5 + $0x48] sm:$0xf0]  ;;  %v5379_v61 = vor.u32 %v7680_v52, %v5376_v53  ;;  %v7662_v62 = vld [vmem:[#allocation5 + $0x94] sm:$0xf] }
  0x37   :  { %267 = vmatpush.bf16.msra.mxu1 %v7636_v54  ;;  %506 = vmatpush.bf16.msra.mxu3 %v5367_v15  ;;  %v5463_v54 = vor.u32 %v7655_v45, %v5462_v44  ;;  %v5315_v60 = vor.u32 %v7664_v50, %v5312_v51  ;;  %v5304_v63 = vld [vmem:[#allocation5 + $0x98] sm:$0xf0]  ;;  %v7678_v0 = vld [vmem:[#allocation5 + $0x114] sm:$0xf]  ;;  %v5446_v4 = vld [vmem:[#allocation5 + $0x30] sm:$0xf] }
  0x38   :  { %v5368_v1 = vld [vmem:[#allocation5 + $0x118] sm:$0xf0]  ;;  %v7651_v5 = vld [vmem:[#allocation5 + $0x34] sm:$0xf0]  ;;  %v7650_v6 = vld [vmem:[#allocation5 + $0x34] sm:$0xf] }
  0x39   :  { %187 = vmatmul.bf16.vlgmr.msra.gmra.mxu0 %v129_v2  ;;  %v5448_v7 = vld [vmem:[#allocation5 + $0x38] sm:$0xf0]  ;;  %v7660_v10 = vld [vmem:[#allocation5 + $0x84] sm:$0xf]  ;;  %v5296_v11 = vld [vmem:[#allocation5 + $0x88] sm:$0xf0]  ;;  %v5447_v15 = vor.u32 %v7651_v5, %v5446_v4 }
  0x3a   :  { %513 = vmatpush.bf16.msrb.mxu0 %v5355_v57  ;;  %268 = vmatmul.bf16.vlgmr.msra.gmra.mxu1 %v210_v3  ;;  %v7653_v57 = vld [vmem:[#allocation5 + $0x44] sm:$0xf0]  ;;  %v5542_v12 = vld [vmem:[#allocation5 + $0x2f0] sm:$0xf]  ;;  %v7676_v13 = vld [vmem:[#allocation5 + $0x104] sm:$0xf]  ;;  %v5451_v19 = vor.u32 %v7650_v6, %v5448_v7  ;;  %v5299_v22 = vor.u32 %v7660_v10, %v5296_v11 }
  0x3b   :  { %526 = vmatpush.bf16.msrb.mxu1 %v5419_v58  ;;  %494 = vmatpush.bf16.msra.mxu2 %v5295_v20  ;;  %v7652_v58 = vld [vmem:[#allocation5 + $0x44] sm:$0xf]  ;;  %v5455_v2 = vor.u32 %v7653_v57, %v5454_v56  ;;  %v5360_v14 = vld [vmem:[#allocation5 + $0x108] sm:$0xf0]  ;;  %v7739_v16 = vld [vmem:[#allocation5 + $0x2f4] sm:$0xf0] }
  0x3c   :  { %507 = vmatpush.bf16.msra.mxu3 %v5359_v30  ;;  %v5459_v3 = vor.u32 %v7652_v58, %v5456_v59  ;;  %v5606_v17 = vld [vmem:[#allocation5 + $0x370] sm:$0xf]  ;;  %v7755_v18 = vld [vmem:[#allocation5 + $0x374] sm:$0xf0]  ;;  %v5438_v20 = vld [vmem:[#allocation5 + $0x20] sm:$0xf] }
  0x3d   :  { %v7649_v21 = vld [vmem:[#allocation5 + $0x24] sm:$0xf0]  ;;  %v5607_v25 = vor.u32 %v7755_v18, %v5606_v17  ;;  %v5534_v26 = vld [vmem:[#allocation5 + $0x2e0] sm:$0xf]  ;;  %v5526_v33 = vld [vmem:[#allocation5 + $0x2d0] sm:$0xf] }
  0x3e   :  { %514 = vmatpush.bf16.msrb.mxu0 %v5347_v8  ;;  %v5307_v8 = vor.u32 %v7662_v62, %v5304_v63  ;;  %v7737_v27 = vld [vmem:[#allocation5 + $0x2e4] sm:$0xf0]  ;;  %v5598_v28 = vld [vmem:[#allocation5 + $0x360] sm:$0xf]  ;;  %v5439_v30 = vor.u32 %v7649_v21, %v5438_v20  ;;  %v7735_v34 = vld [vmem:[#allocation5 + $0x2d4] sm:$0xf0] }
  0x3f   :  { %527 = vmatpush.bf16.msrb.mxu1 %v5411_v9  ;;  %619 = vmatpush.bf16.msrb.mxu2 %v5479_v29  ;;  %v5371_v9 = vor.u32 %v7678_v0, %v5368_v1  ;;  %v7753_v29 = vld [vmem:[#allocation5 + $0x364] sm:$0xf0]  ;;  %v5527_v35 = vor.u32 %v7735_v34, %v5526_v33  ;;  %v5590_v39 = vld [vmem:[#allocation5 + $0x350] sm:$0xf]  ;;  %v7751_v40 = vld [vmem:[#allocation5 + $0x354] sm:$0xf0] }
  0x40   :  { %632 = vmatpush.bf16.msrb.mxu3 %v5483_v31  ;;  %v5535_v31 = vor.u32 %v7737_v27, %v5534_v26  ;;  %v5599_v32 = vor.u32 %v7753_v29, %v5598_v28  ;;  %v5591_v41 = vor.u32 %v7751_v40, %v5590_v39  ;;  %v5518_v45 = vld [vmem:[#allocation5 + $0x2c0] sm:$0xf]  ;;  %v7733_v46 = vld [vmem:[#allocation5 + $0x2c4] sm:$0xf0]  ;;  %v5510_v57 = vld [vmem:[#allocation5 + $0x2b0] sm:$0xf] }
  0x41   :  { %v5519_v47 = vor.u32 %v7733_v46, %v5518_v45  ;;  %v5582_v51 = vld [vmem:[#allocation5 + $0x340] sm:$0xf]  ;;  %v7749_v52 = vld [vmem:[#allocation5 + $0x344] sm:$0xf0]  ;;  %v7731_v58 = vld [vmem:[#allocation5 + $0x2b4] sm:$0xf0] }
  0x42   :  { %515 = vmatpush.bf16.msrb.mxu0 %v5339_v23  ;;  %v5363_v23 = vor.u32 %v7676_v13, %v5360_v14  ;;  %v5583_v53 = vor.u32 %v7749_v52, %v5582_v51  ;;  %v5511_v59 = vor.u32 %v7731_v58, %v5510_v57  ;;  %v5574_v63 = vld [vmem:[#allocation5 + $0x330] sm:$0xf]  ;;  %v7747_v0 = vld [vmem:[#allocation5 + $0x334] sm:$0xf0]  ;;  %v5566_v5 = vld [vmem:[#allocation5 + $0x320] sm:$0xf] }
  0x43   :  { %528 = vmatpush.bf16.msrb.mxu1 %v5403_v24  ;;  %620 = vmatpush.bf16.msrb.mxu2 %v5471_v42  ;;  %v5543_v24 = vor.u32 %v7739_v16, %v5542_v12  ;;  %v5430_v42 = vld [vmem:[#allocation5 + $0x10] sm:$0xf]  ;;  %v5575_v1 = vor.u32 %v7747_v0, %v5574_v63  ;;  %v7745_v6 = vld [vmem:[#allocation5 + $0x324] sm:$0xf0]  ;;  %v7743_v12 = vld [vmem:[#allocation5 + $0x314] sm:$0xf0] }
  0x44   :  { %633 = vmatpush.bf16.msrb.mxu3 %v5475_v43  ;;  %v7647_v43 = vld [vmem:[#allocation5 + $0x14] sm:$0xf0]  ;;  %v5567_v7 = vor.u32 %v7745_v6, %v5566_v5  ;;  %v5558_v11 = vld [vmem:[#allocation5 + $0x310] sm:$0xf]  ;;  %v5486_v14 = vld [vmem:[#allocation5 + $0x280] sm:$0xf] }
  0x45   :  { %v5431_v44 = vor.u32 %v7647_v43, %v5430_v42  ;;  %v5559_v13 = vor.u32 %v7743_v12, %v5558_v11  ;;  %v5550_v17 = vld [vmem:[#allocation5 + $0x300] sm:$0xf]  ;;  %v7741_v18 = vld [vmem:[#allocation5 + $0x304] sm:$0xf0]  ;;  %v7738_v26 = vld [vmem:[#allocation5 + $0x2f4] sm:$0xf] }
  0x46   :  { %516 = vmatpush.bf16.msrb.mxu0 %v5331_v36  ;;  %v7648_v36 = vld [vmem:[#allocation5 + $0x24] sm:$0xf]  ;;  %v130_v20 = vld [vmem:[#allocation10] ss:$0 sm:$0xff]  ;;  %v211_v21 = vld [vmem:[#allocation10 + $0x1] ss:$0 sm:$0xff] }
  0x47   :  { %529 = vmatpush.bf16.msrb.mxu1 %v5395_v37  ;;  %621 = vmatpush.bf16.msrb.mxu2 %v5463_v54  ;;  %v5440_v37 = vld [vmem:[#allocation5 + $0x28] sm:$0xf0]  ;;  %v5422_v54 = vld [vmem:[#allocation5] sm:$0xf]  ;;  %v5544_v27 = vld [vmem:[#allocation5 + $0x2f8] sm:$0xf0] }
  0x48   :  { %634 = vmatpush.bf16.msrb.mxu3 %v5467_v55  ;;  %v5443_v38 = vor.u32 %v7648_v36, %v5440_v37  ;;  %v7645_v55 = vld [vmem:[#allocation5 + $0x4] sm:$0xf0]  ;;  %v274_v28 = vld [vmem:[%s8670_s3] sm:$0xff]  ;;  %v5547_v33 = vor.u32 %v7738_v26, %v5544_v27  ;;  %v5536_v37 = vld [vmem:[#allocation5 + $0x2e8] sm:$0xf0] }
  0x49   :  { %v5423_v56 = vor.u32 %v7645_v55, %v5422_v54  ;;  %v7736_v36 = vld [vmem:[#allocation5 + $0x2e4] sm:$0xf]  ;;  %v7734_v45 = vld [vmem:[#allocation5 + $0x2d4] sm:$0xf]  ;;  %v5528_v46 = vld [vmem:[#allocation5 + $0x2d8] sm:$0xf0] }
  0x4a   :  { %517 = vmatpush.bf16.msrb.mxu0 %v5323_v48  ;;  %v7646_v48 = vld [vmem:[#allocation5 + $0x14] sm:$0xf]  ;;  %v7752_v40 = vld [vmem:[#allocation5 + $0x364] sm:$0xf]  ;;  %v5662_v54 = vld [vmem:[#allocation5 + $0x1e0] sm:$0xf] }
  0x4b   :  { %530 = vmatpush.bf16.msrb.mxu1 %v5387_v49  ;;  %622 = vmatpush.bf16.msrb.mxu2 %v5455_v2  ;;  %v5432_v49 = vld [vmem:[#allocation5 + $0x18] sm:$0xf0]  ;;  %v5502_v2 = vld [vmem:[#allocation5 + $0x2a0] sm:$0xf]  ;;  %v7705_v55 = vld [vmem:[#allocation5 + $0x1e4] sm:$0xf0] }
  0x4c   :  { %635 = vmatpush.bf16.msrb.mxu3 %v5459_v3  ;;  %v5435_v50 = vor.u32 %v7646_v48, %v5432_v49  ;;  %v7729_v3 = vld [vmem:[#allocation5 + $0x2a4] sm:$0xf0]  ;;  %v5670_v48 = vld [vmem:[#allocation5 + $0x1f0] sm:$0xf]  ;;  %v7707_v49 = vld [vmem:[#allocation5 + $0x1f4] sm:$0xf0] }
  0x4d   :  { %v5503_v4 = vor.u32 %v7729_v3, %v5502_v2  ;;  %v5671_v52 = vor.u32 %v7707_v49, %v5670_v48  ;;  %v5726_v58 = vld [vmem:[#allocation5 + $0x260] sm:$0xf]  ;;  %v5520_v63 = vld [vmem:[#allocation5 + $0x2c8] sm:$0xf0]  ;;  %v7703_v2 = vld [vmem:[#allocation5 + $0x1d4] sm:$0xf0] }
  0x4e   :  { %518 = vmatpush.bf16.msrb.mxu0 %v5315_v60  ;;  %v7644_v60 = vld [vmem:[#allocation5 + $0x4] sm:$0xf]  ;;  %v7719_v5 = vld [vmem:[#allocation5 + $0x254] sm:$0xf0]  ;;  %v5512_v12 = vld [vmem:[#allocation5 + $0x2b8] sm:$0xf0] }
  0x4f   :  { %531 = vmatpush.bf16.msrb.mxu1 %v5379_v61  ;;  %623 = vmatpush.bf16.msrb.mxu2 %v5447_v15  ;;  %v5424_v61 = vld [vmem:[#allocation5 + $0x8] sm:$0xf0]  ;;  %v7725_v15 = vld [vmem:[#allocation5 + $0x284] sm:$0xf0]  ;;  %v7748_v6 = vld [vmem:[#allocation5 + $0x344] sm:$0xf] }
  0x50   :  { %636 = vmatpush.bf16.msrb.mxu3 %v5451_v19  ;;  %v5427_v62 = vor.u32 %v7644_v60, %v5424_v61  ;;  %v5487_v16 = vor.u32 %v7725_v15, %v5486_v14  ;;  %v5551_v19 = vor.u32 %v7741_v18, %v5550_v17  ;;  %v5531_v60 = vor.u32 %v7734_v45, %v5528_v46  ;;  %v7732_v61 = vld [vmem:[#allocation5 + $0x2c4] sm:$0xf]  ;;  %v5646_v14 = vld [vmem:[#allocation5 + $0x1c0] sm:$0xf]  ;;  %v7701_v15 = vld [vmem:[#allocation5 + $0x1c4] sm:$0xf0] }
  0x51   :  { %v7746_v17 = vld [vmem:[#allocation5 + $0x334] sm:$0xf]  ;;  %v5638_v26 = vld [vmem:[#allocation5 + $0x1b0] sm:$0xf]  ;;  %v7699_v27 = vld [vmem:[#allocation5 + $0x1b4] sm:$0xf0] }
  0x52   :  { %519 = vmatpush.bf16.msrb.mxu0 %v5307_v8  ;;  %v5494_v8 = vld [vmem:[#allocation5 + $0x290] sm:$0xf]  ;;  %v5560_v45 = vld [vmem:[#allocation5 + $0x318] sm:$0xf0]  ;;  %v5694_v46 = vld [vmem:[#allocation5 + $0x220] sm:$0xf] }
  0x53   :  { %532 = vmatpush.bf16.msrb.mxu1 %v5371_v9  ;;  %624 = vmatpush.bf16.msrb.mxu2 %v5439_v30  ;;  %v7727_v9 = vld [vmem:[#allocation5 + $0x294] sm:$0xf0]  ;;  %v7724_v49 = vld [vmem:[#allocation5 + $0x284] sm:$0xf] }
  0x54   :  { %637 = vmatpush.bf16.msrb.mxu3 %v5443_v38  ;;  %v5495_v10 = vor.u32 %v7727_v9, %v5494_v8  ;;  %v5523_v8 = vor.u32 %v7732_v61, %v5520_v63  ;;  %v111_v9 = vld [vmem:[%s8667_s0] sm:$0xff]  ;;  %v5686_v61 = vld [vmem:[#allocation5 + $0x210] sm:$0xf]  ;;  %v7706_v63 = vld [vmem:[#allocation5 + $0x1f4] sm:$0xf] }
  0x55   :  { %v294_v18 = vpack.c.bf16 %v111_v9, %v111_v9  ;;  %v7779_v9 = vld [vmem:[#allocation2 + $0x138] sm:$0xff] }
  0x56   :  { %520 = vmatpush.bf16.msrb.mxu0 %v5299_v22 }
  0x57   :  { %533 = vmatpush.bf16.msrb.mxu1 %v5363_v23  ;;  %625 = vmatpush.bf16.msrb.mxu2 %v5431_v44  ;;  %v5539_v44 = vor.u32 %v7736_v36, %v5536_v37  ;;  %v7726_v36 = vld [vmem:[#allocation5 + $0x294] sm:$0xf]  ;;  %v5639_v37 = vor.u32 %v7699_v27, %v5638_v26  ;;  %v5720_v26 = vld [vmem:[#allocation5 + $0x258] sm:$0xf0] }
  0x58   :  { %638 = vmatpush.bf16.msrb.mxu3 %v5435_v50  ;;  %v5734_v50 = vld [vmem:[#allocation5 + $0x270] sm:$0xf] }
  0x5a   :  { %882 = vmatpush.bf16.msra.mxu0 %v5543_v24 }
  0x5b   :  { %895 = vmatpush.bf16.msra.mxu1 %v5607_v25  ;;  %626 = vmatpush.bf16.msrb.mxu2 %v5423_v56  ;;  %v5592_v56 = vld [vmem:[#allocation5 + $0x358] sm:$0xf0] }
  0x5c   :  { %639 = vmatpush.bf16.msrb.mxu3 %v5427_v62  ;;  %v5663_v62 = vor.u32 %v7705_v55, %v5662_v54 }
  0x5e   :  { %883 = vmatpush.bf16.msra.mxu0 %v5535_v31  ;;  %v7754_v31 = vld [vmem:[#allocation5 + $0x374] sm:$0xf] }
  0x5f   :  { %896 = vmatpush.bf16.msra.mxu1 %v5599_v32  ;;  %v5608_v32 = vld [vmem:[#allocation5 + $0x378] sm:$0xf0] }
  0x60   :  { %v5611_v38 = vor.u32 %v7754_v31, %v5608_v32  ;;  %v5568_v31 = vld [vmem:[#allocation5 + $0x328] sm:$0xf0]  ;;  %v5702_v32 = vld [vmem:[#allocation5 + $0x230] sm:$0xf] }
  0x62   :  { %884 = vmatpush.bf16.msra.mxu0 %v5527_v35 }
  0x63   :  { %897 = vmatpush.bf16.msra.mxu1 %v5591_v41  ;;  %v5600_v41 = vld [vmem:[#allocation5 + $0x368] sm:$0xf0] }
  0x64   :  { %v5603_v51 = vor.u32 %v7752_v40, %v5600_v41  ;;  %v5630_v40 = vld [vmem:[#allocation5 + $0x1a0] sm:$0xf]  ;;  %v7697_v41 = vld [vmem:[#allocation5 + $0x1a4] sm:$0xf0] }
  0x66   :  { %885 = vmatpush.bf16.msra.mxu0 %v5519_v47  ;;  %v7750_v47 = vld [vmem:[#allocation5 + $0x354] sm:$0xf] }
  0x67   :  { %898 = vmatpush.bf16.msra.mxu1 %v5583_v53  ;;  %v7723_v53 = vld [vmem:[#allocation5 + $0x274] sm:$0xf0]  ;;  %v5595_v3 = vor.u32 %v7750_v47, %v5592_v56  ;;  %v7713_v47 = vld [vmem:[#allocation5 + $0x224] sm:$0xf0]  ;;  %v7740_v56 = vld [vmem:[#allocation5 + $0x304] sm:$0xf] }
  0x68   :  { %v5735_v57 = vor.u32 %v7723_v53, %v5734_v50  ;;  %v5631_v50 = vor.u32 %v7697_v41, %v5630_v40  ;;  %v7695_v53 = vld [vmem:[#allocation5 + $0x194] sm:$0xf0]  ;;  %v5695_v55 = vor.u32 %v7713_v47, %v5694_v46  ;;  %v5640_v40 = vld [vmem:[#allocation5 + $0x1b8] sm:$0xf0]  ;;  %v7696_v47 = vld [vmem:[#allocation5 + $0x1a4] sm:$0xf] }
  0x69   :  { %v7775_v46 = vld [vmem:[#allocation2 + $0x118] sm:$0xff] }
  0x6a   :  { %886 = vmatpush.bf16.msra.mxu0 %v5511_v59  ;;  %v7721_v59 = vld [vmem:[#allocation5 + $0x264] sm:$0xf0] }
  0x6b   :  { %899 = vmatpush.bf16.msra.mxu1 %v5575_v1  ;;  %v5727_v0 = vor.u32 %v7721_v59, %v5726_v58  ;;  %v5654_v1 = vld [vmem:[#allocation5 + $0x1d0] sm:$0xf] }
  0x6c   :  { %v5655_v11 = vor.u32 %v7703_v2, %v5654_v1  ;;  %v5672_v1 = vld [vmem:[#allocation5 + $0x1f8] sm:$0xf0]  ;;  %v5614_v2 = vld [vmem:[#allocation5 + $0x180] sm:$0xf] }
  0x6e   :  { %887 = vmatpush.bf16.msra.mxu0 %v5503_v4  ;;  %v5718_v4 = vld [vmem:[#allocation5 + $0x250] sm:$0xf] }
  0x6f   :  { %900 = vmatpush.bf16.msra.mxu1 %v5567_v7  ;;  %v5584_v7 = vld [vmem:[#allocation5 + $0x348] sm:$0xf0] }
  0x72   :  { %888 = vmatpush.bf16.msra.mxu0 %v5495_v10  ;;  %v7730_v10 = vld [vmem:[#allocation5 + $0x2b4] sm:$0xf] }
  0x73   :  { %901 = vmatpush.bf16.msra.mxu1 %v5559_v13  ;;  %v5719_v13 = vor.u32 %v7719_v5, %v5718_v4  ;;  %v5675_v4 = vor.u32 %v7706_v63, %v5672_v1  ;;  %v7692_v63 = vld [vmem:[#allocation5 + $0x184] sm:$0xf] }
  0x76   :  { %889 = vmatpush.bf16.msra.mxu0 %v5487_v16  ;;  %v5587_v16 = vor.u32 %v7748_v6, %v5584_v7  ;;  %v7722_v6 = vld [vmem:[#allocation5 + $0x274] sm:$0xf]  ;;  %v5736_v7 = vld [vmem:[#allocation5 + $0x278] sm:$0xf0] }
  0x77   :  { %902 = vmatpush.bf16.msra.mxu1 %v5551_v19  ;;  %v5576_v19 = vld [vmem:[#allocation5 + $0x338] sm:$0xf0] }
  0xb6   :  { %v188_v22 = vpop.f32.mrf.mxu0 }
  0xb7   :  { %v269_v23 = vpop.f32.mrf.mxu1  ;;  %v189_v24 = vadd.f32 %v188_v22, %v130_v20  ;;  %v5710_v20 = vld [vmem:[#allocation5 + $0x240] sm:$0xf]  ;;  %v5515_v22 = vor.u32 %v7730_v10, %v5512_v12  ;;  %v7704_v12 = vld [vmem:[#allocation5 + $0x1e4] sm:$0xf] }
  0xb8   :  { %v270_v25 = vadd.f32 %v269_v23, %v211_v21  ;;  %v7717_v21 = vld [vmem:[#allocation5 + $0x244] sm:$0xf0]  ;;  %v7728_v23 = vld [vmem:[#allocation5 + $0x2a4] sm:$0xf]  ;;  %v5678_v10 = vld [vmem:[#allocation5 + $0x200] sm:$0xf] }
  0xb9   :  { %v192_v29 = vmax.f32 %v189_v24, 0.0  ;;  %v5647_v24 = vor.u32 %v7701_v15, %v5646_v14  ;;  %v5664_v14 = vld [vmem:[#allocation5 + $0x1e8] sm:$0xf0] }
  0xba   :  { %v273_v30 = vmax.f32 %v270_v25, 0.0  ;;  %v5504_v25 = vld [vmem:[#allocation5 + $0x2a8] sm:$0xf0]  ;;  %v5667_v15 = vor.u32 %v7704_v12, %v5664_v14 }
  0xbb   :  { %v8487_v34 = vpack.c.bf16 %v192_v29, %v192_v29  ;;  %v7744_v29 = vld [vmem:[#allocation5 + $0x324] sm:$0xf] }
  0xbc   :  { %v275_v35 = vmul.f32 %v274_v28, %v273_v30  ;;  %v5579_v28 = vor.u32 %v7746_v17, %v5576_v19  ;;  %v5711_v30 = vor.u32 %v7717_v21, %v5710_v20  ;;  %v7720_v17 = vld [vmem:[#allocation5 + $0x264] sm:$0xf]  ;;  %v7778_v20 = vld [vmem:[#allocation2 + $0x130] sm:$0xff] }
  0xbd   :  { %495 = vmatmul.bf16.vlgmr.msra.gmra.mxu2 %v8487_v34  ;;  %521 = vmatmul.bf16.vlgmr.msrb.gmra.mxu0 %v8487_v34  ;;  %v7702_v21 = vld [vmem:[#allocation5 + $0x1d4] sm:$0xf] }
  0xbe   :  { %v8489_v39 = vpack.c.bf16 %v275_v35, %v275_v35  ;;  %v190_v42 = vpop.f32.mrf.mxu0  ;;  %908 = vmatpush.bf16.msra.mxu2 %v5547_v33  ;;  %1094 = vmatpush.bf16.msrb.mxu0 %v5671_v52  ;;  %v7715_v33 = vld [vmem:[#allocation5 + $0x234] sm:$0xf0]  ;;  %v5507_v35 = vor.u32 %v7728_v23, %v5504_v25  ;;  %v5622_v52 = vld [vmem:[#allocation5 + $0x190] sm:$0xf]  ;;  %v7718_v25 = vld [vmem:[#allocation5 + $0x254] sm:$0xf] }
  0xbf   :  { %v271_v43 = vpop.f32.mrf.mxu1  ;;  %v5571_v42 = vor.u32 %v7744_v29, %v5568_v31  ;;  %v5623_v59 = vor.u32 %v7695_v53, %v5622_v52  ;;  %v5723_v27 = vor.u32 %v7718_v25, %v5720_v26  ;;  %v7700_v29 = vld [vmem:[#allocation5 + $0x1c4] sm:$0xf]  ;;  %v5696_v52 = vld [vmem:[#allocation5 + $0x228] sm:$0xf0] }
  0xc0   :  { %508 = vmatmul.bf16.vlgmr.msra.gmra.mxu3 %v8489_v39  ;;  %534 = vmatmul.bf16.vlgmr.msrb.gmra.mxu1 %v8489_v39  ;;  %v7742_v43 = vld [vmem:[#allocation5 + $0x314] sm:$0xf] }
  0xc1   :  { %921 = vmatpush.bf16.msra.mxu3 %v5611_v38  ;;  %1107 = vmatpush.bf16.msrb.mxu1 %v5735_v57  ;;  %v5496_v38 = vld [vmem:[#allocation5 + $0x298] sm:$0xf0]  ;;  %v5563_v54 = vor.u32 %v7742_v43, %v5560_v45  ;;  %v5552_v57 = vld [vmem:[#allocation5 + $0x308] sm:$0xf0]  ;;  %v7714_v43 = vld [vmem:[#allocation5 + $0x234] sm:$0xf] }
  0xc2   :  { %909 = vmatpush.bf16.msra.mxu2 %v5539_v44  ;;  %1095 = vmatpush.bf16.msrb.mxu0 %v5663_v62  ;;  %v5703_v44 = vor.u32 %v7715_v33, %v5702_v32  ;;  %v5499_v48 = vor.u32 %v7726_v36, %v5496_v38  ;;  %v7711_v62 = vld [vmem:[#allocation5 + $0x214] sm:$0xf0]  ;;  %v7785_v32 = vld [vmem:[#allocation2 + $0x168] sm:$0xff]  ;;  %v7716_v33 = vld [vmem:[#allocation5 + $0x244] sm:$0xf] }
  0xc3   :  { %v7698_v38 = vld [vmem:[#allocation5 + $0x1b4] sm:$0xf] }
  0xc4   :  { %v5643_v41 = vor.u32 %v7698_v38, %v5640_v40  ;;  %v7811_v38 = vld [vmem:[#allocation2 + $0x238] sm:$0xff] }
  0xc5   :  { %922 = vmatpush.bf16.msra.mxu3 %v5603_v51  ;;  %1108 = vmatpush.bf16.msrb.mxu1 %v5727_v0  ;;  %v5488_v51 = vld [vmem:[#allocation5 + $0x288] sm:$0xf0]  ;;  %v5687_v0 = vor.u32 %v7711_v62, %v5686_v61 }
  0xc6   :  { %910 = vmatpush.bf16.msra.mxu2 %v5531_v60  ;;  %1096 = vmatpush.bf16.msrb.mxu0 %v5655_v11  ;;  %v5491_v58 = vor.u32 %v7724_v49, %v5488_v51  ;;  %v5555_v60 = vor.u32 %v7740_v56, %v5552_v57  ;;  %v7709_v11 = vld [vmem:[#allocation5 + $0x204] sm:$0xf0]  ;;  %v7712_v51 = vld [vmem:[#allocation5 + $0x224] sm:$0xf]  ;;  %v5624_v56 = vld [vmem:[#allocation5 + $0x198] sm:$0xf0] }
  0xc7   :  { %v5699_v53 = vor.u32 %v7712_v51, %v5696_v52  ;;  %v7773_v62 = vld [vmem:[#allocation2 + $0x108] sm:$0xff]  ;;  %v7799_v51 = vld [vmem:[#allocation2 + $0x1d8] sm:$0xff] }
  0xc9   :  { %923 = vmatpush.bf16.msra.mxu3 %v5595_v3  ;;  %1109 = vmatpush.bf16.msrb.mxu1 %v5719_v13  ;;  %v7693_v3 = vld [vmem:[#allocation5 + $0x184] sm:$0xf0]  ;;  %v5679_v13 = vor.u32 %v7709_v11, %v5678_v10 }
  0xca   :  { %911 = vmatpush.bf16.msra.mxu2 %v5523_v8  ;;  %1097 = vmatpush.bf16.msrb.mxu0 %v5647_v24  ;;  %v5615_v5 = vor.u32 %v7693_v3, %v5614_v2  ;;  %v5739_v8 = vor.u32 %v7722_v6, %v5736_v7  ;;  %v7786_v24 = vld [vmem:[#allocation2 + $0x170] sm:$0xff]  ;;  %v7781_v2 = vld [vmem:[#allocation2 + $0x148] sm:$0xff]  ;;  %v7708_v3 = vld [vmem:[#allocation5 + $0x204] sm:$0xf] }
  0xcb   :  { %v7772_v6 = vld [vmem:[#allocation2 + $0x100] sm:$0xff] }
  0xcd   :  { %924 = vmatpush.bf16.msra.mxu3 %v5587_v16  ;;  %627 = vmatmul.bf16.vlgmr.msrb.gmra.mxu2 %v294_v18  ;;  %v7787_v16 = vld [vmem:[#allocation2 + $0x178] sm:$0xff] }
  0xce   :  { %890 = vmatmul.bf16.vlgmr.msra.gmra.mxu0 %v8487_v34  ;;  %912 = vmatpush.bf16.msra.mxu2 %v5515_v22  ;;  %v5656_v22 = vld [vmem:[#allocation5 + $0x1d8] sm:$0xf0] }
  0xcf   :  { %1110 = vmatpush.bf16.msrb.mxu1 %v5711_v30  ;;  %1098 = vmatpush.bf16.msrb.mxu0 %v5639_v37  ;;  %v5659_v23 = vor.u32 %v7702_v21, %v5656_v22  ;;  %v5648_v30 = vld [vmem:[#allocation5 + $0x1c8] sm:$0xf0]  ;;  %v7776_v37 = vld [vmem:[#allocation2 + $0x120] sm:$0xff] }
  0xd0   :  { %640 = vmatmul.bf16.vlgmr.msrb.gmra.mxu3 %v294_v18  ;;  %903 = vmatmul.bf16.vlgmr.msra.gmra.mxu1 %v8489_v39  ;;  %v5728_v18 = vld [vmem:[#allocation5 + $0x268] sm:$0xf0]  ;;  %v5651_v31 = vor.u32 %v7700_v29, %v5648_v30 }
  0xd1   :  { %925 = vmatpush.bf16.msra.mxu3 %v5579_v28  ;;  %v5731_v19 = vor.u32 %v7720_v17, %v5728_v18  ;;  %v7777_v28 = vld [vmem:[#allocation2 + $0x128] sm:$0xff] }
  0xd2   :  { %913 = vmatpush.bf16.msra.mxu2 %v5507_v35  ;;  %v5712_v35 = vld [vmem:[#allocation5 + $0x248] sm:$0xf0]  ;;  %v646_v18 = vld [vmem:[#allocation10 + $0x2] ss:$8 sm:$0x3] }
  0xd3   :  { %1111 = vmatpush.bf16.msrb.mxu1 %v5703_v44  ;;  %1099 = vmatpush.bf16.msrb.mxu0 %v5631_v50  ;;  %v5715_v36 = vor.u32 %v7716_v33, %v5712_v35  ;;  %v5704_v44 = vld [vmem:[#allocation5 + $0x238] sm:$0xf0]  ;;  %v648_v21 = vperm.slane %v646_v18, 0  ;;  %v649_v25 = vperm.slane %v646_v18, 1  ;;  %v6096_v18 = vld [vmem:[#allocation5 + $0x3c8] sm:$0xf0] }
  0xd4   :  { %v5707_v45 = vor.u32 %v7714_v43, %v5704_v44  ;;  %v7783_v50 = vld [vmem:[#allocation2 + $0x158] sm:$0xff]  ;;  %v7810_v43 = vld [vmem:[#allocation2 + $0x230] sm:$0xff]  ;;  %v7801_v44 = vld [vmem:[#allocation2 + $0x1e8] sm:$0xff] }
  0xd5   :  { %926 = vmatpush.bf16.msra.mxu3 %v5571_v42  ;;  %v7784_v42 = vld [vmem:[#allocation2 + $0x160] sm:$0xff]  ;;  %v7803_v33 = vld [vmem:[#allocation2 + $0x1f8] sm:$0xff] }
  0xd6   :  { %914 = vmatpush.bf16.msra.mxu2 %v5499_v48  ;;  %v5632_v48 = vld [vmem:[#allocation5 + $0x1a8] sm:$0xf0] }
  0xd7   :  { %1112 = vmatpush.bf16.msrb.mxu1 %v5695_v55  ;;  %1100 = vmatpush.bf16.msrb.mxu0 %v5623_v59  ;;  %v5635_v49 = vor.u32 %v7696_v47, %v5632_v48  ;;  %v7694_v55 = vld [vmem:[#allocation5 + $0x194] sm:$0xf]  ;;  %v7800_v48 = vld [vmem:[#allocation2 + $0x1e0] sm:$0xff] }
  0xd8   :  { %v5627_v57 = vor.u32 %v7694_v55, %v5624_v56  ;;  %v7710_v59 = vld [vmem:[#allocation5 + $0x214] sm:$0xf] }
  0xd9   :  { %927 = vmatpush.bf16.msra.mxu3 %v5563_v54  ;;  %v7774_v54 = vld [vmem:[#allocation2 + $0x110] sm:$0xff] }
  0xda   :  { %915 = vmatpush.bf16.msra.mxu2 %v5491_v58  ;;  %v7782_v58 = vld [vmem:[#allocation2 + $0x150] sm:$0xff] }
  0xdb   :  { %1113 = vmatpush.bf16.msrb.mxu1 %v5687_v0  ;;  %1101 = vmatpush.bf16.msrb.mxu0 %v5615_v5  ;;  %v5616_v0 = vld [vmem:[#allocation5 + $0x188] sm:$0xf0]  ;;  %v7798_v55 = vld [vmem:[#allocation2 + $0x1d0] sm:$0xff] }
  0xdc   :  { %v5619_v1 = vor.u32 %v7692_v63, %v5616_v0  ;;  %v7806_v56 = vld [vmem:[#allocation2 + $0x210] sm:$0xff]  ;;  %v7825_v63 = vld [vmem:[#allocation2 + $0x2a8] sm:$0xff]  ;;  %v7824_v0 = vld [vmem:[#allocation2 + $0x2a0] sm:$0xff] }
  0xdd   :  { %928 = vmatpush.bf16.msra.mxu3 %v5555_v60  ;;  %916 = vmatmul.bf16.vlgmr.msra.gmra.mxu2 %v8487_v34  ;;  %v5688_v60 = vld [vmem:[#allocation5 + $0x218] sm:$0xf0] }
  0xde   :  { %1120 = vmatpush.bf16.msrb.mxu2 %v5675_v4  ;;  %v5691_v61 = vor.u32 %v7710_v59, %v5688_v60  ;;  %v5680_v4 = vld [vmem:[#allocation5 + $0x208] sm:$0xf0]  ;;  %v7796_v59 = vld [vmem:[#allocation2 + $0x1c0] sm:$0xff]  ;;  %v7827_v60 = vld [vmem:[#allocation2 + $0x2b8] sm:$0xff] }
  0xdf   :  { %1319 = vmatpush.bf16.msra.mxu0 %v7779_v9  ;;  %1114 = vmatpush.bf16.msrb.mxu1 %v5679_v13  ;;  %v5683_v5 = vor.u32 %v7708_v3, %v5680_v4  ;;  %v7821_v3 = vld [vmem:[#allocation2 + $0x288] sm:$0xff]  ;;  %v7771_v4 = vld [vmem:[#allocation2 + $0xf8] sm:$0xff] }
  0xe0   :  { %929 = vmatmul.bf16.vlgmr.msra.gmra.mxu3 %v8489_v39 }
  0xe1   :  { %1133 = vmatpush.bf16.msrb.mxu3 %v5739_v8  ;;  %v7780_v8 = vld [vmem:[#allocation2 + $0x140] sm:$0xff] }
  0xe2   :  { %1121 = vmatpush.bf16.msrb.mxu2 %v5667_v15 }
  0xe3   :  { %1332 = vmatpush.bf16.msra.mxu1 %v7787_v16  ;;  %1320 = vmatpush.bf16.msra.mxu0 %v7778_v20 }
  0xe5   :  { %1134 = vmatpush.bf16.msrb.mxu3 %v5731_v19 }
  0xe6   :  { %1122 = vmatpush.bf16.msrb.mxu2 %v5659_v23 }
  0xe7   :  { %1333 = vmatpush.bf16.msra.mxu1 %v7786_v24  ;;  %1321 = vmatpush.bf16.msra.mxu0 %v7777_v28 }
  0xe9   :  { %1135 = vmatpush.bf16.msrb.mxu3 %v5723_v27 }
  0xea   :  { %1123 = vmatpush.bf16.msrb.mxu2 %v5651_v31 }
  0xeb   :  { %1334 = vmatpush.bf16.msra.mxu1 %v7785_v32  ;;  %1322 = vmatpush.bf16.msra.mxu0 %v7776_v37 }
  0xed   :  { %1136 = vmatpush.bf16.msrb.mxu3 %v5715_v36 }
  0xee   :  { %1124 = vmatpush.bf16.msrb.mxu2 %v5643_v41 }
  0xef   :  { %1335 = vmatpush.bf16.msra.mxu1 %v7784_v42  ;;  %1323 = vmatpush.bf16.msra.mxu0 %v7775_v46  ;;  %v7802_v42 = vld [vmem:[#allocation2 + $0x1f0] sm:$0xff]  ;;  %v7809_v46 = vld [vmem:[#allocation2 + $0x228] sm:$0xff] }
  0xf1   :  { %1137 = vmatpush.bf16.msrb.mxu3 %v5707_v45 }
  0xf2   :  { %1125 = vmatpush.bf16.msrb.mxu2 %v5635_v49 }
  0xf3   :  { %1336 = vmatpush.bf16.msra.mxu1 %v7783_v50  ;;  %1324 = vmatpush.bf16.msra.mxu0 %v7774_v54  ;;  %v7808_v50 = vld [vmem:[#allocation2 + $0x220] sm:$0xff] }
  0xf5   :  { %1138 = vmatpush.bf16.msrb.mxu3 %v5699_v53  ;;  %v7807_v53 = vld [vmem:[#allocation2 + $0x218] sm:$0xff] }
  0xf6   :  { %1126 = vmatpush.bf16.msrb.mxu2 %v5627_v57  ;;  %v7797_v57 = vld [vmem:[#allocation2 + $0x1c8] sm:$0xff] }
  0xf7   :  { %1337 = vmatpush.bf16.msra.mxu1 %v7782_v58  ;;  %1325 = vmatpush.bf16.msra.mxu0 %v7773_v62  ;;  %v7805_v58 = vld [vmem:[#allocation2 + $0x208] sm:$0xff]  ;;  %v7826_v62 = vld [vmem:[#allocation2 + $0x2b0] sm:$0xff] }
  0xf9   :  { %1139 = vmatpush.bf16.msrb.mxu3 %v5691_v61  ;;  %v7804_v61 = vld [vmem:[#allocation2 + $0x200] sm:$0xff] }
  0xfa   :  { %1127 = vmatpush.bf16.msrb.mxu2 %v5619_v1  ;;  %v7823_v1 = vld [vmem:[#allocation2 + $0x298] sm:$0xff] }
  0xfb   :  { %1338 = vmatpush.bf16.msra.mxu1 %v7781_v2  ;;  %1326 = vmatpush.bf16.msra.mxu0 %v7772_v6  ;;  %v7822_v2 = vld [vmem:[#allocation2 + $0x290] sm:$0xff]  ;;  %v6120_v6 = vld [vmem:[#allocation5 + $0x3f8] sm:$0xf0] }
  0xfd   :  { %1140 = vmatpush.bf16.msrb.mxu3 %v5683_v5  ;;  %v7850_v5 = vld [vmem:[#allocation5 + $0x3f4] sm:$0xf] }
  0xff   :  { %1339 = vmatpush.bf16.msra.mxu1 %v7780_v8  ;;  %v6123_v8 = vor.u32 %v7850_v5, %v6120_v6  ;;  %v7756_v6 = vld [vmem:[#allocation2 + $0x80] sm:$0xff] }
 0x101   :  { %1454 = vmatpush.bf16.msra.mxu3 %v7771_v4  ;;  %v7815_v4 = vld [vmem:[#allocation2 + $0x258] sm:$0xff] }
 0x13a   :  { %v522_v7 = vpop.f32.mrf.mxu0 }
 0x13d   :  { %v535_v9 = vpop.f32.mrf.mxu1 }
 0x13e   :  { %v536_v23 = vadd.f32 %v535_v9, %v522_v7  ;;  %v7820_v7 = vld [vmem:[#allocation2 + $0x280] sm:$0xff] }
 0x13f   :  { %v7848_v9 = vld [vmem:[#allocation5 + $0x3e4] sm:$0xf] }
 0x140   :  { %v496_v10 = vpop.f32.mrf.mxu2 }
 0x142   :  { %v524_v12 = vpop.f32.mrf.mxu0 }
 0x143   :  { %v509_v11 = vpop.f32.mrf.mxu3 }
 0x144   :  { %v510_v20 = vadd.f32 %v509_v11, %v496_v10  ;;  %v6112_v10 = vld [vmem:[#allocation5 + $0x3e8] sm:$0xf0]  ;;  %v7770_v11 = vld [vmem:[#allocation2 + $0xf0] sm:$0xff] }
 0x145   :  { %v537_v13 = vpop.f32.mrf.mxu1  ;;  %1455 = vmatpush.bf16.msra.mxu3 %v7770_v11  ;;  %v6115_v12 = vor.u32 %v7848_v9, %v6112_v10  ;;  %v7814_v9 = vld [vmem:[#allocation2 + $0x250] sm:$0xff] }
 0x146   :  { %v7846_v13 = vld [vmem:[#allocation5 + $0x3d4] sm:$0xf]  ;;  %v6262_v11 = vld [vmem:[#allocation5 + $0x490] sm:$0xf] }
 0x148   :  { %v498_v14 = vpop.f32.mrf.mxu2 }
 0x149   :  { %v6104_v14 = vld [vmem:[#allocation5 + $0x3d8] sm:$0xf0] }
 0x14b   :  { %v511_v15 = vpop.f32.mrf.mxu3  ;;  %v891_v16 = vpop.f32.mrf.mxu0 }
 0x14c   :  { %v7769_v15 = vld [vmem:[#allocation2 + $0xe8] sm:$0xff] }
 0x14d   :  { %v904_v17 = vpop.f32.mrf.mxu1  ;;  %1456 = vmatpush.bf16.msra.mxu3 %v7769_v15  ;;  %v6254_v15 = vld [vmem:[#allocation5 + $0x480] sm:$0xf] }
 0x14e   :  { %v8502_v19 = vadd.f32 %v904_v17, %v891_v16  ;;  %v6107_v16 = vor.u32 %v7846_v13, %v6104_v14  ;;  %v7844_v17 = vld [vmem:[#allocation5 + $0x3c4] sm:$0xf]  ;;  %v7813_v13 = vld [vmem:[#allocation2 + $0x248] sm:$0xff] }
 0x150   :  { %v628_v22 = vpop.f32.mrf.mxu2 }
 0x151   :  { %v629_v24 = vadd.f32 %v628_v22, %v510_v20  ;;  %v7768_v20 = vld [vmem:[#allocation2 + $0xe0] sm:$0xff]  ;;  %v7842_v22 = vld [vmem:[#allocation5 + $0x3b4] sm:$0xf] }
 0x152   :  { %1457 = vmatpush.bf16.msra.mxu3 %v7768_v20  ;;  %v1147_v20 = vld [vmem:[#allocation10 + $0x3] ss:$8 sm:$0x3] }
 0x153   :  { %v641_v26 = vpop.f32.mrf.mxu3  ;;  %v893_v27 = vpop.f32.mrf.mxu0  ;;  %v652_v28 = vadd.f32 %v648_v21, %v629_v24  ;;  %v6099_v21 = vor.u32 %v7844_v17, %v6096_v18  ;;  %v7767_v24 = vld [vmem:[#allocation2 + $0xd8] sm:$0xff]  ;;  %v7812_v17 = vld [vmem:[#allocation2 + $0x240] sm:$0xff] }
 0x154   :  { %v642_v29 = vadd.f32 %v641_v26, %v536_v23  ;;  %v6088_v23 = vld [vmem:[#allocation5 + $0x3b8] sm:$0xf0]  ;;  %v7840_v26 = vld [vmem:[#allocation5 + $0x3a4] sm:$0xf]  ;;  %v6080_v27 = vld [vmem:[#allocation5 + $0x3a8] sm:$0xf0] }
 0x155   :  { %v906_v30 = vpop.f32.mrf.mxu1  ;;  %v8504_v31 = vmax.f32 %v652_v28, 0.0  ;;  %v7763_v28 = vld [vmem:[#allocation2 + $0xb8] sm:$0xff] }
 0x156   :  { %v653_v32 = vadd.f32 %v649_v25, %v642_v29  ;;  %1458 = vmatpush.bf16.msra.mxu3 %v7767_v24  ;;  %v6091_v25 = vor.u32 %v7842_v22, %v6088_v23  ;;  %v7766_v29 = vld [vmem:[#allocation2 + $0xd0] sm:$0xff]  ;;  %1441 = vmatpush.bf16.msra.mxu2 %v7763_v28  ;;  %v6083_v30 = vor.u32 %v7840_v26, %v6080_v27  ;;  %v1149_v23 = vperm.slane %v1147_v20, 0 }
 0x157   :  { %v688_v35 = vpack.c.bf16 %v8504_v31, %v8504_v31 }
 0x158   :  { %v8508_v36 = vmax.f32 %v653_v32, 0.0  ;;  %v630_v37 = vpop.f32.mrf.mxu2  ;;  %v7838_v32 = vld [vmem:[#allocation5 + $0x394] sm:$0xf] }
 0x159   :  { %1102 = vmatmul.bf16.vlgmr.msrb.gmra.mxu0 %v688_v35  ;;  %1128 = vmatmul.bf16.vlgmr.msrb.gmra.mxu2 %v688_v35  ;;  %v7762_v35 = vld [vmem:[#allocation2 + $0xb0] sm:$0xff]  ;;  %v7765_v37 = vld [vmem:[#allocation2 + $0xc8] sm:$0xff] }
 0x15a   :  { %v689_v40 = vpack.c.bf16 %v8508_v36, %v8508_v36  ;;  %1615 = vmatpush.bf16.msrb.mxu0 %v7803_v33  ;;  %1459 = vmatpush.bf16.msra.mxu3 %v7766_v29  ;;  %v6072_v33 = vld [vmem:[#allocation5 + $0x398] sm:$0xf0] }
 0x15b   :  { %v643_v41 = vpop.f32.mrf.mxu3  ;;  %1442 = vmatpush.bf16.msra.mxu2 %v7762_v35 }
 0x15c   :  { %1115 = vmatmul.bf16.vlgmr.msrb.gmra.mxu1 %v689_v40  ;;  %1141 = vmatmul.bf16.vlgmr.msrb.gmra.mxu3 %v689_v40  ;;  %v7836_v40 = vld [vmem:[#allocation5 + $0x384] sm:$0xf]  ;;  %v6064_v41 = vld [vmem:[#allocation5 + $0x388] sm:$0xf0] }
 0x15d   :  { %1628 = vmatpush.bf16.msrb.mxu1 %v7811_v38  ;;  %v6075_v38 = vor.u32 %v7838_v32, %v6072_v33 }
 0x15e   :  { %1616 = vmatpush.bf16.msrb.mxu0 %v7802_v42  ;;  %1460 = vmatpush.bf16.msra.mxu3 %v7765_v37  ;;  %v7761_v42 = vld [vmem:[#allocation2 + $0xa8] sm:$0xff] }
 0x15f   :  { %1443 = vmatpush.bf16.msra.mxu2 %v7761_v42 }
 0x160   :  { %v917_v45 = vpop.f32.mrf.mxu2 }
 0x161   :  { %1629 = vmatpush.bf16.msrb.mxu1 %v7810_v43  ;;  %v7764_v43 = vld [vmem:[#allocation2 + $0xc0] sm:$0xff] }
 0x162   :  { %1617 = vmatpush.bf16.msrb.mxu0 %v7801_v44  ;;  %v7819_v44 = vld [vmem:[#allocation2 + $0x278] sm:$0xff]  ;;  %1461 = vmatpush.bf16.msra.mxu3 %v7764_v43 }
 0x163   :  { %v930_v47 = vpop.f32.mrf.mxu3 }
 0x164   :  { %v8512_v49 = vadd.f32 %v930_v47, %v917_v45  ;;  %v6310_v45 = vld [vmem:[#allocation5 + $0x4f0] sm:$0xf]  ;;  %v6067_v47 = vor.u32 %v7836_v40, %v6064_v41  ;;  %v7867_v41 = vld [vmem:[#allocation5 + $0x474] sm:$0xf0] }
 0x165   :  { %1630 = vmatpush.bf16.msrb.mxu1 %v7809_v46  ;;  %v7899_v46 = vld [vmem:[#allocation5 + $0x4f4] sm:$0xf0] }
 0x166   :  { %1618 = vmatpush.bf16.msrb.mxu0 %v7800_v48  ;;  %1833 = vmatpush.bf16.msrb.mxu3 %v7819_v44  ;;  %v6311_v48 = vor.u32 %v7899_v46, %v6310_v45  ;;  %v7865_v46 = vld [vmem:[#allocation5 + $0x464] sm:$0xf0] }
 0x168   :  { %v919_v52 = vpop.f32.mrf.mxu2 }
 0x169   :  { %1631 = vmatpush.bf16.msrb.mxu1 %v7808_v50  ;;  %1327 = vmatmul.bf16.vlgmr.msra.gmra.mxu0 %v8487_v34  ;;  %v7760_v50 = vld [vmem:[#allocation2 + $0xa0] sm:$0xff] }
 0x16a   :  { %1619 = vmatpush.bf16.msrb.mxu0 %v7799_v51  ;;  %v7818_v51 = vld [vmem:[#allocation2 + $0x270] sm:$0xff]  ;;  %v6302_v52 = vld [vmem:[#allocation5 + $0x4e0] sm:$0xf]  ;;  %1444 = vmatpush.bf16.msra.mxu2 %v7760_v50 }
 0x16b   :  { %v932_v54 = vpop.f32.mrf.mxu3  ;;  %1834 = vmatpush.bf16.msrb.mxu3 %v7818_v51 }
 0x16c   :  { %1340 = vmatmul.bf16.vlgmr.msra.gmra.mxu1 %v8489_v39  ;;  %v7759_v54 = vld [vmem:[#allocation2 + $0x98] sm:$0xff] }
 0x16d   :  { %1632 = vmatpush.bf16.msrb.mxu1 %v7807_v53  ;;  %v7897_v53 = vld [vmem:[#allocation5 + $0x4e4] sm:$0xf0] }
 0x16e   :  { %1620 = vmatpush.bf16.msrb.mxu0 %v7798_v55  ;;  %v7817_v55 = vld [vmem:[#allocation2 + $0x268] sm:$0xff]  ;;  %1445 = vmatpush.bf16.msra.mxu2 %v7759_v54  ;;  %v7863_v54 = vld [vmem:[#allocation5 + $0x454] sm:$0xf0] }
 0x16f   :  { %1835 = vmatpush.bf16.msrb.mxu3 %v7817_v55 }
 0x171   :  { %1633 = vmatpush.bf16.msrb.mxu1 %v7806_v56  ;;  %v6303_v56 = vor.u32 %v7897_v53, %v6302_v52  ;;  %v6166_v53 = vld [vmem:[#allocation5 + $0x450] sm:$0xf] }
 0x172   :  { %1621 = vmatpush.bf16.msrb.mxu0 %v7797_v57  ;;  %v6294_v57 = vld [vmem:[#allocation5 + $0x4d0] sm:$0xf]  ;;  %v6167_v55 = vor.u32 %v7863_v54, %v6166_v53  ;;  %v7839_v54 = vld [vmem:[#allocation5 + $0x394] sm:$0xf0] }
 0x173   :  { %v6070_v53 = vld [vmem:[#allocation5 + $0x390] sm:$0xf] }
 0x175   :  { %1634 = vmatpush.bf16.msrb.mxu1 %v7805_v58  ;;  %v7895_v58 = vld [vmem:[#allocation5 + $0x4d4] sm:$0xf0] }
 0x176   :  { %1622 = vmatpush.bf16.msrb.mxu0 %v7796_v59  ;;  %v6295_v59 = vor.u32 %v7895_v58, %v6294_v57  ;;  %v7861_v57 = vld [vmem:[#allocation5 + $0x444] sm:$0xf0] }
 0x179   :  { %1635 = vmatpush.bf16.msrb.mxu1 %v7804_v61  ;;  %1623 = vmatmul.bf16.vlgmr.msrb.gmra.mxu0 %v8487_v34  ;;  %v6286_v61 = vld [vmem:[#allocation5 + $0x4c0] sm:$0xf] }
 0x17a   :  { %1846 = vmatpush.bf16.msra.mxu0 %v7827_v60  ;;  %v7758_v60 = vld [vmem:[#allocation2 + $0x90] sm:$0xff] }
 0x17b   :  { %1446 = vmatpush.bf16.msra.mxu2 %v7758_v60 }
 0x17c   :  { %1636 = vmatmul.bf16.vlgmr.msrb.gmra.mxu1 %v8489_v39 }
 0x17e   :  { %1847 = vmatpush.bf16.msra.mxu0 %v7826_v62  ;;  %v7893_v62 = vld [vmem:[#allocation5 + $0x4c4] sm:$0xf0] }
 0x182   :  { %1848 = vmatpush.bf16.msra.mxu0 %v7825_v63  ;;  %v7816_v63 = vld [vmem:[#allocation2 + $0x260] sm:$0xff] }
 0x183   :  { %1836 = vmatpush.bf16.msrb.mxu3 %v7816_v63 }
 0x186   :  { %1849 = vmatpush.bf16.msra.mxu0 %v7824_v0  ;;  %v6287_v0 = vor.u32 %v7893_v62, %v6286_v61  ;;  %v6150_v61 = vld [vmem:[#allocation5 + $0x430] sm:$0xf]  ;;  %v7859_v62 = vld [vmem:[#allocation5 + $0x434] sm:$0xf0] }
 0x187   :  { %1837 = vmatpush.bf16.msrb.mxu3 %v7815_v4  ;;  %v6151_v63 = vor.u32 %v7859_v62, %v6150_v61  ;;  %v1467_v62 = vld [vmem:[#allocation10 + $0x4] ss:$0 sm:$0xff] }
 0x18a   :  { %1850 = vmatpush.bf16.msra.mxu0 %v7823_v1  ;;  %v7757_v1 = vld [vmem:[#allocation2 + $0x88] sm:$0xff] }
 0x18b   :  { %1447 = vmatpush.bf16.msra.mxu2 %v7757_v1  ;;  %1838 = vmatpush.bf16.msrb.mxu3 %v7814_v9  ;;  %v7857_v1 = vld [vmem:[#allocation5 + $0x424] sm:$0xf0]  ;;  %v6126_v9 = vld [vmem:[#allocation5 + $0x400] sm:$0xf] }
 0x18e   :  { %1851 = vmatpush.bf16.msra.mxu0 %v7822_v2  ;;  %v6278_v2 = vld [vmem:[#allocation5 + $0x4b0] sm:$0xf] }
 0x18f   :  { %1448 = vmatpush.bf16.msra.mxu2 %v7756_v6  ;;  %1839 = vmatpush.bf16.msrb.mxu3 %v7813_v13  ;;  %v6134_v6 = vld [vmem:[#allocation5 + $0x410] sm:$0xf] }
 0x192   :  { %1852 = vmatpush.bf16.msra.mxu0 %v7821_v3  ;;  %v7891_v3 = vld [vmem:[#allocation5 + $0x4b4] sm:$0xf0] }
 0x193   :  { %v6279_v5 = vor.u32 %v7891_v3, %v6278_v2  ;;  %1840 = vmatpush.bf16.msrb.mxu3 %v7812_v17 }
 0x196   :  { %1853 = vmatpush.bf16.msra.mxu0 %v7820_v7  ;;  %v6270_v7 = vld [vmem:[#allocation5 + $0x4a0] sm:$0xf] }
 0x199   :  { %1854 = vmatmul.bf16.vlgmr.msra.gmra.mxu0 %v8489_v39 }
 0x19a   :  { %2167 = vmatpush.bf16.msrb.mxu0 %v6123_v8  ;;  %v7889_v8 = vld [vmem:[#allocation5 + $0x4a4] sm:$0xf0] }
 0x19b   :  { %v6271_v10 = vor.u32 %v7889_v8, %v6270_v7  ;;  %v7855_v7 = vld [vmem:[#allocation5 + $0x414] sm:$0xf0] }
 0x19c   :  { %v6135_v8 = vor.u32 %v7855_v7, %v6134_v6  ;;  %v7835_v6 = vld [vmem:[#allocation2 + $0x2f8] sm:$0xff]  ;;  %v7834_v7 = vld [vmem:[#allocation2 + $0x2f0] sm:$0xff] }
 0x19d   :  { %1928 = vmatpush.bf16.msra.mxu1 %v7835_v6  ;;  %v7883_v6 = vld [vmem:[#allocation2 + $0x378] sm:$0xff] }
 0x19e   :  { %2168 = vmatpush.bf16.msrb.mxu0 %v6115_v12  ;;  %v7887_v12 = vld [vmem:[#allocation5 + $0x494] sm:$0xf0] }
 0x19f   :  { %v6263_v14 = vor.u32 %v7887_v12, %v6262_v11 }
 0x1a1   :  { %1929 = vmatpush.bf16.msra.mxu1 %v7834_v7  ;;  %v7911_v7 = vld [vmem:[#allocation5 + $0x554] sm:$0xf0] }
 0x1a2   :  { %2169 = vmatpush.bf16.msrb.mxu0 %v6107_v16  ;;  %v7885_v16 = vld [vmem:[#allocation5 + $0x484] sm:$0xf0] }
 0x1a3   :  { %v6255_v18 = vor.u32 %v7885_v16, %v6254_v15  ;;  %v7795_v15 = vld [vmem:[#allocation2 + $0x1b8] sm:$0xff]  ;;  %v7794_v16 = vld [vmem:[#allocation2 + $0x1b0] sm:$0xff] }
 0x1a4   :  { %1689 = vmatpush.bf16.msrb.mxu2 %v7795_v15 }
 0x1a6   :  { %2170 = vmatpush.bf16.msrb.mxu0 %v6099_v21 }
 0x1a8   :  { %1690 = vmatpush.bf16.msrb.mxu2 %v7794_v16  ;;  %v7866_v16 = vld [vmem:[#allocation5 + $0x474] sm:$0xf] }
 0x1aa   :  { %2171 = vmatpush.bf16.msrb.mxu0 %v6091_v25 }
 0x1ae   :  { %2172 = vmatpush.bf16.msrb.mxu0 %v6083_v30  ;;  %v1150_v30 = vperm.slane %v1147_v20, 1 }
 0x1b2   :  { %2173 = vmatpush.bf16.msrb.mxu0 %v6075_v38 }
 0x1b6   :  { %2174 = vmatpush.bf16.msrb.mxu0 %v6067_v47 }
 0x1b9   :  { %2175 = vmatmul.bf16.vlgmr.msrb.gmra.mxu0 %v8487_v34 }
 0x1ba   :  { %2553 = vmatpush.bf16.msra.mxu0 %v6311_v48 }
 0x1be   :  { %2554 = vmatpush.bf16.msra.mxu0 %v6303_v56  ;;  %v6158_v56 = vld [vmem:[#allocation5 + $0x440] sm:$0xf] }
 0x1bf   :  { %v6159_v60 = vor.u32 %v7861_v57, %v6158_v56  ;;  %v6062_v56 = vld [vmem:[#allocation5 + $0x380] sm:$0xf]  ;;  %v7837_v57 = vld [vmem:[#allocation5 + $0x384] sm:$0xf0] }
 0x1c2   :  { %2555 = vmatpush.bf16.msra.mxu0 %v6295_v59 }
 0x1c6   :  { %2556 = vmatpush.bf16.msra.mxu0 %v6287_v0  ;;  %v6142_v0 = vld [vmem:[#allocation5 + $0x420] sm:$0xf] }
 0x1c7   :  { %v6143_v4 = vor.u32 %v7857_v1, %v6142_v0 }
 0x1ca   :  { %2557 = vmatpush.bf16.msra.mxu0 %v6279_v5 }
 0x1ce   :  { %2558 = vmatpush.bf16.msra.mxu0 %v6271_v10  ;;  %v7853_v10 = vld [vmem:[#allocation5 + $0x404] sm:$0xf0] }
 0x1cf   :  { %v6127_v13 = vor.u32 %v7853_v10, %v6126_v9  ;;  %v7831_v10 = vld [vmem:[#allocation2 + $0x2d8] sm:$0xff] }
 0x1d2   :  { %2559 = vmatpush.bf16.msra.mxu0 %v6263_v14 }
 0x1d6   :  { %2560 = vmatpush.bf16.msra.mxu0 %v6255_v18  ;;  %v1103_v21 = vpop.f32.mrf.mxu0  ;;  %v7793_v18 = vld [vmem:[#allocation2 + $0x1a8] sm:$0xff] }
 0x1d7   :  { %v1104_v22 = vadd.f32 %v1103_v21, %v8502_v19  ;;  %v6182_v19 = vld [vmem:[#allocation5 + $0x470] sm:$0xf]  ;;  %1691 = vmatpush.bf16.msrb.mxu2 %v7793_v18  ;;  %v7792_v21 = vld [vmem:[#allocation2 + $0x1a0] sm:$0xff] }
 0x1d8   :  { %v6183_v44 = vor.u32 %v7867_v41, %v6182_v19  ;;  %v6094_v41 = vld [vmem:[#allocation5 + $0x3c0] sm:$0xf] }
 0x1d9   :  { %2561 = vmatmul.bf16.vlgmr.msra.gmra.mxu0 %v8487_v34  ;;  %v1116_v24 = vpop.f32.mrf.mxu1  ;;  %v7828_v18 = vld [vmem:[#allocation2 + $0x2c0] sm:$0xff] }
 0x1da   :  { %v1117_v25 = vadd.f32 %v1116_v24, %v1104_v22  ;;  %v7791_v22 = vld [vmem:[#allocation2 + $0x198] sm:$0xff]  ;;  %v7790_v24 = vld [vmem:[#allocation2 + $0x190] sm:$0xff] }
 0x1db   :  { %1692 = vmatpush.bf16.msrb.mxu2 %v7792_v21 }
 0x1dc   :  { %v1153_v26 = vadd.f32 %v1149_v23, %v1117_v25  ;;  %v1129_v27 = vpop.f32.mrf.mxu2  ;;  %v7789_v25 = vld [vmem:[#allocation2 + $0x188] sm:$0xff] }
 0x1dd   :  { %v1130_v29 = vadd.f32 %v1129_v27, %v8512_v49  ;;  %v6174_v49 = vld [vmem:[#allocation5 + $0x460] sm:$0xf]  ;;  %v6118_v27 = vld [vmem:[#allocation5 + $0x3f0] sm:$0xf] }
 0x1de   :  { %v8522_v28 = vmax.f32 %v1153_v26, 0.0  ;;  %v1105_v32 = vpop.f32.mrf.mxu0  ;;  %v6175_v51 = vor.u32 %v7865_v46, %v6174_v49  ;;  %v7788_v26 = vld [vmem:[#allocation2 + $0x180] sm:$0xff]  ;;  %v7843_v49 = vld [vmem:[#allocation5 + $0x3b4] sm:$0xf0] }
 0x1df   :  { %v1142_v33 = vpop.f32.mrf.mxu3  ;;  %1693 = vmatpush.bf16.msrb.mxu2 %v7791_v22  ;;  %v6110_v32 = vld [vmem:[#allocation5 + $0x3e0] sm:$0xf]  ;;  %v7864_v22 = vld [vmem:[#allocation5 + $0x464] sm:$0xf] }
 0x1e0   :  { %v1189_v35 = vpack.c.bf16 %v8522_v28, %v8522_v28  ;;  %v1143_v37 = vadd.f32 %v1142_v33, %v1130_v29  ;;  %v7851_v29 = vld [vmem:[#allocation5 + $0x3f4] sm:$0xf0]  ;;  %v7849_v33 = vld [vmem:[#allocation5 + $0x3e4] sm:$0xf0] }
 0x1e1   :  { %v1118_v38 = vpop.f32.mrf.mxu1 }
 0x1e2   :  { %v1154_v40 = vadd.f32 %v1150_v30, %v1143_v37  ;;  %1449 = vmatmul.bf16.vlgmr.msra.gmra.mxu2 %v1189_v35  ;;  %v6119_v30 = vor.u32 %v7851_v29, %v6118_v27  ;;  %v6111_v35 = vor.u32 %v7849_v33, %v6110_v32  ;;  %v6102_v37 = vld [vmem:[#allocation5 + $0x3d0] sm:$0xf]  ;;  %v7847_v38 = vld [vmem:[#allocation5 + $0x3d4] sm:$0xf0]  ;;  %v6168_v27 = vld [vmem:[#allocation5 + $0x458] sm:$0xf0] }
 0x1e3   :  { %1694 = vmatpush.bf16.msrb.mxu2 %v7790_v24  ;;  %v6160_v32 = vld [vmem:[#allocation5 + $0x448] sm:$0xf0] }
 0x1e4   :  { %v8527_v42 = vmax.f32 %v1154_v40, 0.0  ;;  %v1131_v43 = vpop.f32.mrf.mxu2  ;;  %v6103_v40 = vor.u32 %v7847_v38, %v6102_v37  ;;  %v6152_v37 = vld [vmem:[#allocation5 + $0x438] sm:$0xf0] }
 0x1e5   :  { %v7845_v43 = vld [vmem:[#allocation5 + $0x3c4] sm:$0xf0] }
 0x1e6   :  { %v1190_v45 = vpack.c.bf16 %v8527_v42, %v8527_v42  ;;  %v1328_v48 = vpop.f32.mrf.mxu0 }
 0x1e7   :  { %v1144_v47 = vpop.f32.mrf.mxu3  ;;  %1695 = vmatpush.bf16.msrb.mxu2 %v7789_v25 }
 0x1e8   :  { %1462 = vmatmul.bf16.vlgmr.msra.gmra.mxu3 %v1190_v45  ;;  %v6086_v45 = vld [vmem:[#allocation5 + $0x3b0] sm:$0xf]  ;;  %v6078_v47 = vld [vmem:[#allocation5 + $0x3a0] sm:$0xf] }
 0x1e9   :  { %v1341_v50 = vpop.f32.mrf.mxu1  ;;  %2154 = vmatpush.bf16.msra.mxu3 %v6183_v44  ;;  %v6095_v44 = vor.u32 %v7845_v43, %v6094_v41  ;;  %v6087_v46 = vor.u32 %v7843_v49, %v6086_v45  ;;  %v6144_v41 = vld [vmem:[#allocation5 + $0x428] sm:$0xf0]  ;;  %v6136_v45 = vld [vmem:[#allocation5 + $0x418] sm:$0xf0] }
 0x1ea   :  { %v8531_v52 = vadd.f32 %v1341_v50, %v1328_v48  ;;  %v7841_v48 = vld [vmem:[#allocation5 + $0x3a4] sm:$0xf0] }
 0x1eb   :  { %1696 = vmatpush.bf16.msrb.mxu2 %v7788_v26  ;;  %v7862_v26 = vld [vmem:[#allocation5 + $0x454] sm:$0xf] }
 0x1ec   :  { %v6171_v29 = vor.u32 %v7862_v26, %v6168_v27  ;;  %v6334_v26 = vld [vmem:[#allocation5 + $0x520] sm:$0xf]  ;;  %v7905_v27 = vld [vmem:[#allocation5 + $0x524] sm:$0xf0] }
 0x1ed   :  { %2155 = vmatpush.bf16.msra.mxu3 %v6175_v51  ;;  %v6079_v51 = vor.u32 %v7841_v48, %v6078_v47  ;;  %v6128_v47 = vld [vmem:[#allocation5 + $0x408] sm:$0xf0] }
 0x1ee   :  { %v1330_v58 = vpop.f32.mrf.mxu0 }
 0x1ef   :  { %2141 = vmatpush.bf16.msra.mxu2 %v6119_v30  ;;  %v6063_v58 = vor.u32 %v7837_v57, %v6062_v56  ;;  %v7860_v30 = vld [vmem:[#allocation5 + $0x444] sm:$0xf] }
 0x1f0   :  { %v6163_v33 = vor.u32 %v7860_v30, %v6160_v32  ;;  %v1860_v57 = vld [vmem:[#allocation10 + $0x6] ss:$0 sm:$0xff]  ;;  %v7879_v30 = vld [vmem:[#allocation2 + $0x358] sm:$0xff]  ;;  %v6335_v32 = vor.u32 %v7905_v27, %v6334_v26  ;;  %v6320_v26 = vld [vmem:[#allocation5 + $0x508] sm:$0xf0] }
 0x1f1   :  { %v1343_v59 = vpop.f32.mrf.mxu1  ;;  %2156 = vmatpush.bf16.msra.mxu3 %v6167_v55  ;;  %v6071_v55 = vor.u32 %v7839_v54, %v6070_v53 }
 0x1f3   :  { %2142 = vmatpush.bf16.msra.mxu2 %v6111_v35  ;;  %v7858_v35 = vld [vmem:[#allocation5 + $0x434] sm:$0xf] }
 0x1f4   :  { %v6155_v38 = vor.u32 %v7858_v35, %v6152_v37  ;;  %v7903_v35 = vld [vmem:[#allocation5 + $0x514] sm:$0xf0]  ;;  %v7870_v37 = vld [vmem:[#allocation2 + $0x310] sm:$0xff] }
 0x1f5   :  { %2157 = vmatpush.bf16.msra.mxu3 %v6159_v60 }
 0x1f6   :  { %v1624_v2 = vpop.f32.mrf.mxu0 }
 0x1f7   :  { %2143 = vmatpush.bf16.msra.mxu2 %v6103_v40  ;;  %v7856_v40 = vld [vmem:[#allocation5 + $0x424] sm:$0xf] }
 0x1f8   :  { %1841 = vmatmul.bf16.vlgmr.msrb.gmra.mxu3 %v8487_v34  ;;  %v6147_v43 = vor.u32 %v7856_v40, %v6144_v41  ;;  %v6318_v41 = vld [vmem:[#allocation5 + $0x500] sm:$0xf] }
 0x1f9   :  { %v1637_v3 = vpop.f32.mrf.mxu1  ;;  %2158 = vmatpush.bf16.msra.mxu3 %v6151_v63 }
 0x1fa   :  { %v8534_v5 = vadd.f32 %v1637_v3, %v1624_v2 }
 0x1fb   :  { %2144 = vmatpush.bf16.msra.mxu2 %v6095_v44  ;;  %v7854_v44 = vld [vmem:[#allocation5 + $0x414] sm:$0xf] }
 0x1fc   :  { %v6139_v49 = vor.u32 %v7854_v44, %v6136_v45  ;;  %v7869_v44 = vld [vmem:[#allocation2 + $0x308] sm:$0xff] }
 0x1fd   :  { %2159 = vmatpush.bf16.msra.mxu3 %v6143_v4  ;;  %v7877_v45 = vld [vmem:[#allocation2 + $0x348] sm:$0xff] }
 0x1fe   :  { %v1626_v11 = vpop.f32.mrf.mxu0 }
 0x1ff   :  { %2145 = vmatpush.bf16.msra.mxu2 %v6087_v46  ;;  %v7852_v46 = vld [vmem:[#allocation5 + $0x404] sm:$0xf] }
 0x200   :  { %v6131_v48 = vor.u32 %v7852_v46, %v6128_v47  ;;  %v6376_v46 = vld [vmem:[#allocation5 + $0x578] sm:$0xf0] }
 0x201   :  { %v1639_v12 = vpop.f32.mrf.mxu1  ;;  %2160 = vmatpush.bf16.msra.mxu3 %v6135_v8  ;;  %v7833_v8 = vld [vmem:[#allocation2 + $0x2e8] sm:$0xff] }
 0x202   :  { %1930 = vmatpush.bf16.msra.mxu1 %v7833_v8  ;;  %v7830_v12 = vld [vmem:[#allocation2 + $0x2d0] sm:$0xff] }
 0x203   :  { %2146 = vmatpush.bf16.msra.mxu2 %v6079_v51  ;;  %v1702_v51 = vld [vmem:[#allocation10 + $0x5] ss:$0 sm:$0xff]  ;;  %v7874_v8 = vld [vmem:[#allocation2 + $0x330] sm:$0xff] }
 0x205   :  { %2161 = vmatpush.bf16.msra.mxu3 %v6127_v13  ;;  %v7829_v13 = vld [vmem:[#allocation2 + $0x2c8] sm:$0xff] }
 0x207   :  { %2147 = vmatpush.bf16.msra.mxu2 %v6071_v55 }
 0x208   :  { %2162 = vmatmul.bf16.vlgmr.msra.gmra.mxu3 %v8489_v39 }
 0x20b   :  { %2148 = vmatpush.bf16.msra.mxu2 %v6063_v58 }
 0x216   :  { %v8537_v14 = vpop.f32.mrf.mxu0 }
 0x21e   :  { %v1857_v17 = vpop.f32.mrf.mxu0 }
 0x21f   :  { %v6184_v17 = vld [vmem:[#allocation5 + $0x478] sm:$0xf0] }
 0x220   :  { %v6187_v21 = vor.u32 %v7866_v16, %v6184_v17  ;;  %v7881_v16 = vld [vmem:[#allocation2 + $0x368] sm:$0xff] }
 0x236   :  { %v8539_v20 = vpop.f32.mrf.mxu0 }
 0x23e   :  { %v2178_v23 = vpop.f32.mrf.mxu0 }
 0x23f   :  { %v6176_v23 = vld [vmem:[#allocation5 + $0x468] sm:$0xf0] }
 0x240   :  { %v6179_v24 = vor.u32 %v7864_v22, %v6176_v23  ;;  %v7872_v22 = vld [vmem:[#allocation2 + $0x320] sm:$0xff] }
 0x256   :  { %v8541_v19 = vpop.f32.mrf.mxu0 }
 0x25e   :  { %v2564_v50 = vpop.f32.mrf.mxu0 }
 0x265   :  { %v1450_v59 = vpop.f32.mrf.mxu2 }
 0x266   :  { %v1451_v60 = vadd.f32 %v1450_v59, %v8531_v52  ;;  %v7832_v52 = vld [vmem:[#allocation2 + $0x2e0] sm:$0xff]  ;;  %v6374_v59 = vld [vmem:[#allocation5 + $0x570] sm:$0xf] }
 0x267   :  { %1931 = vmatpush.bf16.msra.mxu1 %v7832_v52  ;;  %v7882_v52 = vld [vmem:[#allocation2 + $0x370] sm:$0xff] }
 0x26b   :  { %v1463_v61 = vpop.f32.mrf.mxu3  ;;  %1932 = vmatpush.bf16.msra.mxu1 %v7831_v10 }
 0x26c   :  { %v1464_v63 = vadd.f32 %v1463_v61, %v1451_v60  ;;  %v7915_v60 = vld [vmem:[#allocation5 + $0x574] sm:$0xf0] }
 0x26d   :  { %v1452_v0 = vpop.f32.mrf.mxu2 }
 0x26e   :  { %v1468_v1 = vadd.f32 %v1467_v62, %v1464_v63  ;;  %v6375_v63 = vor.u32 %v7915_v60, %v6374_v59  ;;  %v7896_v60 = vld [vmem:[#allocation5 + $0x4e4] sm:$0xf] }
 0x26f   :  { %1933 = vmatpush.bf16.msra.mxu1 %v7830_v12  ;;  %v7909_v12 = vld [vmem:[#allocation5 + $0x544] sm:$0xf0] }
 0x270   :  { %v8544_v2 = vmax.f32 %v1468_v1, 0.0  ;;  %v6366_v1 = vld [vmem:[#allocation5 + $0x560] sm:$0xf] }
 0x272   :  { %v1486_v3 = vpack.c.bf16 %v8544_v2, %v8544_v2 }
 0x273   :  { %v1465_v4 = vpop.f32.mrf.mxu3  ;;  %1934 = vmatpush.bf16.msra.mxu1 %v7829_v13  ;;  %v7873_v13 = vld [vmem:[#allocation2 + $0x328] sm:$0xff] }
 0x274   :  { %1697 = vmatmul.bf16.vlgmr.msrb.gmra.mxu2 %v1486_v3  ;;  %v7913_v3 = vld [vmem:[#allocation5 + $0x564] sm:$0xf0] }
 0x275   :  { %v6367_v4 = vor.u32 %v7913_v3, %v6366_v1  ;;  %2277 = vmatpush.bf16.msrb.mxu2 %v7883_v6 }
 0x277   :  { %1935 = vmatpush.bf16.msra.mxu1 %v7828_v18  ;;  %v6342_v18 = vld [vmem:[#allocation5 + $0x530] sm:$0xf] }
 0x279   :  { %2278 = vmatpush.bf16.msrb.mxu2 %v7882_v52  ;;  %v7904_v52 = vld [vmem:[#allocation5 + $0x524] sm:$0xf] }
 0x27b   :  { %v1842_v9 = vpop.f32.mrf.mxu3  ;;  %2180 = vmatpush.bf16.msrb.mxu1 %v6187_v21  ;;  %v7907_v21 = vld [vmem:[#allocation5 + $0x534] sm:$0xf0] }
 0x27c   :  { %v1856_v55 = vadd.f32 %v8537_v14, %v1842_v9  ;;  %v6358_v14 = vld [vmem:[#allocation5 + $0x550] sm:$0xf] }
 0x27d   :  { %v6359_v10 = vor.u32 %v7911_v7, %v6358_v14  ;;  %2279 = vmatpush.bf16.msrb.mxu2 %v7881_v16  ;;  %v7906_v14 = vld [vmem:[#allocation5 + $0x534] sm:$0xf]  ;;  %v6344_v7 = vld [vmem:[#allocation5 + $0x538] sm:$0xf0] }
 0x27f   :  { %2181 = vmatpush.bf16.msrb.mxu1 %v6179_v24  ;;  %v7880_v24 = vld [vmem:[#allocation2 + $0x360] sm:$0xff] }
 0x281   :  { %2280 = vmatpush.bf16.msrb.mxu2 %v7880_v24 }
 0x283   :  { %v1844_v11 = vpop.f32.mrf.mxu3  ;;  %2182 = vmatpush.bf16.msrb.mxu1 %v6171_v29  ;;  %v7871_v29 = vld [vmem:[#allocation2 + $0x318] sm:$0xff] }
 0x284   :  { %2149 = vmatmul.bf16.vlgmr.msra.gmra.mxu2 %v8487_v34  ;;  %v6350_v11 = vld [vmem:[#allocation5 + $0x540] sm:$0xf] }
 0x285   :  { %v6351_v17 = vor.u32 %v7909_v12, %v6350_v11  ;;  %2281 = vmatpush.bf16.msrb.mxu2 %v7879_v30  ;;  %v7894_v12 = vld [vmem:[#allocation5 + $0x4d4] sm:$0xf]  ;;  %v6280_v30 = vld [vmem:[#allocation5 + $0x4b8] sm:$0xf0] }
 0x287   :  { %2183 = vmatpush.bf16.msrb.mxu1 %v6163_v33  ;;  %v6326_v33 = vld [vmem:[#allocation5 + $0x510] sm:$0xf] }
 0x288   :  { %v6327_v40 = vor.u32 %v7903_v35, %v6326_v33  ;;  %v7888_v33 = vld [vmem:[#allocation5 + $0x4a4] sm:$0xf]  ;;  %v6272_v35 = vld [vmem:[#allocation5 + $0x4a8] sm:$0xf0] }
 0x28b   :  { %v8549_v15 = vpop.f32.mrf.mxu3  ;;  %2184 = vmatpush.bf16.msrb.mxu1 %v6155_v38  ;;  %v7878_v38 = vld [vmem:[#allocation2 + $0x350] sm:$0xff] }
 0x28c   :  { %2282 = vmatpush.bf16.msrb.mxu2 %v7878_v38  ;;  %v7886_v38 = vld [vmem:[#allocation5 + $0x494] sm:$0xf] }
 0x28f   :  { %2185 = vmatpush.bf16.msrb.mxu1 %v6147_v43  ;;  %v7901_v43 = vld [vmem:[#allocation5 + $0x504] sm:$0xf0] }
 0x290   :  { %v6319_v47 = vor.u32 %v7901_v43, %v6318_v41  ;;  %2283 = vmatpush.bf16.msrb.mxu2 %v7877_v45  ;;  %v7884_v43 = vld [vmem:[#allocation5 + $0x484] sm:$0xf] }
 0x293   :  { %v2165_v25 = vpop.f32.mrf.mxu3  ;;  %2186 = vmatpush.bf16.msrb.mxu1 %v6139_v49  ;;  %v7914_v49 = vld [vmem:[#allocation5 + $0x574] sm:$0xf] }
 0x294   :  { %v6343_v25 = vor.u32 %v7907_v21, %v6342_v18  ;;  %v6328_v18 = vld [vmem:[#allocation5 + $0x518] sm:$0xf0] }
 0x297   :  { %2187 = vmatpush.bf16.msrb.mxu1 %v6131_v48  ;;  %v7898_v48 = vld [vmem:[#allocation5 + $0x4f4] sm:$0xf] }
 0x2f7   :  { %v1698_v50 = vpop.f32.mrf.mxu2 }
 0x2f8   :  { %v1699_v53 = vadd.f32 %v1698_v50, %v8534_v5  ;;  %v7875_v5 = vld [vmem:[#allocation2 + $0x338] sm:$0xff] }
 0x2f9   :  { %2338 = vmatpush.bf16.msrb.mxu3 %v7875_v5  ;;  %v6312_v50 = vld [vmem:[#allocation5 + $0x4f8] sm:$0xf0]  ;;  %v7908_v5 = vld [vmem:[#allocation5 + $0x544] sm:$0xf] }
 0x2fa   :  { %v8552_v54 = vadd.f32 %v1702_v51, %v1699_v53  ;;  %v7868_v51 = vld [vmem:[#allocation2 + $0x300] sm:$0xff]  ;;  %v6379_v53 = vor.u32 %v7914_v49, %v6376_v46  ;;  %v6315_v59 = vor.u32 %v7898_v48, %v6312_v50 }
 0x2fb   :  { %v1975_v49 = vld [vmem:[#allocation10 + $0x20] ss:$8 sm:$0x3] }
 0x2fc   :  { %v1704_v56 = vmax.f32 %v8552_v54, 0.0  ;;  %v1977_v46 = vperm.slane %v1975_v49, 0  ;;  %v6506_v54 = vld [vmem:[#allocation7 + $0x78] sm:$0xf] }
 0x2fd   :  { %2339 = vmatpush.bf16.msrb.mxu3 %v7874_v8  ;;  %v6347_v8 = vor.u32 %v7906_v14, %v6344_v7  ;;  %v7969_v14 = vld [vmem:[#allocation7 + $0x128] sm:$0xf0] }
 0x2fe   :  { %v1859_v58 = vadd.f32 %v1856_v55, %v1704_v56  ;;  %v7876_v55 = vld [vmem:[#allocation2 + $0x340] sm:$0xff] }
 0x2ff   :  { %v1700_v61 = vpop.f32.mrf.mxu2  ;;  %2284 = vmatpush.bf16.msrb.mxu2 %v7876_v55 }
 0x300   :  { %v1861_v62 = vadd.f32 %v1860_v57, %v1859_v58  ;;  %v7912_v57 = vld [vmem:[#allocation5 + $0x564] sm:$0xf]  ;;  %v6368_v58 = vld [vmem:[#allocation5 + $0x568] sm:$0xf0] }
 0x301   :  { %2340 = vmatpush.bf16.msrb.mxu3 %v7873_v13  ;;  %v6304_v61 = vld [vmem:[#allocation5 + $0x4e8] sm:$0xf0]  ;;  %v6296_v13 = vld [vmem:[#allocation5 + $0x4d8] sm:$0xf0] }
 0x302   :  { %v1878_v0 = vpack.c.bf16 %v1861_v62, %v1861_v62  ;;  %v6371_v62 = vor.u32 %v7912_v57, %v6368_v58  ;;  %v6307_v1 = vor.u32 %v7896_v60, %v6304_v61  ;;  %v6299_v16 = vor.u32 %v7894_v12, %v6296_v13  ;;  %v6626_v57 = vld [vmem:[#allocation7 + $0x168] sm:$0xf]  ;;  %v7978_v58 = vld [vmem:[#allocation7 + $0x170] sm:$0xf0] }
 0x303   :  { %2579 = vmatpush.bf16.msra.mxu2 %v6315_v59  ;;  %v6627_v60 = vor.u32 %v7978_v58, %v6626_v57  ;;  %v6578_v13 = vld [vmem:[#allocation7 + $0x108] sm:$0xf]  ;;  %v6622_v58 = vld [vmem:[#allocation7 + $0x158] sm:$0xf] }
 0x304   :  { %1936 = vmatmul.bf16.vlgmr.msra.gmra.mxu1 %v1878_v0  ;;  %v6360_v0 = vld [vmem:[#allocation5 + $0x558] sm:$0xf0] }
 0x305   :  { %2566 = vmatpush.bf16.msra.mxu1 %v6375_v63  ;;  %2341 = vmatpush.bf16.msrb.mxu3 %v7872_v22  ;;  %v7910_v63 = vld [vmem:[#allocation5 + $0x554] sm:$0xf]  ;;  %v7892_v22 = vld [vmem:[#allocation5 + $0x4c4] sm:$0xf] }
 0x306   :  { %v6363_v3 = vor.u32 %v7910_v63, %v6360_v0  ;;  %v7975_v63 = vld [vmem:[#allocation7 + $0x158] sm:$0xf0] }
 0x307   :  { %v8558_v9 = vpop.f32.mrf.mxu2  ;;  %2580 = vmatpush.bf16.msra.mxu2 %v6307_v1 }
 0x308   :  { %v2151_v48 = vadd.f32 %v8558_v9, %v1977_v46  ;;  %v6634_v46 = vld [vmem:[#allocation7 + $0x170] sm:$0xf] }
 0x309   :  { %2567 = vmatpush.bf16.msra.mxu1 %v6367_v4  ;;  %2342 = vmatpush.bf16.msrb.mxu3 %v7871_v29  ;;  %v6352_v4 = vld [vmem:[#allocation5 + $0x548] sm:$0xf0]  ;;  %v7890_v29 = vld [vmem:[#allocation5 + $0x4b4] sm:$0xf] }
 0x30a   :  { %v6355_v6 = vor.u32 %v7908_v5, %v6352_v4  ;;  %v6602_v5 = vld [vmem:[#allocation7 + $0x138] sm:$0xf]  ;;  %v7972_v4 = vld [vmem:[#allocation7 + $0x140] sm:$0xf0] }
 0x30b   :  { %2581 = vmatpush.bf16.msra.mxu2 %v6299_v16  ;;  %v6603_v9 = vor.u32 %v7972_v4, %v6602_v5  ;;  %v7966_v16 = vld [vmem:[#allocation7 + $0x110] sm:$0xf0]  ;;  %v7936_v5 = vld [vmem:[#allocation7 + $0x20] sm:$0xf0] }
 0x30d   :  { %2568 = vmatpush.bf16.msra.mxu1 %v6359_v10  ;;  %2343 = vmatpush.bf16.msrb.mxu3 %v7870_v37  ;;  %v6336_v10 = vld [vmem:[#allocation5 + $0x528] sm:$0xf0]  ;;  %v6275_v37 = vor.u32 %v7888_v33, %v6272_v35  ;;  %v7960_v33 = vld [vmem:[#allocation7 + $0xe0] sm:$0xf0] }
 0x30e   :  { %v6339_v11 = vor.u32 %v7904_v52, %v6336_v10  ;;  %v6530_v52 = vld [vmem:[#allocation7 + $0xa8] sm:$0xf]  ;;  %v7954_v10 = vld [vmem:[#allocation7 + $0xb0] sm:$0xf0] }
 0x30f   :  { %v2152_v23 = vpop.f32.mrf.mxu2 }
 0x310   :  { %v6288_v23 = vld [vmem:[#allocation5 + $0x4c8] sm:$0xf0] }
 0x311   :  { %2569 = vmatpush.bf16.msra.mxu1 %v6351_v17  ;;  %2344 = vmatpush.bf16.msrb.mxu3 %v7869_v44  ;;  %v7902_v17 = vld [vmem:[#allocation5 + $0x514] sm:$0xf]  ;;  %v6291_v24 = vor.u32 %v7892_v22, %v6288_v23  ;;  %v6256_v44 = vld [vmem:[#allocation5 + $0x488] sm:$0xf0]  ;;  %v7951_v22 = vld [vmem:[#allocation7 + $0x98] sm:$0xf0]  ;;  %v6579_v23 = vor.u32 %v7966_v16, %v6578_v13 }
 0x312   :  { %v6331_v21 = vor.u32 %v7902_v17, %v6328_v18  ;;  %v6259_v45 = vor.u32 %v7884_v43, %v6256_v44  ;;  %v6531_v17 = vor.u32 %v7954_v10, %v6530_v52  ;;  %v6542_v43 = vld [vmem:[#allocation7 + $0xc0] sm:$0xf]  ;;  %v7957_v44 = vld [vmem:[#allocation7 + $0xc8] sm:$0xf0]  ;;  %v7955_v52 = vld [vmem:[#allocation7 + $0xb8] sm:$0xf0] }
 0x313   :  { %2582 = vmatpush.bf16.msra.mxu2 %v6291_v24  ;;  %v7963_v24 = vld [vmem:[#allocation7 + $0xf8] sm:$0xf0] }
 0x314   :  { %2188 = vmatmul.bf16.vlgmr.msrb.gmra.mxu1 %v8489_v39  ;;  %v7967_v13 = vld [vmem:[#allocation7 + $0x118] sm:$0xf0] }
 0x315   :  { %2570 = vmatpush.bf16.msra.mxu1 %v6343_v25  ;;  %2345 = vmatpush.bf16.msrb.mxu3 %v7868_v51  ;;  %v7900_v25 = vld [vmem:[#allocation5 + $0x504] sm:$0xf] }
 0x316   :  { %v6323_v27 = vor.u32 %v7900_v25, %v6320_v26  ;;  %v8567_v25 = vld [vmem:[#allocation10 + $0x22] ss:$8 sm:$0x3] }
 0x319   :  { %2571 = vmatpush.bf16.msra.mxu1 %v6335_v32  ;;  %2592 = vmatpush.bf16.msra.mxu3 %v6379_v53  ;;  %v6283_v32 = vor.u32 %v7890_v29, %v6280_v30  ;;  %v2164_v53 = vadd.f32 %v8549_v15, %v2151_v48  ;;  %v6590_v15 = vld [vmem:[#allocation7 + $0x120] sm:$0xf]  ;;  %v2389_v30 = vperm.slane %v8567_v25, 0 }
 0x31b   :  { %2583 = vmatpush.bf16.msra.mxu2 %v6283_v32  ;;  %v6554_v32 = vld [vmem:[#allocation7 + $0xd8] sm:$0xf] }
 0x31d   :  { %2572 = vmatpush.bf16.msra.mxu1 %v6327_v40  ;;  %2593 = vmatpush.bf16.msra.mxu3 %v6371_v62  ;;  %v6264_v40 = vld [vmem:[#allocation5 + $0x498] sm:$0xf0]  ;;  %v6614_v62 = vld [vmem:[#allocation7 + $0x150] sm:$0xf] }
 0x31e   :  { %v6267_v41 = vor.u32 %v7886_v38, %v6264_v40  ;;  %v6615_v1 = vor.u32 %v7975_v63, %v6614_v62  ;;  %v7945_v38 = vld [vmem:[#allocation7 + $0x68] sm:$0xf0]  ;;  %v6555_v40 = vor.u32 %v7960_v33, %v6554_v32  ;;  %v7930_v33 = vld [vmem:[#allocation2 + $0x3f0] sm:$0xff] }
 0x31f   :  { %2584 = vmatpush.bf16.msra.mxu2 %v6275_v37  ;;  %v6494_v37 = vld [vmem:[#allocation7 + $0x60] sm:$0xf]  ;;  %v7961_v32 = vld [vmem:[#allocation7 + $0xe8] sm:$0xf0] }
 0x321   :  { %2573 = vmatpush.bf16.msra.mxu1 %v6319_v47  ;;  %2594 = vmatpush.bf16.msra.mxu3 %v6363_v3  ;;  %v1879_v47 = vld [vmem:[#allocation10 + $0x7] ss:$0 sm:$0xff]  ;;  %v1978_v3 = vperm.slane %v1975_v49, 1  ;;  %v6495_v49 = vor.u32 %v7945_v38, %v6494_v37  ;;  %v6502_v37 = vld [vmem:[#allocation7 + $0x68] sm:$0xf] }
 0x322   :  { %v7946_v38 = vld [vmem:[#allocation7 + $0x70] sm:$0xf0] }
 0x323   :  { %2585 = vmatpush.bf16.msra.mxu2 %v6267_v41  ;;  %v2563_v41 = vadd.f32 %v8541_v19, %v2389_v30  ;;  %v7939_v19 = vld [vmem:[#allocation7 + $0x38] sm:$0xf0]  ;;  %v6562_v30 = vld [vmem:[#allocation7 + $0xe0] sm:$0xf] }
 0x324   :  { %2574 = vmatmul.bf16.vlgmr.msra.gmra.mxu1 %v8489_v39 }
 0x325   :  { %2595 = vmatpush.bf16.msra.mxu3 %v6355_v6  ;;  %v2177_v6 = vadd.f32 %v8539_v20, %v1978_v3  ;;  %v6566_v20 = vld [vmem:[#allocation7 + $0xf0] sm:$0xf]  ;;  %v6458_v3 = vld [vmem:[#allocation7 + $0x18] sm:$0xf] }
 0x326   :  { %v6567_v29 = vor.u32 %v7963_v24, %v6566_v20  ;;  %v7923_v20 = vld [vmem:[#allocation2 + $0x3b8] sm:$0xff] }
 0x327   :  { %2586 = vmatpush.bf16.msra.mxu2 %v6259_v45  ;;  %2750 = vmatpush.bf16.msrb.mxu1 %v7923_v20  ;;  %v6532_v20 = vld [vmem:[#allocation7 + $0xb4] sm:$0xf0] }
 0x329   :  { %2596 = vmatpush.bf16.msra.mxu3 %v6347_v8 }
 0x32d   :  { %2597 = vmatpush.bf16.msra.mxu3 %v6339_v11  ;;  %v6591_v11 = vor.u32 %v7969_v14, %v6590_v15  ;;  %v7970_v15 = vld [vmem:[#allocation7 + $0x130] sm:$0xf0]  ;;  %v6446_v14 = vld [vmem:[#allocation7] sm:$0xf] }
 0x331   :  { %2598 = vmatpush.bf16.msra.mxu3 %v6331_v21  ;;  %v6518_v21 = vld [vmem:[#allocation7 + $0x90] sm:$0xf] }
 0x335   :  { %2599 = vmatpush.bf16.msra.mxu3 %v6323_v27  ;;  %v6519_v27 = vor.u32 %v7951_v22, %v6518_v21  ;;  %v6574_v22 = vld [vmem:[#allocation7 + $0xf8] sm:$0xf] }
 0x381   :  { %v1937_v50 = vpop.f32.mrf.mxu1 }
 0x382   :  { %v1938_v51 = vadd.f32 %v1937_v50, %v1879_v47  ;;  %v7979_v47 = vld [vmem:[#allocation7 + $0x178] sm:$0xf0]  ;;  %v6482_v50 = vld [vmem:[#allocation7 + $0x48] sm:$0xf] }
 0x384   :  { %v1941_v55 = vmax.f32 %v1938_v51, 0.0  ;;  %v7942_v51 = vld [vmem:[#allocation7 + $0x50] sm:$0xf0] }
 0x385   :  { %v6483_v57 = vor.u32 %v7942_v51, %v6482_v50 }
 0x386   :  { %v2193_v59 = vadd.f32 %v2164_v53, %v1941_v55  ;;  %v6543_v53 = vor.u32 %v7957_v44, %v6542_v43  ;;  %v6635_v55 = vor.u32 %v7979_v47, %v6634_v46  ;;  %v6550_v43 = vld [vmem:[#allocation7 + $0xc8] sm:$0xf]  ;;  %v7958_v44 = vld [vmem:[#allocation7 + $0xd0] sm:$0xf0]  ;;  %v7943_v46 = vld [vmem:[#allocation7 + $0x58] sm:$0xf0] }
 0x387   :  { %v7920_v47 = vld [vmem:[#allocation2 + $0x3a0] sm:$0xff]  ;;  %v6551_v50 = vor.u32 %v7958_v44, %v6550_v43  ;;  %v6752_v43 = vld [vmem:[#allocation5 + $0x6e8] sm:$0xf0] }
 0x388   :  { %v2211_v61 = vpack.c.bf16 %v2193_v59, %v2193_v59  ;;  %v7976_v59 = vld [vmem:[#allocation7 + $0x160] sm:$0xf0] }
 0x389   :  { %v1939_v0 = vpop.f32.mrf.mxu1 }
 0x38a   :  { %2346 = vmatmul.bf16.vlgmr.msrb.gmra.mxu3 %v2211_v61  ;;  %v6623_v61 = vor.u32 %v7976_v59, %v6622_v58  ;;  %v6610_v0 = vld [vmem:[#allocation7 + $0x140] sm:$0xf] }
 0x38b   :  { %3108 = vmatpush.bf16.msrb.mxu3 %v6627_v60  ;;  %v6470_v60 = vld [vmem:[#allocation7 + $0x30] sm:$0xf]  ;;  %v6466_v59 = vld [vmem:[#allocation7 + $0x20] sm:$0xf] }
 0x38c   :  { %v6471_v63 = vor.u32 %v7939_v19, %v6470_v60  ;;  %v7937_v60 = vld [vmem:[#allocation7 + $0x28] sm:$0xf0] }
 0x38d   :  { %v6467_v19 = vor.u32 %v7937_v60, %v6466_v59  ;;  %v7944_v59 = vld [vmem:[#allocation7 + $0x64] sm:$0xf]  ;;  %v6496_v60 = vld [vmem:[#allocation7 + $0x6c] sm:$0xf0] }
 0x38f   :  { %3109 = vmatpush.bf16.msrb.mxu3 %v6615_v1  ;;  %v7973_v1 = vld [vmem:[#allocation7 + $0x148] sm:$0xf0] }
 0x390   :  { %v6611_v4 = vor.u32 %v7973_v1, %v6610_v0  ;;  %v7918_v0 = vld [vmem:[#allocation2 + $0x390] sm:$0xff]  ;;  %v7929_v1 = vld [vmem:[#allocation2 + $0x3e8] sm:$0xff] }
 0x391   :  { %v2189_v7 = vpop.f32.mrf.mxu1 }
 0x392   :  { %v2190_v8 = vadd.f32 %v2189_v7, %v2177_v6  ;;  %v6598_v6 = vld [vmem:[#allocation7 + $0x128] sm:$0xf]  ;;  %v7933_v7 = vld [vmem:[#allocation7 + $0x8] sm:$0xf0] }
 0x393   :  { %3110 = vmatpush.bf16.msrb.mxu3 %v6603_v9  ;;  %v6459_v9 = vor.u32 %v7936_v5, %v6458_v3  ;;  %v6599_v10 = vor.u32 %v7970_v15, %v6598_v6  ;;  %v7917_v3 = vld [vmem:[#allocation2 + $0x388] sm:$0xff]  ;;  %v7928_v5 = vld [vmem:[#allocation2 + $0x3e0] sm:$0xff]  ;;  %v6628_v6 = vld [vmem:[#allocation7 + $0x174] sm:$0xf0] }
 0x394   :  { %v2194_v12 = vadd.f32 %v2190_v8, %v1704_v56  ;;  %v7948_v56 = vld [vmem:[#allocation7 + $0x80] sm:$0xf0]  ;;  %v6538_v8 = vld [vmem:[#allocation7 + $0xb0] sm:$0xf] }
 0x395   :  { %v6507_v35 = vor.u32 %v7948_v56, %v6506_v54  ;;  %v6539_v16 = vor.u32 %v7955_v52, %v6538_v8  ;;  %v7949_v54 = vld [vmem:[#allocation7 + $0x88] sm:$0xf0]  ;;  %v7922_v56 = vld [vmem:[#allocation2 + $0x3b0] sm:$0xff]  ;;  %v6616_v8 = vld [vmem:[#allocation7 + $0x15c] sm:$0xf0] }
 0x396   :  { %v2228_v18 = vpack.c.bf16 %v2194_v12, %v2194_v12  ;;  %v6586_v12 = vld [vmem:[#allocation7 + $0x110] sm:$0xf]  ;;  %2751 = vmatpush.bf16.msrb.mxu1 %v7922_v56 }
 0x397   :  { %3111 = vmatpush.bf16.msrb.mxu3 %v6591_v11  ;;  %v6447_v11 = vor.u32 %v7933_v7, %v6446_v14  ;;  %v6587_v21 = vor.u32 %v7967_v13, %v6586_v12  ;;  %v7927_v14 = vld [vmem:[#allocation2 + $0x3d8] sm:$0xff]  ;;  %v7974_v7 = vld [vmem:[#allocation7 + $0x154] sm:$0xf]  ;;  %v6604_v12 = vld [vmem:[#allocation7 + $0x144] sm:$0xf0] }
 0x398   :  { %2285 = vmatmul.bf16.vlgmr.msrb.gmra.mxu2 %v2228_v18  ;;  %v7952_v18 = vld [vmem:[#allocation7 + $0xa0] sm:$0xf0]  ;;  %v6619_v52 = vor.u32 %v7974_v7, %v6616_v8  ;;  %v7938_v8 = vld [vmem:[#allocation7 + $0x34] sm:$0xf] }
 0x399   :  { %3095 = vmatpush.bf16.msrb.mxu2 %v6531_v17  ;;  %v2191_v26 = vpop.f32.mrf.mxu1  ;;  %v6526_v17 = vld [vmem:[#allocation7 + $0x98] sm:$0xf] }
 0x39a   :  { %2600 = vmatmul.bf16.vlgmr.msra.gmra.mxu3 %v8489_v39  ;;  %v6527_v24 = vor.u32 %v7952_v18, %v6526_v17  ;;  %v7931_v26 = vld [vmem:[#allocation2 + $0x3f8] sm:$0xff]  ;;  %v7968_v17 = vld [vmem:[#allocation7 + $0x124] sm:$0xf]  ;;  %v6592_v18 = vld [vmem:[#allocation7 + $0x12c] sm:$0xf0] }
 0x39b   :  { %3112 = vmatpush.bf16.msrb.mxu3 %v6579_v23  ;;  %v7964_v23 = vld [vmem:[#allocation7 + $0x100] sm:$0xf0]  ;;  %2689 = vmatpush.bf16.msrb.mxu0 %v7931_v26  ;;  %v7965_v26 = vld [vmem:[#allocation7 + $0x10c] sm:$0xf] }
 0x39d   :  { %3096 = vmatpush.bf16.msrb.mxu2 %v6519_v27  ;;  %v6514_v27 = vld [vmem:[#allocation7 + $0x80] sm:$0xf] }
 0x39f   :  { %3113 = vmatpush.bf16.msrb.mxu3 %v6567_v29  ;;  %v6575_v29 = vor.u32 %v7964_v23, %v6574_v22  ;;  %2690 = vmatpush.bf16.msrb.mxu0 %v7930_v33  ;;  %v7924_v22 = vld [vmem:[#allocation2 + $0x3c0] sm:$0xff]  ;;  %v7953_v23 = vld [vmem:[#allocation7 + $0xac] sm:$0xf] }
 0x3a1   :  { %3097 = vmatpush.bf16.msrb.mxu2 %v6507_v35  ;;  %v2575_v45 = vpop.f32.mrf.mxu1  ;;  %v6515_v35 = vor.u32 %v7949_v54, %v6514_v27  ;;  %v6580_v27 = vld [vmem:[#allocation7 + $0x114] sm:$0xf0]  ;;  %v8026_v54 = vld [vmem:[#allocation5 + $0x6f4] sm:$0xf] }
 0x3a2   :  { %v8572_v48 = vadd.f32 %v2575_v45, %v2563_v41  ;;  %v6563_v41 = vor.u32 %v7961_v32, %v6562_v30  ;;  %v6503_v45 = vor.u32 %v7946_v38, %v6502_v37  ;;  %v6583_v56 = vor.u32 %v7965_v26, %v6580_v27  ;;  %v7950_v30 = vld [vmem:[#allocation7 + $0x94] sm:$0xf]  ;;  %v6520_v32 = vld [vmem:[#allocation7 + $0x9c] sm:$0xf0]  ;;  %v6712_v26 = vld [vmem:[#allocation5 + $0x698] sm:$0xf0] }
 0x3a3   :  { %3114 = vmatpush.bf16.msrb.mxu3 %v6555_v40  ;;  %v7921_v40 = vld [vmem:[#allocation2 + $0x3a8] sm:$0xff]  ;;  %2691 = vmatpush.bf16.msrb.mxu0 %v7929_v1  ;;  %v7962_v37 = vld [vmem:[#allocation7 + $0xf4] sm:$0xf]  ;;  %v6568_v38 = vld [vmem:[#allocation7 + $0xfc] sm:$0xf0] }
 0x3a4   :  { %2752 = vmatpush.bf16.msrb.mxu1 %v7921_v40  ;;  %v8024_v40 = vld [vmem:[#allocation5 + $0x6e4] sm:$0xf]  ;;  %v6736_v1 = vld [vmem:[#allocation5 + $0x6c8] sm:$0xf0] }
 0x3a5   :  { %3098 = vmatpush.bf16.msrb.mxu2 %v6495_v49  ;;  %v6490_v49 = vld [vmem:[#allocation7 + $0x50] sm:$0xf]  ;;  %v6755_v44 = vor.u32 %v8024_v40, %v6752_v43  ;;  %v7070_v43 = vld [vmem:[#allocation8 + $0x1e0] sm:$0xf] }
 0x3a6   :  { %v6491_v51 = vor.u32 %v7943_v46, %v6490_v49  ;;  %v6508_v49 = vld [vmem:[#allocation7 + $0x84] sm:$0xf0] }
 0x3a7   :  { %3115 = vmatpush.bf16.msrb.mxu3 %v6543_v53  ;;  %v6478_v53 = vld [vmem:[#allocation7 + $0x38] sm:$0xf]  ;;  %2692 = vmatpush.bf16.msrb.mxu0 %v7928_v5  ;;  %v7941_v5 = vld [vmem:[#allocation7 + $0x4c] sm:$0xf] }
 0x3a8   :  { %2587 = vmatmul.bf16.vlgmr.msra.gmra.mxu2 %v8487_v34  ;;  %2753 = vmatpush.bf16.msrb.mxu1 %v7920_v47 }
 0x3a9   :  { %3099 = vmatpush.bf16.msrb.mxu2 %v6483_v57  ;;  %v2577_v62 = vpop.f32.mrf.mxu1  ;;  %v7919_v57 = vld [vmem:[#allocation2 + $0x398] sm:$0xff] }
 0x3aa   :  { %3116 = vmatmul.bf16.vlgmr.msrb.gmra.mxu3 %v8489_v39  ;;  %v7934_v62 = vld [vmem:[#allocation7 + $0x10] sm:$0xf0] }
 0x3ab   :  { %3160 = vmatpush.bf16.msra.mxu3 %v6635_v55  ;;  %v7940_v55 = vld [vmem:[#allocation7 + $0x40] sm:$0xf0]  ;;  %2693 = vmatpush.bf16.msrb.mxu0 %v7927_v14  ;;  %v6728_v14 = vld [vmem:[#allocation5 + $0x6b8] sm:$0xf0] }
 0x3ac   :  { %v6479_v58 = vor.u32 %v7940_v55, %v6478_v53  ;;  %2754 = vmatpush.bf16.msrb.mxu1 %v7919_v57  ;;  %v8022_v53 = vld [vmem:[#allocation5 + $0x6d4] sm:$0xf]  ;;  %v6744_v57 = vld [vmem:[#allocation5 + $0x6d8] sm:$0xf0] }
 0x3ad   :  { %3100 = vmatpush.bf16.msrb.mxu2 %v6471_v63 }
 0x3af   :  { %3161 = vmatpush.bf16.msra.mxu3 %v6623_v61  ;;  %v6454_v61 = vld [vmem:[#allocation7 + $0x8] sm:$0xf] }
 0x3b0   :  { %v6455_v63 = vor.u32 %v7934_v62, %v6454_v61  ;;  %2755 = vmatpush.bf16.msrb.mxu1 %v7918_v0  ;;  %v7956_v61 = vld [vmem:[#allocation7 + $0xc4] sm:$0xf]  ;;  %v6544_v62 = vld [vmem:[#allocation7 + $0xcc] sm:$0xf0] }
 0x3b1   :  { %3101 = vmatpush.bf16.msrb.mxu2 %v6459_v9  ;;  %v7977_v9 = vld [vmem:[#allocation7 + $0x16c] sm:$0xf]  ;;  %v6547_v0 = vor.u32 %v7956_v61, %v6544_v62  ;;  %v7038_v61 = vld [vmem:[#allocation8 + $0x1a0] sm:$0xf]  ;;  %v8082_v62 = vld [vmem:[#allocation8 + $0x1ac] sm:$0xf0] }
 0x3b2   :  { %v6631_v15 = vor.u32 %v7977_v9, %v6628_v6 }
 0x3b3   :  { %3162 = vmatpush.bf16.msra.mxu3 %v6611_v4  ;;  %v7916_v4 = vld [vmem:[#allocation2 + $0x380] sm:$0xff] }
 0x3b4   :  { %2756 = vmatpush.bf16.msrb.mxu1 %v7917_v3 }
 0x3b5   :  { %3102 = vmatpush.bf16.msrb.mxu2 %v6447_v11  ;;  %v7971_v11 = vld [vmem:[#allocation7 + $0x13c] sm:$0xf] }
 0x3b6   :  { %v6607_v13 = vor.u32 %v7971_v11, %v6604_v12  ;;  %v8016_v11 = vld [vmem:[#allocation5 + $0x6a4] sm:$0xf]  ;;  %v6720_v12 = vld [vmem:[#allocation5 + $0x6a8] sm:$0xf0] }
 0x3b7   :  { %3163 = vmatpush.bf16.msra.mxu3 %v6599_v10  ;;  %v7926_v10 = vld [vmem:[#allocation2 + $0x3d0] sm:$0xff] }
 0x3b8   :  { %3103 = vmatmul.bf16.vlgmr.msrb.gmra.mxu2 %v8487_v34  ;;  %2757 = vmatpush.bf16.msrb.mxu1 %v7916_v4  ;;  %v6484_v4 = vld [vmem:[#allocation7 + $0x54] sm:$0xf0] }
 0x3b9   :  { %3147 = vmatpush.bf16.msra.mxu2 %v6539_v16  ;;  %2694 = vmatpush.bf16.msrb.mxu0 %v7926_v10  ;;  %v7925_v16 = vld [vmem:[#allocation2 + $0x3c8] sm:$0xff]  ;;  %v6487_v9 = vor.u32 %v7941_v5, %v6484_v4  ;;  %v8078_v5 = vld [vmem:[#allocation8 + $0x18c] sm:$0xf0] }
 0x3bb   :  { %3164 = vmatpush.bf16.msra.mxu3 %v6587_v21  ;;  %v6595_v21 = vor.u32 %v7968_v17, %v6592_v18  ;;  %v2351_v17 = vld [vmem:[#allocation10 + $0x21] ss:$0 sm:$0xff]  ;;  %v7935_v18 = vld [vmem:[#allocation7 + $0x1c] sm:$0xf] }
 0x3bc   :  { %3134 = vmatpush.bf16.msra.mxu1 %v6631_v15  ;;  %v8018_v15 = vld [vmem:[#allocation5 + $0x6b4] sm:$0xf] }
 0x3bd   :  { %3148 = vmatpush.bf16.msra.mxu2 %v6527_v24  ;;  %2695 = vmatpush.bf16.msrb.mxu0 %v7925_v16  ;;  %v6535_v24 = vor.u32 %v7953_v23, %v6532_v20  ;;  %v6731_v7 = vor.u32 %v8018_v15, %v6728_v14 }
 0x3bf   :  { %3165 = vmatpush.bf16.msra.mxu3 %v6575_v29  ;;  %v6760_v29 = vld [vmem:[#allocation5 + $0x6f8] sm:$0xf0] }
 0x3c0   :  { %3135 = vmatpush.bf16.msra.mxu1 %v6619_v52  ;;  %v6763_v33 = vor.u32 %v8026_v54, %v6760_v29  ;;  %v6472_v52 = vld [vmem:[#allocation7 + $0x3c] sm:$0xf0]  ;;  %v6448_v29 = vld [vmem:[#allocation7 + $0xc] sm:$0xf0] }
 0x3c1   :  { %3149 = vmatpush.bf16.msra.mxu2 %v6515_v35  ;;  %2696 = vmatpush.bf16.msrb.mxu0 %v7924_v22  ;;  %v6523_v35 = vor.u32 %v7950_v30, %v6520_v32  ;;  %v6475_v10 = vor.u32 %v7938_v8, %v6472_v52  ;;  %v6726_v52 = vld [vmem:[#allocation5 + $0x6b0] sm:$0xf] }
 0x3c3   :  { %3166 = vmatpush.bf16.msra.mxu3 %v6563_v41  ;;  %v6571_v41 = vor.u32 %v7962_v37, %v6568_v38  ;;  %v8012_v37 = vld [vmem:[#allocation5 + $0x684] sm:$0xf]  ;;  %v6704_v38 = vld [vmem:[#allocation5 + $0x688] sm:$0xf0] }
 0x3c4   :  { %3136 = vmatpush.bf16.msra.mxu1 %v6607_v13  ;;  %v6723_v13 = vor.u32 %v8016_v11, %v6720_v12  ;;  %v7006_v12 = vld [vmem:[#allocation8 + $0x160] sm:$0xf] }
 0x3c5   :  { %3150 = vmatpush.bf16.msra.mxu2 %v6503_v45  ;;  %3121 = vmatpush.bf16.msra.mxu0 %v6535_v24  ;;  %v7947_v45 = vld [vmem:[#allocation7 + $0x7c] sm:$0xf]  ;;  %v8014_v24 = vld [vmem:[#allocation5 + $0x694] sm:$0xf] }
 0x3c6   :  { %v6511_v46 = vor.u32 %v7947_v45, %v6508_v49  ;;  %v6715_v54 = vor.u32 %v8014_v24, %v6712_v26  ;;  %v8070_v24 = vld [vmem:[#allocation8 + $0x14c] sm:$0xf0] }
 0x3c7   :  { %3167 = vmatpush.bf16.msra.mxu3 %v6551_v50  ;;  %v7959_v50 = vld [vmem:[#allocation7 + $0xdc] sm:$0xf] }
 0x3c8   :  { %3137 = vmatpush.bf16.msra.mxu1 %v6595_v21  ;;  %v6460_v21 = vld [vmem:[#allocation7 + $0x24] sm:$0xf0] }
 0x3c9   :  { %3151 = vmatpush.bf16.msra.mxu2 %v6491_v51  ;;  %3122 = vmatpush.bf16.msra.mxu0 %v6523_v35  ;;  %v6556_v51 = vld [vmem:[#allocation7 + $0xe4] sm:$0xf0]  ;;  %v6463_v23 = vor.u32 %v7935_v18, %v6460_v21  ;;  %v8027_v35 = vld [vmem:[#allocation5 + $0x6f4] sm:$0xf0]  ;;  %v6718_v21 = vld [vmem:[#allocation5 + $0x6a0] sm:$0xf] }
 0x3ca   :  { %3168 = vmatmul.bf16.vlgmr.msra.gmra.mxu3 %v8489_v39  ;;  %v6559_v55 = vor.u32 %v7959_v50, %v6556_v51  ;;  %v8025_v51 = vld [vmem:[#allocation5 + $0x6e4] sm:$0xf0] }
 0x3cb   :  { %3426 = vmatpush.bf16.msrb.mxu3 %v6763_v33  ;;  %v6758_v33 = vld [vmem:[#allocation5 + $0x6f0] sm:$0xf] }
 0x3cc   :  { %3138 = vmatpush.bf16.msra.mxu1 %v6583_v56  ;;  %v7932_v56 = vld [vmem:[#allocation7 + $0x4] sm:$0xf]  ;;  %v6759_v49 = vor.u32 %v8027_v35, %v6758_v33 }
 0x3cd   :  { %3152 = vmatpush.bf16.msra.mxu2 %v6479_v58  ;;  %3123 = vmatpush.bf16.msra.mxu0 %v6511_v46  ;;  %v6747_v58 = vor.u32 %v8022_v53, %v6744_v57  ;;  %v6451_v30 = vor.u32 %v7932_v56, %v6448_v29  ;;  %v7054_v53 = vld [vmem:[#allocation8 + $0x1c0] sm:$0xf]  ;;  %v6710_v56 = vld [vmem:[#allocation5 + $0x690] sm:$0xf]  ;;  %v8015_v29 = vld [vmem:[#allocation5 + $0x694] sm:$0xf0] }
 0x3ce   :  { %v6711_v35 = vor.u32 %v8015_v29, %v6710_v56  ;;  %v8007_v56 = vld [vmem:[#allocation5 + $0x654] sm:$0xf0]  ;;  %v8006_v29 = vld [vmem:[#allocation5 + $0x654] sm:$0xf] }
 0x3cf   :  { %3427 = vmatpush.bf16.msrb.mxu3 %v6755_v44  ;;  %v8090_v44 = vld [vmem:[#allocation8 + $0x1ec] sm:$0xf0] }
 0x3d0   :  { %3139 = vmatpush.bf16.msra.mxu1 %v6571_v41  ;;  %v6707_v41 = vor.u32 %v8012_v37, %v6704_v38  ;;  %v7071_v46 = vor.u32 %v8090_v44, %v7070_v43  ;;  %v6958_v44 = vld [vmem:[#allocation8 + $0x100] sm:$0xf] }
 0x3d1   :  { %3153 = vmatpush.bf16.msra.mxu2 %v6467_v19  ;;  %v6499_v19 = vor.u32 %v7944_v59, %v6496_v60  ;;  %v6742_v60 = vld [vmem:[#allocation5 + $0x6d0] sm:$0xf] }
 0x3d3   :  { %3428 = vmatpush.bf16.msrb.mxu3 %v6747_v58  ;;  %3124 = vmatpush.bf16.msra.mxu0 %v6499_v19  ;;  %v8023_v19 = vld [vmem:[#allocation5 + $0x6d4] sm:$0xf0] }
 0x3d4   :  { %3140 = vmatpush.bf16.msra.mxu1 %v6559_v55  ;;  %v8086_v55 = vld [vmem:[#allocation8 + $0x1cc] sm:$0xf0] }
 0x3d5   :  { %3154 = vmatpush.bf16.msra.mxu2 %v6455_v63  ;;  %v8020_v63 = vld [vmem:[#allocation5 + $0x6c4] sm:$0xf]  ;;  %v7055_v58 = vor.u32 %v8086_v55, %v7054_v53 }
 0x3d6   :  { %v6739_v3 = vor.u32 %v8020_v63, %v6736_v1  ;;  %v7039_v1 = vor.u32 %v8082_v62, %v7038_v61  ;;  %v7062_v62 = vld [vmem:[#allocation8 + $0x1c8] sm:$0xf] }
 0x3d7   :  { %3125 = vmatpush.bf16.msra.mxu0 %v6487_v9  ;;  %v6734_v9 = vld [vmem:[#allocation5 + $0x6c0] sm:$0xf] }
 0x3d8   :  { %3155 = vmatmul.bf16.vlgmr.msra.gmra.mxu2 %v8487_v34  ;;  %3141 = vmatpush.bf16.msra.mxu1 %v6547_v0  ;;  %v6743_v0 = vor.u32 %v8023_v19, %v6742_v60 }
 0x3d9   :  { %3429 = vmatpush.bf16.msrb.mxu3 %v6739_v3  ;;  %v7022_v3 = vld [vmem:[#allocation8 + $0x180] sm:$0xf] }
 0x3db   :  { %3126 = vmatpush.bf16.msra.mxu0 %v6475_v10  ;;  %v8019_v10 = vld [vmem:[#allocation5 + $0x6b4] sm:$0xf0] }
 0x3dd   :  { %3430 = vmatpush.bf16.msrb.mxu3 %v6731_v7  ;;  %v7023_v7 = vor.u32 %v8078_v5, %v7022_v3  ;;  %v6824_v3 = vld [vmem:[#allocation5 + $0x5f8] sm:$0xf0]  ;;  %v7992_v5 = vld [vmem:[#allocation5 + $0x5e4] sm:$0xf] }
 0x3df   :  { %3127 = vmatpush.bf16.msra.mxu0 %v6463_v23 }
 0x3e1   :  { %3431 = vmatpush.bf16.msrb.mxu3 %v6723_v13  ;;  %v8074_v13 = vld [vmem:[#allocation8 + $0x16c] sm:$0xf0] }
 0x3e2   :  { %v7007_v18 = vor.u32 %v8074_v13, %v7006_v12 }
 0x3e3   :  { %3128 = vmatpush.bf16.msra.mxu0 %v6451_v30  ;;  %v6974_v30 = vld [vmem:[#allocation8 + $0x120] sm:$0xf] }
 0x3e5   :  { %3432 = vmatpush.bf16.msrb.mxu3 %v6715_v54 }
 0x3e9   :  { %3433 = vmatpush.bf16.msrb.mxu3 %v6707_v41  ;;  %v8013_v41 = vld [vmem:[#allocation5 + $0x684] sm:$0xf0] }
 0x3ed   :  { %3964 = vmatpush.bf16.msra.mxu3 %v7071_v46 }
 0x3f1   :  { %3965 = vmatpush.bf16.msra.mxu3 %v7055_v58 }
 0x3f5   :  { %3966 = vmatpush.bf16.msra.mxu3 %v7039_v1  ;;  %v7994_v1 = vld [vmem:[#allocation5 + $0x5f4] sm:$0xf] }
 0x3f9   :  { %3967 = vmatpush.bf16.msra.mxu3 %v7023_v7  ;;  %v6694_v7 = vld [vmem:[#allocation5 + $0x670] sm:$0xf] }
 0x3fd   :  { %3968 = vmatpush.bf16.msra.mxu3 %v7007_v18  ;;  %v8009_v18 = vld [vmem:[#allocation5 + $0x664] sm:$0xf0] }
 0x40d   :  { %v2347_v47 = vpop.f32.mrf.mxu3 }
 0x415   :  { %v2349_v6 = vpop.f32.mrf.mxu3 }
 0x416   :  { %v8021_v6 = vld [vmem:[#allocation5 + $0x6c4] sm:$0xf0] }
 0x41b   :  { %v2286_v16 = vpop.f32.mrf.mxu2 }
 0x41c   :  { %v2348_v22 = vadd.f32 %v2347_v47, %v2286_v16  ;;  %v6750_v47 = vld [vmem:[#allocation5 + $0x6e0] sm:$0xf] }
 0x41d   :  { %v2601_v20 = vpop.f32.mrf.mxu3  ;;  %v6751_v59 = vor.u32 %v8025_v51, %v6750_v47 }
 0x41e   :  { %v2352_v27 = vadd.f32 %v2351_v17, %v2348_v22  ;;  %v6727_v17 = vor.u32 %v8019_v10, %v6726_v52  ;;  %v8017_v22 = vld [vmem:[#allocation5 + $0x6a4] sm:$0xf0]  ;;  %v6696_v52 = vld [vmem:[#allocation5 + $0x678] sm:$0xf0]  ;;  %v7990_v10 = vld [vmem:[#allocation5 + $0x5d4] sm:$0xf] }
 0x41f   :  { %v6719_v26 = vor.u32 %v8017_v22, %v6718_v21  ;;  %v8008_v21 = vld [vmem:[#allocation5 + $0x664] sm:$0xf]  ;;  %v6688_v22 = vld [vmem:[#allocation5 + $0x668] sm:$0xf0] }
 0x420   :  { %v2353_v32 = vmax.f32 %v2352_v27, 0.0 }
 0x422   :  { %v2605_v40 = vadd.f32 %v8572_v48, %v2353_v32  ;;  %v2390_v48 = vperm.slane %v8567_v25, 1  ;;  %v6735_v25 = vor.u32 %v8021_v6, %v6734_v9  ;;  %v8066_v32 = vld [vmem:[#allocation8 + $0x12c] sm:$0xf0]  ;;  %v6827_v9 = vor.u32 %v7994_v1, %v6824_v3  ;;  %v6816_v6 = vld [vmem:[#allocation5 + $0x5e8] sm:$0xf0] }
 0x423   :  { %v2288_v45 = vpop.f32.mrf.mxu2  ;;  %v6975_v37 = vor.u32 %v8066_v32, %v6974_v30  ;;  %v6680_v30 = vld [vmem:[#allocation5 + $0x658] sm:$0xf0]  ;;  %v7988_v32 = vld [vmem:[#allocation5 + $0x5c4] sm:$0xf]  ;;  %v6982_v3 = vld [vmem:[#allocation8 + $0x128] sm:$0xf] }
 0x424   :  { %v2623_v50 = vpack.c.bf16 %v2605_v40, %v2605_v40  ;;  %v6702_v40 = vld [vmem:[#allocation5 + $0x680] sm:$0xf]  ;;  %v8062_v45 = vld [vmem:[#allocation8 + $0x10c] sm:$0xf0] }
 0x425   :  { %v2603_v57 = vpop.f32.mrf.mxu3  ;;  %v6959_v46 = vor.u32 %v8062_v45, %v6958_v44  ;;  %v6670_v44 = vld [vmem:[#allocation5 + $0x640] sm:$0xf] }
 0x426   :  { %2758 = vmatmul.bf16.vlgmr.msrb.gmra.mxu1 %v2623_v50 }
 0x427   :  { %3400 = vmatpush.bf16.msrb.mxu1 %v6759_v49  ;;  %v6703_v49 = vor.u32 %v8013_v41, %v6702_v40  ;;  %v6683_v41 = vor.u32 %v8006_v29, %v6680_v30  ;;  %v7999_v29 = vld [vmem:[#allocation5 + $0x614] sm:$0xf0]  ;;  %v8080_v30 = vld [vmem:[#allocation8 + $0x1a4] sm:$0xf] }
 0x42b   :  { %v2588_v63 = vpop.f32.mrf.mxu2  ;;  %3401 = vmatpush.bf16.msrb.mxu1 %v6751_v59  ;;  %v7078_v59 = vld [vmem:[#allocation8 + $0x1e8] sm:$0xf] }
 0x42c   :  { %v2589_v4 = vadd.f32 %v2588_v63, %v2390_v48  ;;  %v8091_v48 = vld [vmem:[#allocation8 + $0x1f4] sm:$0xf0] }
 0x42d   :  { %v3117_v15 = vpop.f32.mrf.mxu3  ;;  %v7079_v19 = vor.u32 %v8091_v48, %v7078_v59  ;;  %v8087_v63 = vld [vmem:[#allocation8 + $0x1d4] sm:$0xf0]  ;;  %v6662_v48 = vld [vmem:[#allocation5 + $0x630] sm:$0xf] }
 0x42e   :  { %v2602_v14 = vadd.f32 %v2601_v20, %v2589_v4  ;;  %v8582_v20 = vld [vmem:[#allocation10 + $0x24] ss:$8 sm:$0x7]  ;;  %v7063_v4 = vor.u32 %v8087_v63, %v7062_v62  ;;  %v6664_v62 = vld [vmem:[#allocation5 + $0x638] sm:$0xf0] }
 0x42f   :  { %3402 = vmatpush.bf16.msrb.mxu1 %v6743_v0  ;;  %v2833_v54 = vperm.slane %v8582_v20, 0  ;;  %v2835_v53 = vperm.slane %v8582_v20, 2  ;;  %v7984_v63 = vld [vmem:[#allocation5 + $0x5a4] sm:$0xf] }
 0x430   :  { %v2606_v8 = vadd.f32 %v2602_v14, %v8544_v2  ;;  %v6990_v2 = vld [vmem:[#allocation8 + $0x140] sm:$0xf]  ;;  %v8083_v14 = vld [vmem:[#allocation8 + $0x1b4] sm:$0xf0] }
 0x431   :  { %v6991_v27 = vor.u32 %v8070_v24, %v6990_v2  ;;  %v8079_v2 = vld [vmem:[#allocation8 + $0x194] sm:$0xf0] }
 0x432   :  { %v2640_v11 = vpack.c.bf16 %v2606_v8, %v2606_v8  ;;  %v8010_v8 = vld [vmem:[#allocation5 + $0x674] sm:$0xf] }
 0x433   :  { %v2590_v16 = vpop.f32.mrf.mxu2  ;;  %3403 = vmatpush.bf16.msrb.mxu1 %v6735_v25  ;;  %3969 = vmatpush.bf16.msra.mxu3 %v6991_v27  ;;  %v6819_v25 = vor.u32 %v7992_v5, %v6816_v6  ;;  %v6699_v13 = vor.u32 %v8010_v8, %v6696_v52  ;;  %v6678_v27 = vld [vmem:[#allocation5 + $0x650] sm:$0xf]  ;;  %v8067_v5 = vld [vmem:[#allocation8 + $0x134] sm:$0xf0]  ;;  %v7980_v52 = vld [vmem:[#allocation5 + $0x584] sm:$0xf] }
 0x434   :  { %2697 = vmatmul.bf16.vlgmr.msrb.gmra.mxu0 %v2640_v11  ;;  %v6808_v11 = vld [vmem:[#allocation5 + $0x5d8] sm:$0xf0]  ;;  %v6686_v16 = vld [vmem:[#allocation5 + $0x660] sm:$0xf]  ;;  %v6679_v40 = vor.u32 %v8007_v56, %v6678_v27  ;;  %v6646_v56 = vld [vmem:[#allocation5 + $0x610] sm:$0xf] }
 0x435   :  { %v3119_v23 = vpop.f32.mrf.mxu3  ;;  %3413 = vmatpush.bf16.msrb.mxu2 %v6699_v13  ;;  %v6687_v24 = vor.u32 %v8009_v18, %v6686_v16  ;;  %v7072_v13 = vld [vmem:[#allocation8 + $0x1f0] sm:$0xf0]  ;;  %v6654_v18 = vld [vmem:[#allocation5 + $0x620] sm:$0xf] }
 0x436   :  { %3142 = vmatmul.bf16.vlgmr.msra.gmra.mxu1 %v8489_v39  ;;  %v7030_v23 = vld [vmem:[#allocation8 + $0x188] sm:$0xf] }
 0x437   :  { %3404 = vmatpush.bf16.msrb.mxu1 %v6727_v17  ;;  %3970 = vmatpush.bf16.msra.mxu3 %v6975_v37  ;;  %v7014_v37 = vld [vmem:[#allocation8 + $0x168] sm:$0xf] }
 0x43b   :  { %v3104_v33 = vpop.f32.mrf.mxu2  ;;  %3405 = vmatpush.bf16.msrb.mxu1 %v6719_v26  ;;  %3971 = vmatpush.bf16.msra.mxu3 %v6959_v46  ;;  %v6691_v26 = vor.u32 %v8008_v21, %v6688_v22  ;;  %v8004_v46 = vld [vmem:[#allocation5 + $0x644] sm:$0xf]  ;;  %v8001_v21 = vld [vmem:[#allocation5 + $0x624] sm:$0xf0] }
 0x43c   :  { %v3105_v38 = vadd.f32 %v3104_v33, %v2833_v54  ;;  %v6811_v54 = vor.u32 %v7990_v10, %v6808_v11  ;;  %v6800_v33 = vld [vmem:[#allocation5 + $0x5c8] sm:$0xf0]  ;;  %v8084_v22 = vld [vmem:[#allocation8 + $0x1c4] sm:$0xf] }
 0x43d   :  { %3414 = vmatpush.bf16.msrb.mxu2 %v6691_v26  ;;  %v6803_v45 = vor.u32 %v7988_v32, %v6800_v33  ;;  %v6768_v10 = vld [vmem:[#allocation5 + $0x588] sm:$0xf0]  ;;  %v6647_v32 = vor.u32 %v7999_v29, %v6646_v56  ;;  %v7040_v33 = vld [vmem:[#allocation8 + $0x1b0] sm:$0xf0]  ;;  %v6878_v56 = vld [vmem:[#allocation8 + $0x60] sm:$0xf] }
 0x43e   :  { %v8586_v43 = vadd.f32 %v3117_v15, %v3105_v38  ;;  %v7046_v15 = vld [vmem:[#allocation8 + $0x1a8] sm:$0xf]  ;;  %v8075_v38 = vld [vmem:[#allocation8 + $0x174] sm:$0xf0]  ;;  %v6771_v16 = vor.u32 %v7980_v52, %v6768_v10  ;;  %v6656_v26 = vld [vmem:[#allocation5 + $0x628] sm:$0xf0] }
 0x43f   :  { %3406 = vmatpush.bf16.msrb.mxu1 %v6711_v35  ;;  %v7047_v17 = vor.u32 %v8083_v14, %v7046_v15  ;;  %v7031_v35 = vor.u32 %v8079_v2, %v7030_v23  ;;  %v7982_v15 = vld [vmem:[#allocation5 + $0x594] sm:$0xf]  ;;  %v6776_v14 = vld [vmem:[#allocation5 + $0x598] sm:$0xf0]  ;;  %v6655_v23 = vor.u32 %v8001_v21, %v6654_v18  ;;  %v8064_v10 = vld [vmem:[#allocation8 + $0x124] sm:$0xf] }
 0x440   :  { %v6779_v8 = vor.u32 %v7982_v15, %v6776_v14  ;;  %v7056_v2 = vld [vmem:[#allocation8 + $0x1d0] sm:$0xf0]  ;;  %v6806_v14 = vld [vmem:[#allocation5 + $0x5d0] sm:$0xf]  ;;  %v6894_v18 = vld [vmem:[#allocation8 + $0x80] sm:$0xf] }
 0x441   :  { %3415 = vmatpush.bf16.msrb.mxu2 %v6683_v41  ;;  %v7059_v27 = vor.u32 %v8084_v22, %v7056_v2  ;;  %v6638_v41 = vld [vmem:[#allocation5 + $0x600] sm:$0xf]  ;;  %v8046_v21 = vld [vmem:[#allocation8 + $0x8c] sm:$0xf0]  ;;  %v6960_v2 = vld [vmem:[#allocation8 + $0x110] sm:$0xf0] }
 0x442   :  { %v6895_v22 = vor.u32 %v8046_v21, %v6894_v18  ;;  %v8042_v29 = vld [vmem:[#allocation8 + $0x6c] sm:$0xf0]  ;;  %v6944_v18 = vld [vmem:[#allocation8 + $0xf0] sm:$0xf0]  ;;  %v6950_v21 = vld [vmem:[#allocation8 + $0xe8] sm:$0xf] }
 0x443   :  { %v3106_v47 = vpop.f32.mrf.mxu2  ;;  %3407 = vmatpush.bf16.msrb.mxu1 %v6703_v49  ;;  %v8005_v49 = vld [vmem:[#allocation5 + $0x644] sm:$0xf0] }
 0x444   :  { %3129 = vmatmul.bf16.vlgmr.msra.gmra.mxu0 %v8487_v34  ;;  %v6672_v47 = vld [vmem:[#allocation5 + $0x648] sm:$0xf0] }
 0x445   :  { %v6675_v59 = vor.u32 %v8004_v46, %v6672_v47  ;;  %v7024_v46 = vld [vmem:[#allocation8 + $0x190] sm:$0xf0]  ;;  %v7996_v47 = vld [vmem:[#allocation5 + $0x604] sm:$0xf] }
 0x447   :  { %3532 = vmatpush.bf16.msra.mxu1 %v6827_v9  ;;  %3416 = vmatpush.bf16.msrb.mxu2 %v6675_v59 }
 0x44b   :  { %3533 = vmatpush.bf16.msra.mxu1 %v6819_v25  ;;  %v6966_v25 = vld [vmem:[#allocation8 + $0x108] sm:$0xf] }
 0x44d   :  { %v3169_v50 = vpop.f32.mrf.mxu3 }
 0x44f   :  { %3534 = vmatpush.bf16.msra.mxu1 %v6811_v54 }
 0x453   :  { %3535 = vmatpush.bf16.msra.mxu1 %v6803_v45  ;;  %v8076_v45 = vld [vmem:[#allocation8 + $0x184] sm:$0xf] }
 0x455   :  { %v3171_v51 = vpop.f32.mrf.mxu3 }
 0x456   :  { %v6792_v51 = vld [vmem:[#allocation5 + $0x5b8] sm:$0xf0] }
 0x45b   :  { %v3156_v55 = vpop.f32.mrf.mxu2 }
 0x45c   :  { %v3157_v57 = vadd.f32 %v3156_v55, %v2835_v53  ;;  %v7015_v53 = vor.u32 %v8075_v38, %v7014_v37  ;;  %v6998_v55 = vld [vmem:[#allocation8 + $0x148] sm:$0xf]  ;;  %v6648_v37 = vld [vmem:[#allocation5 + $0x618] sm:$0xf0]  ;;  %v7043_v38 = vor.u32 %v8080_v30, %v7040_v33  ;;  %v6879_v30 = vor.u32 %v8042_v29, %v6878_v56  ;;  %v6928_v29 = vld [vmem:[#allocation8 + $0xd0] sm:$0xf0] }
 0x45d   :  { %v7985_v33 = vld [vmem:[#allocation5 + $0x5a4] sm:$0xf0] }
 0x45e   :  { %v3170_v58 = vadd.f32 %v3169_v50, %v3157_v57  ;;  %v7986_v50 = vld [vmem:[#allocation5 + $0x5b4] sm:$0xf]  ;;  %v8071_v57 = vld [vmem:[#allocation8 + $0x154] sm:$0xf0] }
 0x45f   :  { %v6999_v1 = vor.u32 %v8071_v57, %v6998_v55  ;;  %v6822_v55 = vld [vmem:[#allocation5 + $0x5f0] sm:$0xf]  ;;  %v7995_v57 = vld [vmem:[#allocation5 + $0x5f4] sm:$0xf0] }
 0x460   :  { %v3175_v60 = vadd.f32 %v3170_v58, %v8527_v42  ;;  %v8011_v42 = vld [vmem:[#allocation5 + $0x674] sm:$0xf0]  ;;  %v6671_v58 = vor.u32 %v8005_v49, %v6670_v44  ;;  %v7997_v44 = vld [vmem:[#allocation5 + $0x604] sm:$0xf0]  ;;  %v6823_v59 = vor.u32 %v7995_v57, %v6822_v55  ;;  %v6830_v57 = vld [vmem:[#allocation8] sm:$0xf] }
 0x461   :  { %v6695_v12 = vor.u32 %v8011_v42, %v6694_v7  ;;  %v6983_v7 = vor.u32 %v8067_v5, %v6982_v3  ;;  %v8063_v42 = vld [vmem:[#allocation8 + $0x114] sm:$0xf0]  ;;  %v6639_v49 = vor.u32 %v7997_v44, %v6638_v41  ;;  %v6926_v3 = vld [vmem:[#allocation8 + $0xc0] sm:$0xf]  ;;  %v8054_v5 = vld [vmem:[#allocation8 + $0xcc] sm:$0xf0] }
 0x462   :  { %v3226_v61 = vpack.c.bf16 %v3175_v60, %v3175_v60  ;;  %v6795_v60 = vor.u32 %v7986_v50, %v6792_v51  ;;  %v6967_v11 = vor.u32 %v8063_v42, %v6966_v25  ;;  %v6640_v50 = vld [vmem:[#allocation5 + $0x608] sm:$0xf0]  ;;  %v7027_v51 = vor.u32 %v8076_v45, %v7024_v46  ;;  %v6910_v42 = vld [vmem:[#allocation8 + $0xa0] sm:$0xf]  ;;  %v6774_v44 = vld [vmem:[#allocation5 + $0x590] sm:$0xf] }
 0x463   :  { %v3158_v0 = vpop.f32.mrf.mxu2  ;;  %3387 = vmatpush.bf16.msrb.mxu0 %v6695_v12  ;;  %v8088_v12 = vld [vmem:[#allocation8 + $0x1e4] sm:$0xf]  ;;  %v7983_v45 = vld [vmem:[#allocation5 + $0x594] sm:$0xf0]  ;;  %v6846_v46 = vld [vmem:[#allocation8 + $0x20] sm:$0xf] }
 0x464   :  { %3408 = vmatmul.bf16.vlgmr.msrb.gmra.mxu1 %v3226_v61  ;;  %3434 = vmatmul.bf16.vlgmr.msrb.gmra.mxu3 %v3226_v61  ;;  %v8002_v61 = vld [vmem:[#allocation5 + $0x634] sm:$0xf]  ;;  %v6784_v0 = vld [vmem:[#allocation5 + $0x5a8] sm:$0xf0] }
 0x465   :  { %4016 = vmatpush.bf16.msrb.mxu3 %v7079_v19  ;;  %v8003_v19 = vld [vmem:[#allocation5 + $0x634] sm:$0xf0]  ;;  %v6667_v9 = vor.u32 %v8002_v61, %v6664_v62  ;;  %3536 = vmatpush.bf16.msra.mxu1 %v6795_v60  ;;  %v6787_v6 = vor.u32 %v7984_v63, %v6784_v0  ;;  %v8072_v60 = vld [vmem:[#allocation8 + $0x164] sm:$0xf]  ;;  %v6814_v63 = vld [vmem:[#allocation5 + $0x5e0] sm:$0xf] }
 0x466   :  { %v7993_v0 = vld [vmem:[#allocation5 + $0x5e4] sm:$0xf0] }
 0x467   :  { %3388 = vmatpush.bf16.msrb.mxu0 %v6687_v24  ;;  %3417 = vmatpush.bf16.msrb.mxu2 %v6667_v9  ;;  %v8000_v24 = vld [vmem:[#allocation5 + $0x624] sm:$0xf] }
 0x468   :  { %v6659_v54 = vor.u32 %v8000_v24, %v6656_v26  ;;  %v8068_v9 = vld [vmem:[#allocation8 + $0x144] sm:$0xf]  ;;  %v6790_v26 = vld [vmem:[#allocation5 + $0x5b0] sm:$0xf] }
 0x469   :  { %4017 = vmatpush.bf16.msrb.mxu3 %v7063_v4  ;;  %v6663_v4 = vor.u32 %v8003_v19, %v6662_v48  ;;  %3537 = vmatpush.bf16.msra.mxu1 %v6787_v6  ;;  %v8058_v48 = vld [vmem:[#allocation8 + $0xec] sm:$0xf0]  ;;  %v7008_v19 = vld [vmem:[#allocation8 + $0x170] sm:$0xf0] }
 0x46a   :  { %v7011_v62 = vor.u32 %v8072_v60, %v7008_v19  ;;  %v6992_v6 = vld [vmem:[#allocation8 + $0x150] sm:$0xf0]  ;;  %v2763_v19 = vld [vmem:[#allocation10 + $0x23] ss:$0 sm:$0xff] }
 0x46b   :  { %3389 = vmatpush.bf16.msrb.mxu0 %v6679_v40  ;;  %3418 = vmatpush.bf16.msrb.mxu2 %v6659_v54  ;;  %v6995_v15 = vor.u32 %v8068_v9, %v6992_v6 }
 0x46d   :  { %4018 = vmatpush.bf16.msrb.mxu3 %v7047_v17  ;;  %3538 = vmatpush.bf16.msra.mxu1 %v6779_v8  ;;  %v7075_v17 = vor.u32 %v8088_v12, %v7072_v13  ;;  %v8050_v8 = vld [vmem:[#allocation8 + $0xac] sm:$0xf0]  ;;  %v6798_v13 = vld [vmem:[#allocation5 + $0x5c0] sm:$0xf] }
 0x46e   :  { %v6911_v52 = vor.u32 %v8050_v8, %v6910_v42  ;;  %v2834_v42 = vperm.slane %v8582_v20, 1  ;;  %v8081_v8 = vld [vmem:[#allocation8 + $0x1ac] sm:$0xf] }
 0x46f   :  { %3390 = vmatpush.bf16.msrb.mxu0 %v6671_v58  ;;  %v6942_v58 = vld [vmem:[#allocation8 + $0xe0] sm:$0xf] }
 0x470   :  { %v6943_v61 = vor.u32 %v8058_v48, %v6942_v58  ;;  %v8030_v58 = vld [vmem:[#allocation8 + $0xc] sm:$0xf0] }
 0x471   :  { %4019 = vmatpush.bf16.msrb.mxu3 %v7031_v35  ;;  %3539 = vmatpush.bf16.msra.mxu1 %v6771_v16  ;;  %v7998_v35 = vld [vmem:[#allocation5 + $0x614] sm:$0xf]  ;;  %v7989_v16 = vld [vmem:[#allocation5 + $0x5c4] sm:$0xf0] }
 0x472   :  { %v6651_v40 = vor.u32 %v7998_v35, %v6648_v37  ;;  %v6862_v37 = vld [vmem:[#allocation8 + $0x40] sm:$0xf] }
 0x473   :  { %3391 = vmatpush.bf16.msrb.mxu0 %v6663_v4  ;;  %v6927_v4 = vor.u32 %v8054_v5, %v6926_v3  ;;  %v7080_v3 = vld [vmem:[#allocation8 + $0x1f8] sm:$0xf0] }
 0x474   :  { %3972 = vmatmul.bf16.vlgmr.msra.gmra.mxu3 %v8489_v39  ;;  %3419 = vmatpush.bf16.msrb.mxu2 %v6651_v40 }
 0x475   :  { %4020 = vmatpush.bf16.msrb.mxu3 %v7015_v53  ;;  %3990 = vmatpush.bf16.msrb.mxu1 %v7075_v17  ;;  %v6643_v53 = vor.u32 %v7996_v47, %v6640_v50  ;;  %v6799_v17 = vor.u32 %v7989_v16, %v6798_v13  ;;  %v8034_v47 = vld [vmem:[#allocation8 + $0x2c] sm:$0xf0]  ;;  %v7032_v13 = vld [vmem:[#allocation8 + $0x198] sm:$0xf0]  ;;  %v8056_v16 = vld [vmem:[#allocation8 + $0xe4] sm:$0xf] }
 0x476   :  { %v6847_v50 = vor.u32 %v8034_v47, %v6846_v46  ;;  %v6947_v20 = vor.u32 %v8056_v16, %v6944_v18  ;;  %v8065_v47 = vld [vmem:[#allocation8 + $0x12c] sm:$0xf]  ;;  %v6838_v18 = vld [vmem:[#allocation8 + $0x8] sm:$0xf] }
 0x477   :  { %3392 = vmatpush.bf16.msrb.mxu0 %v6655_v23  ;;  %v8060_v23 = vld [vmem:[#allocation8 + $0x104] sm:$0xf] }
 0x478   :  { %3420 = vmatpush.bf16.msrb.mxu2 %v6643_v53  ;;  %v6963_v24 = vor.u32 %v8060_v23, %v6960_v2  ;;  %v7981_v53 = vld [vmem:[#allocation5 + $0x584] sm:$0xf0] }
 0x479   :  { %4021 = vmatpush.bf16.msrb.mxu3 %v6999_v1  ;;  %3991 = vmatpush.bf16.msrb.mxu1 %v7059_v27  ;;  %v6815_v1 = vor.u32 %v7993_v0, %v6814_v63  ;;  %v7987_v27 = vld [vmem:[#allocation5 + $0x5b4] sm:$0xf0] }
 0x47a   :  { %v6791_v54 = vor.u32 %v7987_v27, %v6790_v26  ;;  %v7016_v26 = vld [vmem:[#allocation8 + $0x178] sm:$0xf0] }
 0x47b   :  { %3393 = vmatpush.bf16.msrb.mxu0 %v6647_v32  ;;  %v6782_v32 = vld [vmem:[#allocation5 + $0x5a0] sm:$0xf] }
 0x47c   :  { %3951 = vmatpush.bf16.msra.mxu2 %v6943_v61  ;;  %v6783_v35 = vor.u32 %v7985_v33, %v6782_v32  ;;  %v8055_v32 = vld [vmem:[#allocation8 + $0xd4] sm:$0xf0] }
 0x47d   :  { %4022 = vmatpush.bf16.msrb.mxu3 %v6983_v7  ;;  %3992 = vmatpush.bf16.msrb.mxu1 %v7043_v38  ;;  %v7991_v7 = vld [vmem:[#allocation5 + $0x5d4] sm:$0xf0]  ;;  %v8038_v38 = vld [vmem:[#allocation8 + $0x4c] sm:$0xf0] }
 0x47e   :  { %v6807_v25 = vor.u32 %v7991_v7, %v6806_v14  ;;  %v6863_v40 = vor.u32 %v8038_v38, %v6862_v37  ;;  %v7064_v14 = vld [vmem:[#allocation8 + $0x1d8] sm:$0xf0]  ;;  %v8069_v37 = vld [vmem:[#allocation8 + $0x14c] sm:$0xf] }
 0x47f   :  { %3394 = vmatpush.bf16.msrb.mxu0 %v6639_v49  ;;  %v6775_v49 = vor.u32 %v7983_v45, %v6774_v44  ;;  %v7000_v38 = vld [vmem:[#allocation8 + $0x158] sm:$0xf0]  ;;  %v6912_v44 = vld [vmem:[#allocation8 + $0xb0] sm:$0xf0]  ;;  %v6918_v45 = vld [vmem:[#allocation8 + $0xa8] sm:$0xf] }
 0x480   :  { %3952 = vmatpush.bf16.msra.mxu2 %v6927_v4  ;;  %v7003_v46 = vor.u32 %v8069_v37, %v7000_v38  ;;  %v8045_v37 = vld [vmem:[#allocation8 + $0x8c] sm:$0xf]  ;;  %v6904_v38 = vld [vmem:[#allocation8 + $0x98] sm:$0xf0] }
 0x481   :  { %4023 = vmatpush.bf16.msrb.mxu3 %v6967_v11  ;;  %3993 = vmatpush.bf16.msrb.mxu1 %v7027_v51  ;;  %v6976_v11 = vld [vmem:[#allocation8 + $0x130] sm:$0xf0]  ;;  %v6766_v51 = vld [vmem:[#allocation5 + $0x580] sm:$0xf] }
 0x482   :  { %v6979_v12 = vor.u32 %v8064_v10, %v6976_v11  ;;  %v6767_v55 = vor.u32 %v7981_v53, %v6766_v51 }
 0x483   :  { %3519 = vmatpush.bf16.msra.mxu0 %v6823_v59  ;;  %v6831_v59 = vor.u32 %v8030_v58, %v6830_v57  ;;  %v6896_v57 = vld [vmem:[#allocation8 + $0x90] sm:$0xf0]  ;;  %v6902_v58 = vld [vmem:[#allocation8 + $0x88] sm:$0xf] }
 0x484   :  { %4024 = vmatmul.bf16.vlgmr.msrb.gmra.mxu3 %v8489_v39  ;;  %3953 = vmatpush.bf16.msra.mxu2 %v6911_v52  ;;  %v7048_v52 = vld [vmem:[#allocation8 + $0x1b8] sm:$0xf0] }
 0x485   :  { %3994 = vmatpush.bf16.msrb.mxu1 %v7011_v62  ;;  %v7051_v11 = vor.u32 %v8081_v8, %v7048_v52  ;;  %v8032_v52 = vld [vmem:[#allocation8 + $0x24] sm:$0xf] }
 0x487   :  { %3520 = vmatpush.bf16.msra.mxu0 %v6815_v1  ;;  %v8089_v1 = vld [vmem:[#allocation8 + $0x1ec] sm:$0xf] }
 0x488   :  { %3954 = vmatpush.bf16.msra.mxu2 %v6895_v22  ;;  %v7083_v9 = vor.u32 %v8089_v1, %v7080_v3  ;;  %v8059_v22 = vld [vmem:[#allocation8 + $0xf4] sm:$0xf0]  ;;  %v6886_v1 = vld [vmem:[#allocation8 + $0x68] sm:$0xf] }
 0x489   :  { %3995 = vmatpush.bf16.msrb.mxu1 %v6995_v15  ;;  %v8085_v15 = vld [vmem:[#allocation8 + $0x1cc] sm:$0xf]  ;;  %v6951_v27 = vor.u32 %v8059_v22, %v6950_v21  ;;  %v8043_v3 = vld [vmem:[#allocation8 + $0x74] sm:$0xf0] }
 0x48a   :  { %v8031_v21 = vld [vmem:[#allocation8 + $0x14] sm:$0xf0]  ;;  %v8057_v22 = vld [vmem:[#allocation8 + $0xec] sm:$0xf] }
 0x48b   :  { %3521 = vmatpush.bf16.msra.mxu0 %v6807_v25  ;;  %v7067_v25 = vor.u32 %v8085_v15, %v7064_v14  ;;  %v8036_v15 = vld [vmem:[#allocation8 + $0x44] sm:$0xf]  ;;  %v6864_v14 = vld [vmem:[#allocation8 + $0x50] sm:$0xf0] }
 0x48c   :  { %3955 = vmatpush.bf16.msra.mxu2 %v6879_v30  ;;  %v6934_v30 = vld [vmem:[#allocation8 + $0xc8] sm:$0xf] }
 0x48d   :  { %3996 = vmatpush.bf16.msrb.mxu1 %v6979_v12 }
 0x48f   :  { %3522 = vmatpush.bf16.msra.mxu0 %v6799_v17 }
 0x490   :  { %3956 = vmatpush.bf16.msra.mxu2 %v6863_v40 }
 0x491   :  { %3997 = vmatpush.bf16.msrb.mxu1 %v6963_v24  ;;  %v8073_v24 = vld [vmem:[#allocation8 + $0x16c] sm:$0xf] }
 0x493   :  { %3523 = vmatpush.bf16.msra.mxu0 %v6791_v54  ;;  %v8052_v54 = vld [vmem:[#allocation8 + $0xc4] sm:$0xf] }
 0x494   :  { %3957 = vmatpush.bf16.msra.mxu2 %v6847_v50  ;;  %v6931_v40 = vor.u32 %v8052_v54, %v6928_v29  ;;  %v6984_v50 = vld [vmem:[#allocation8 + $0x138] sm:$0xf0] }
 0x495   :  { %v6936_v54 = vld [vmem:[#allocation8 + $0xd8] sm:$0xf0] }
 0x497   :  { %3524 = vmatpush.bf16.msra.mxu0 %v6783_v35  ;;  %v7019_v35 = vor.u32 %v8073_v24, %v7016_v26  ;;  %v6839_v24 = vor.u32 %v8031_v21, %v6838_v18  ;;  %v7110_v18 = vld [vmem:[#allocation5 + $0x830] sm:$0xf]  ;;  %v8131_v21 = vld [vmem:[#allocation5 + $0x834] sm:$0xf0] }
 0x498   :  { %3958 = vmatpush.bf16.msra.mxu2 %v6831_v59  ;;  %v8047_v59 = vld [vmem:[#allocation8 + $0x94] sm:$0xf0] }
 0x49b   :  { %3525 = vmatpush.bf16.msra.mxu0 %v6775_v49  ;;  %v8051_v49 = vld [vmem:[#allocation8 + $0xb4] sm:$0xf0] }
 0x49c   :  { %v6919_v53 = vor.u32 %v8051_v49, %v6918_v45  ;;  %v8037_v49 = vld [vmem:[#allocation8 + $0x4c] sm:$0xf] }
 0x49f   :  { %3526 = vmatpush.bf16.msra.mxu0 %v6767_v55  ;;  %v8044_v55 = vld [vmem:[#allocation8 + $0x84] sm:$0xf] }
 0x4a3   :  { %v2759_v41 = vpop.f32.mrf.mxu1 }
 0x4ab   :  { %v2761_v48 = vpop.f32.mrf.mxu1 }
 0x4ac   :  { %v6987_v48 = vor.u32 %v8065_v47, %v6984_v50  ;;  %v8033_v50 = vld [vmem:[#allocation8 + $0x2c] sm:$0xf] }
 0x4b1   :  { %v2698_v60 = vpop.f32.mrf.mxu0 }
 0x4b2   :  { %v2760_v61 = vadd.f32 %v2759_v41, %v2698_v60  ;;  %v8048_v41 = vld [vmem:[#allocation8 + $0xa4] sm:$0xf]  ;;  %v8061_v60 = vld [vmem:[#allocation8 + $0x10c] sm:$0xf] }
 0x4b3   :  { %v3143_v62 = vpop.f32.mrf.mxu1  ;;  %v6915_v51 = vor.u32 %v8048_v41, %v6912_v44  ;;  %v6888_v41 = vld [vmem:[#allocation8 + $0x78] sm:$0xf0] }
 0x4b4   :  { %v2764_v63 = vadd.f32 %v2763_v19, %v2760_v61  ;;  %v6968_v19 = vld [vmem:[#allocation8 + $0x118] sm:$0xf0]  ;;  %v6899_v61 = vor.u32 %v8044_v55, %v6896_v57  ;;  %v8029_v57 = vld [vmem:[#allocation8 + $0xc] sm:$0xf] }
 0x4b6   :  { %v2765_v0 = vmax.f32 %v2764_v63, 0.0  ;;  %v8040_v63 = vld [vmem:[#allocation8 + $0x64] sm:$0xf] }
 0x4b8   :  { %v3173_v5 = vadd.f32 %v8586_v43, %v2765_v0  ;;  %v8077_v43 = vld [vmem:[#allocation8 + $0x18c] sm:$0xf]  ;;  %v6880_v0 = vld [vmem:[#allocation8 + $0x70] sm:$0xf0] }
 0x4b9   :  { %v2700_v4 = vpop.f32.mrf.mxu0  ;;  %v7035_v23 = vor.u32 %v8077_v43, %v7032_v13 }
 0x4ba   :  { %v8594_v6 = vpack.c.bf16 %v3173_v5, %v3173_v5  ;;  %v6971_v5 = vor.u32 %v8061_v60, %v6968_v19  ;;  %v6883_v4 = vor.u32 %v8040_v63, %v6880_v0  ;;  %v7142_v19 = vld [vmem:[#allocation5 + $0x870] sm:$0xf]  ;;  %v7144_v0 = vld [vmem:[#allocation5 + $0x878] sm:$0xf0] }
 0x4bb   :  { %v3145_v7 = vpop.f32.mrf.mxu1 }
 0x4bc   :  { %3540 = vmatmul.bf16.vlgmr.msra.gmra.mxu1 %v8594_v6  ;;  %v6870_v7 = vld [vmem:[#allocation8 + $0x48] sm:$0xf] }
 0x4bd   :  { %4042 = vmatpush.bf16.msra.mxu1 %v7083_v9  ;;  %v6887_v9 = vor.u32 %v8043_v3, %v6886_v1  ;;  %v7134_v1 = vld [vmem:[#allocation5 + $0x860] sm:$0xf]  ;;  %v8137_v3 = vld [vmem:[#allocation5 + $0x864] sm:$0xf0] }
 0x4c1   :  { %v3130_v10 = vpop.f32.mrf.mxu0  ;;  %4043 = vmatpush.bf16.msra.mxu1 %v7067_v25  ;;  %v8039_v25 = vld [vmem:[#allocation8 + $0x54] sm:$0xf0] }
 0x4c2   :  { %v3131_v12 = vadd.f32 %v3130_v10, %v2834_v42  ;;  %v6867_v42 = vor.u32 %v8036_v15, %v6864_v14  ;;  %v6871_v8 = vor.u32 %v8039_v25, %v6870_v7  ;;  %v6848_v10 = vld [vmem:[#allocation8 + $0x30] sm:$0xf0]  ;;  %v7136_v15 = vld [vmem:[#allocation5 + $0x868] sm:$0xf0]  ;;  %v7126_v7 = vld [vmem:[#allocation5 + $0x850] sm:$0xf] }
 0x4c3   :  { %v6851_v13 = vor.u32 %v8032_v52, %v6848_v10  ;;  %v8135_v25 = vld [vmem:[#allocation5 + $0x854] sm:$0xf0]  ;;  %v7128_v52 = vld [vmem:[#allocation5 + $0x858] sm:$0xf0] }
 0x4c4   :  { %v3144_v17 = vadd.f32 %v3143_v62, %v3131_v12  ;;  %v6903_v62 = vor.u32 %v8047_v59, %v6902_v58  ;;  %v8035_v12 = vld [vmem:[#allocation8 + $0x34] sm:$0xf0]  ;;  %v6840_v58 = vld [vmem:[#allocation8 + $0x18] sm:$0xf0] }
 0x4c5   :  { %4044 = vmatpush.bf16.msra.mxu1 %v7051_v11  ;;  %v6854_v11 = vld [vmem:[#allocation8 + $0x28] sm:$0xf]  ;;  %v6843_v59 = vor.u32 %v8029_v57, %v6840_v58  ;;  %v7200_v57 = vld [vmem:[#allocation5 + $0x8e8] sm:$0xf0] }
 0x4c6   :  { %v3174_v2 = vadd.f32 %v3144_v17, %v8522_v28  ;;  %v6935_v28 = vor.u32 %v8055_v32, %v6934_v30  ;;  %v6855_v16 = vor.u32 %v8035_v12, %v6854_v11  ;;  %v8028_v17 = vld [vmem:[#allocation8 + $0x4] sm:$0xf]  ;;  %v8049_v30 = vld [vmem:[#allocation8 + $0xac] sm:$0xf]  ;;  %v6920_v32 = vld [vmem:[#allocation8 + $0xb8] sm:$0xf0] }
 0x4c7   :  { %v7118_v11 = vld [vmem:[#allocation5 + $0x840] sm:$0xf]  ;;  %v8133_v12 = vld [vmem:[#allocation5 + $0x844] sm:$0xf0] }
 0x4c8   :  { %v3225_v56 = vpack.c.bf16 %v3174_v2, %v3174_v2 }
 0x4c9   :  { %v3132_v33 = vpop.f32.mrf.mxu0  ;;  %4045 = vmatpush.bf16.msra.mxu1 %v7035_v23  ;;  %v6952_v23 = vld [vmem:[#allocation8 + $0xf8] sm:$0xf0] }
 0x4ca   :  { %3395 = vmatmul.bf16.vlgmr.msrb.gmra.mxu0 %v3225_v56  ;;  %3421 = vmatmul.bf16.vlgmr.msrb.gmra.mxu2 %v3225_v56 }
 0x4cb   :  { %3977 = vmatpush.bf16.msrb.mxu0 %v6947_v20  ;;  %4003 = vmatpush.bf16.msrb.mxu2 %v6951_v27  ;;  %v6955_v20 = vor.u32 %v8057_v22, %v6952_v23  ;;  %v8053_v27 = vld [vmem:[#allocation8 + $0xcc] sm:$0xf]  ;;  %v7111_v22 = vor.u32 %v8131_v21, %v7110_v18  ;;  %v8130_v23 = vld [vmem:[#allocation5 + $0x834] sm:$0xf]  ;;  %v8148_v21 = vld [vmem:[#allocation5 + $0x8c4] sm:$0xf] }
 0x4cc   :  { %3998 = vmatmul.bf16.vlgmr.msrb.gmra.mxu1 %v8489_v39  ;;  %v6939_v29 = vor.u32 %v8053_v27, %v6936_v54  ;;  %v8129_v27 = vld [vmem:[#allocation5 + $0x824] sm:$0xf0]  ;;  %v7264_v18 = vld [vmem:[#allocation5 + $0x768] sm:$0xf0] }
 0x4cd   :  { %4046 = vmatpush.bf16.msra.mxu1 %v7019_v35  ;;  %v6923_v35 = vor.u32 %v8049_v30, %v6920_v32  ;;  %v7206_v32 = vld [vmem:[#allocation5 + $0x8f0] sm:$0xf] }
 0x4cf   :  { %3978 = vmatpush.bf16.msrb.mxu0 %v6931_v40  ;;  %4004 = vmatpush.bf16.msrb.mxu2 %v6935_v28  ;;  %v6907_v40 = vor.u32 %v8045_v37, %v6904_v38  ;;  %v8041_v28 = vld [vmem:[#allocation8 + $0x6c] sm:$0xf]  ;;  %v7208_v38 = vld [vmem:[#allocation5 + $0x8f8] sm:$0xf0] }
 0x4d0   :  { %v6891_v45 = vor.u32 %v8041_v28, %v6888_v41  ;;  %v8127_v28 = vld [vmem:[#allocation5 + $0x814] sm:$0xf0] }
 0x4d1   :  { %4047 = vmatpush.bf16.msra.mxu1 %v7003_v46  ;;  %v6872_v46 = vld [vmem:[#allocation8 + $0x58] sm:$0xf0] }
 0x4d2   :  { %v6875_v47 = vor.u32 %v8037_v49, %v6872_v46  ;;  %v8126_v49 = vld [vmem:[#allocation5 + $0x814] sm:$0xf]  ;;  %v7096_v46 = vld [vmem:[#allocation5 + $0x818] sm:$0xf0] }
 0x4d3   :  { %3979 = vmatpush.bf16.msrb.mxu0 %v6915_v51  ;;  %4005 = vmatpush.bf16.msrb.mxu2 %v6919_v53  ;;  %v6856_v51 = vld [vmem:[#allocation8 + $0x38] sm:$0xf0] }
 0x4d4   :  { %v6859_v55 = vor.u32 %v8033_v50, %v6856_v51  ;;  %v7198_v50 = vld [vmem:[#allocation5 + $0x8e0] sm:$0xf]  ;;  %v8153_v51 = vld [vmem:[#allocation5 + $0x8e4] sm:$0xf0] }
 0x4d5   :  { %4048 = vmatpush.bf16.msra.mxu1 %v6987_v48 }
 0x4d7   :  { %3980 = vmatpush.bf16.msrb.mxu0 %v6899_v61  ;;  %4006 = vmatpush.bf16.msrb.mxu2 %v6903_v62  ;;  %v8139_v61 = vld [vmem:[#allocation5 + $0x874] sm:$0xf0]  ;;  %v8138_v62 = vld [vmem:[#allocation5 + $0x874] sm:$0xf] }
 0x4d8   :  { %v7143_v63 = vor.u32 %v8139_v61, %v7142_v19  ;;  %v8124_v61 = vld [vmem:[#allocation5 + $0x804] sm:$0xf] }
 0x4d9   :  { %4049 = vmatpush.bf16.msra.mxu1 %v6971_v5  ;;  %v7147_v5 = vor.u32 %v8138_v62, %v7144_v0  ;;  %v7088_v62 = vld [vmem:[#allocation5 + $0x808] sm:$0xf0] }
 0x4da   :  { %3527 = vmatmul.bf16.vlgmr.msra.gmra.mxu0 %v8594_v6  ;;  %3959 = vmatmul.bf16.vlgmr.msra.gmra.mxu2 %v8487_v34  ;;  %v6832_v6 = vld [vmem:[#allocation8 + $0x10] sm:$0xf0]  ;;  %v7091_v0 = vor.u32 %v8124_v61, %v7088_v62  ;;  %v7158_v62 = vld [vmem:[#allocation5 + $0x890] sm:$0xf] }
 0x4db   :  { %3981 = vmatpush.bf16.msrb.mxu0 %v6883_v4  ;;  %4007 = vmatpush.bf16.msrb.mxu2 %v6887_v9  ;;  %v6835_v2 = vor.u32 %v8028_v17, %v6832_v6  ;;  %v7135_v4 = vor.u32 %v8137_v3, %v7134_v1  ;;  %v8136_v9 = vld [vmem:[#allocation5 + $0x864] sm:$0xf]  ;;  %v7120_v17 = vld [vmem:[#allocation5 + $0x848] sm:$0xf0]  ;;  %v8107_v1 = vld [vmem:[#allocation5 + $0x774] sm:$0xf0] }
 0x4dc   :  { %4050 = vmatmul.bf16.vlgmr.msra.gmra.mxu1 %v8489_v39  ;;  %v7139_v14 = vor.u32 %v8136_v9, %v7136_v15  ;;  %v7190_v3 = vld [vmem:[#allocation5 + $0x8d0] sm:$0xf]  ;;  %v8151_v9 = vld [vmem:[#allocation5 + $0x8d4] sm:$0xf0]  ;;  %v8106_v15 = vld [vmem:[#allocation5 + $0x774] sm:$0xf] }
 0x4df   :  { %3982 = vmatpush.bf16.msrb.mxu0 %v6867_v42  ;;  %4008 = vmatpush.bf16.msrb.mxu2 %v6871_v8  ;;  %v8134_v42 = vld [vmem:[#allocation5 + $0x854] sm:$0xf]  ;;  %v7127_v8 = vor.u32 %v8135_v25, %v7126_v7  ;;  %v7191_v7 = vor.u32 %v8151_v9, %v7190_v3 }
 0x4e0   :  { %v7131_v10 = vor.u32 %v8134_v42, %v7128_v52  ;;  %v8150_v42 = vld [vmem:[#allocation5 + $0x8d4] sm:$0xf] }
 0x4e1   :  { %v8603_v43 = vpop.f32.mrf.mxu1  ;;  %v8142_v9 = vld [vmem:[#allocation5 + $0x894] sm:$0xf] }
 0x4e3   :  { %3983 = vmatpush.bf16.msrb.mxu0 %v6851_v13  ;;  %4009 = vmatpush.bf16.msrb.mxu2 %v6855_v16  ;;  %v7119_v13 = vor.u32 %v8133_v12, %v7118_v11  ;;  %v8132_v16 = vld [vmem:[#allocation5 + $0x844] sm:$0xf]  ;;  %v8105_v11 = vld [vmem:[#allocation5 + $0x764] sm:$0xf0] }
 0x4e4   :  { %v7123_v6 = vor.u32 %v8132_v16, %v7120_v17  ;;  %v8149_v16 = vld [vmem:[#allocation5 + $0x8c4] sm:$0xf0]  ;;  %v8104_v17 = vld [vmem:[#allocation5 + $0x764] sm:$0xf] }
 0x4e7   :  { %v8605_v26 = vpop.f32.mrf.mxu3  ;;  %3984 = vmatpush.bf16.msrb.mxu0 %v6835_v2  ;;  %4010 = vmatpush.bf16.msrb.mxu2 %v6839_v24  ;;  %v7112_v2 = vld [vmem:[#allocation5 + $0x838] sm:$0xf0] }
 0x4e8   :  { %v7115_v24 = vor.u32 %v8130_v23, %v7112_v2  ;;  %v7267_v23 = vor.u32 %v8104_v17, %v7264_v18  ;;  %v8140_v17 = vld [vmem:[#allocation5 + $0x884] sm:$0xf] }
 0x4e9   :  { %v3411_v56 = vpop.f32.mrf.mxu1 }
 0x4ea   :  { %3985 = vmatmul.bf16.vlgmr.msrb.gmra.mxu0 %v8487_v34  ;;  %4011 = vmatmul.bf16.vlgmr.msrb.gmra.mxu2 %v8487_v34  ;;  %v8128_v56 = vld [vmem:[#allocation5 + $0x824] sm:$0xf] }
 0x4eb   :  { %4029 = vmatpush.bf16.msra.mxu0 %v6955_v20  ;;  %4287 = vmatpush.bf16.msra.mxu2 %v7143_v63  ;;  %v7102_v20 = vld [vmem:[#allocation5 + $0x820] sm:$0xf]  ;;  %v7270_v63 = vld [vmem:[#allocation5 + $0x770] sm:$0xf] }
 0x4ec   :  { %v7103_v54 = vor.u32 %v8129_v27, %v7102_v20  ;;  %v8103_v20 = vld [vmem:[#allocation5 + $0x754] sm:$0xf0] }
 0x4ef   :  { %v3437_v33 = vpop.f32.mrf.mxu3  ;;  %4030 = vmatpush.bf16.msra.mxu0 %v6939_v29  ;;  %4288 = vmatpush.bf16.msra.mxu2 %v7135_v4  ;;  %v7104_v29 = vld [vmem:[#allocation5 + $0x828] sm:$0xf0]  ;;  %v7271_v4 = vor.u32 %v8107_v1, %v7270_v63  ;;  %v8143_v63 = vld [vmem:[#allocation5 + $0x894] sm:$0xf0] }
 0x4f0   :  { %v7107_v30 = vor.u32 %v8128_v56, %v7104_v29  ;;  %v8155_v33 = vld [vmem:[#allocation5 + $0x8f4] sm:$0xf0]  ;;  %v8102_v29 = vld [vmem:[#allocation5 + $0x754] sm:$0xf]  ;;  %v7159_v3 = vor.u32 %v8143_v63, %v7158_v62  ;;  %v7320_v63 = vld [vmem:[#allocation5 + $0x7d8] sm:$0xf0] }
 0x4f1   :  { %v7207_v37 = vor.u32 %v8155_v33, %v7206_v32  ;;  %v8147_v56 = vld [vmem:[#allocation5 + $0x8b4] sm:$0xf0]  ;;  %v7256_v33 = vld [vmem:[#allocation5 + $0x758] sm:$0xf0]  ;;  %v8118_v62 = vld [vmem:[#allocation5 + $0x7d4] sm:$0xf] }
 0x4f3   :  { %4031 = vmatpush.bf16.msra.mxu0 %v6923_v35  ;;  %4289 = vmatpush.bf16.msra.mxu2 %v7127_v8  ;;  %v8154_v35 = vld [vmem:[#allocation5 + $0x8f4] sm:$0xf]  ;;  %v7192_v8 = vld [vmem:[#allocation5 + $0x8d8] sm:$0xf0] }
 0x4f4   :  { %v7211_v41 = vor.u32 %v8154_v35, %v7208_v38  ;;  %4300 = vmatpush.bf16.msra.mxu3 %v7207_v37  ;;  %v7195_v52 = vor.u32 %v8150_v42, %v7192_v8  ;;  %v8146_v35 = vld [vmem:[#allocation5 + $0x8b4] sm:$0xf]  ;;  %v7176_v37 = vld [vmem:[#allocation5 + $0x8b8] sm:$0xf0]  ;;  %v7259_v38 = vor.u32 %v8102_v29, %v7256_v33  ;;  %v8097_v42 = vld [vmem:[#allocation5 + $0x724] sm:$0xf0] }
 0x4f5   :  { %v8094_v33 = vld [vmem:[#allocation5 + $0x714] sm:$0xf] }
 0x4f6   :  { %4326 = vmatpush.bf16.msrb.mxu1 %v7211_v41  ;;  %v8101_v41 = vld [vmem:[#allocation5 + $0x744] sm:$0xf0] }
 0x4f7   :  { %v8609_v44 = vpop.f32.mrf.mxu3  ;;  %4032 = vmatpush.bf16.msra.mxu0 %v6907_v40  ;;  %4290 = vmatpush.bf16.msra.mxu2 %v7119_v13  ;;  %v7094_v40 = vld [vmem:[#allocation5 + $0x810] sm:$0xf]  ;;  %v7182_v13 = vld [vmem:[#allocation5 + $0x8c0] sm:$0xf] }
 0x4fb   :  { %4033 = vmatpush.bf16.msra.mxu0 %v6891_v45  ;;  %4291 = vmatpush.bf16.msra.mxu2 %v7111_v22  ;;  %v7095_v45 = vor.u32 %v8127_v28, %v7094_v40  ;;  %v7184_v22 = vld [vmem:[#allocation5 + $0x8c8] sm:$0xf0]  ;;  %v7179_v40 = vor.u32 %v8146_v35, %v7176_v37  ;;  %v7246_v28 = vld [vmem:[#allocation5 + $0x740] sm:$0xf]  ;;  %v7224_v35 = vld [vmem:[#allocation5 + $0x718] sm:$0xf0] }
 0x4fc   :  { %v7187_v2 = vor.u32 %v8148_v21, %v7184_v22  ;;  %v7152_v21 = vld [vmem:[#allocation5 + $0x888] sm:$0xf0]  ;;  %v7334_v22 = vld [vmem:[#allocation5 + $0x7f0] sm:$0xf] }
 0x4ff   :  { %v3975_v53 = vpop.f32.mrf.mxu3  ;;  %4034 = vmatpush.bf16.msra.mxu0 %v6875_v47  ;;  %4292 = vmatpush.bf16.msra.mxu2 %v7103_v54  ;;  %v7099_v47 = vor.u32 %v8126_v49, %v7096_v46  ;;  %v7174_v54 = vld [vmem:[#allocation5 + $0x8b0] sm:$0xf]  ;;  %v7166_v49 = vld [vmem:[#allocation5 + $0x8a0] sm:$0xf]  ;;  %v8145_v46 = vld [vmem:[#allocation5 + $0x8a4] sm:$0xf0] }
 0x500   :  { %v7199_v53 = vor.u32 %v8153_v51, %v7198_v50  ;;  %v7175_v32 = vor.u32 %v8147_v56, %v7174_v54  ;;  %v7167_v50 = vor.u32 %v8145_v46, %v7166_v49  ;;  %v7248_v51 = vld [vmem:[#allocation5 + $0x748] sm:$0xf0]  ;;  %v7336_v54 = vld [vmem:[#allocation5 + $0x7f8] sm:$0xf0]  ;;  %v7222_v56 = vld [vmem:[#allocation5 + $0x710] sm:$0xf] }
 0x501   :  { %v7328_v49 = vld [vmem:[#allocation5 + $0x7e8] sm:$0xf0]  ;;  %v7214_v46 = vld [vmem:[#allocation5 + $0x700] sm:$0xf] }
 0x502   :  { %4301 = vmatpush.bf16.msra.mxu3 %v7199_v53  ;;  %v8144_v53 = vld [vmem:[#allocation5 + $0x8a4] sm:$0xf] }
 0x503   :  { %4035 = vmatpush.bf16.msra.mxu0 %v6859_v55  ;;  %4293 = vmatpush.bf16.msra.mxu2 %v7095_v45  ;;  %v8152_v55 = vld [vmem:[#allocation5 + $0x8e4] sm:$0xf]  ;;  %v7247_v45 = vor.u32 %v8101_v41, %v7246_v28  ;;  %v8121_v28 = vld [vmem:[#allocation5 + $0x7e4] sm:$0xf0] }
 0x504   :  { %v7203_v58 = vor.u32 %v8152_v55, %v7200_v57  ;;  %v7168_v57 = vld [vmem:[#allocation5 + $0x8a8] sm:$0xf0] }
 0x506   :  { %4327 = vmatpush.bf16.msrb.mxu1 %v7203_v58  ;;  %4302 = vmatpush.bf16.msra.mxu3 %v7191_v7 }
 0x507   :  { %v8611_v48 = vpop.f32.mrf.mxu3  ;;  %4036 = vmatpush.bf16.msra.mxu0 %v6843_v59  ;;  %v7086_v59 = vld [vmem:[#allocation5 + $0x800] sm:$0xf] }
 0x50a   :  { %4037 = vmatmul.bf16.vlgmr.msra.gmra.mxu0 %v8487_v34  ;;  %4328 = vmatpush.bf16.msrb.mxu1 %v7195_v52  ;;  %v7150_v52 = vld [vmem:[#allocation5 + $0x880] sm:$0xf] }
 0x50b   :  { %4313 = vmatpush.bf16.msrb.mxu0 %v7147_v5 }
 0x50e   :  { %4329 = vmatpush.bf16.msrb.mxu1 %v7187_v2 }
 0x50f   :  { %v4027_v60 = vpop.f32.mrf.mxu3  ;;  %4314 = vmatpush.bf16.msrb.mxu0 %v7139_v14  ;;  %v7272_v14 = vld [vmem:[#allocation5 + $0x778] sm:$0xf0] }
 0x510   :  { %v8125_v60 = vld [vmem:[#allocation5 + $0x804] sm:$0xf0]  ;;  %v7275_v25 = vor.u32 %v8106_v15, %v7272_v14  ;;  %v7160_v15 = vld [vmem:[#allocation5 + $0x898] sm:$0xf0] }
 0x511   :  { %v7087_v19 = vor.u32 %v8125_v60, %v7086_v59  ;;  %v7171_v59 = vor.u32 %v8144_v53, %v7168_v57  ;;  %v7238_v60 = vld [vmem:[#allocation5 + $0x730] sm:$0xf]  ;;  %v7163_v7 = vor.u32 %v8142_v9, %v7160_v15  ;;  %v7216_v53 = vld [vmem:[#allocation5 + $0x708] sm:$0xf0]  ;;  %v8117_v9 = vld [vmem:[#allocation5 + $0x7c4] sm:$0xf0] }
 0x512   :  { %4330 = vmatpush.bf16.msrb.mxu1 %v7179_v40  ;;  %v7326_v40 = vld [vmem:[#allocation5 + $0x7e0] sm:$0xf] }
 0x513   :  { %4315 = vmatpush.bf16.msrb.mxu0 %v7131_v10  ;;  %4294 = vmatpush.bf16.msra.mxu2 %v7087_v19  ;;  %v7262_v10 = vld [vmem:[#allocation5 + $0x760] sm:$0xf]  ;;  %v8099_v19 = vld [vmem:[#allocation5 + $0x734] sm:$0xf0]  ;;  %v7327_v41 = vor.u32 %v8121_v28, %v7326_v40 }
 0x514   :  { %v7263_v12 = vor.u32 %v8105_v11, %v7262_v10  ;;  %v7239_v61 = vor.u32 %v8099_v19, %v7238_v60  ;;  %v8141_v10 = vld [vmem:[#allocation5 + $0x884] sm:$0xf0]  ;;  %v8096_v11 = vld [vmem:[#allocation5 + $0x724] sm:$0xf]  ;;  %v8119_v60 = vld [vmem:[#allocation5 + $0x7d4] sm:$0xf0] }
 0x516   :  { %4331 = vmatpush.bf16.msrb.mxu1 %v7171_v59  ;;  %v7318_v59 = vld [vmem:[#allocation5 + $0x7d0] sm:$0xf] }
 0x517   :  { %4316 = vmatpush.bf16.msrb.mxu0 %v7123_v6  ;;  %4499 = vmatpush.bf16.msrb.mxu2 %v7271_v4  ;;  %v7183_v6 = vor.u32 %v8149_v16, %v7182_v13  ;;  %v7240_v4 = vld [vmem:[#allocation5 + $0x738] sm:$0xf0]  ;;  %v7151_v13 = vor.u32 %v8141_v10, %v7150_v52  ;;  %v7232_v16 = vld [vmem:[#allocation5 + $0x728] sm:$0xf0]  ;;  %v8115_v52 = vld [vmem:[#allocation5 + $0x7b4] sm:$0xf0] }
 0x518   :  { %v7235_v18 = vor.u32 %v8096_v11, %v7232_v16  ;;  %v8114_v11 = vld [vmem:[#allocation5 + $0x7b4] sm:$0xf] }
 0x519   :  { %4303 = vmatpush.bf16.msra.mxu3 %v7183_v6 }
 0x51a   :  { %4332 = vmatpush.bf16.msrb.mxu1 %v7163_v7  ;;  %v7312_v7 = vld [vmem:[#allocation5 + $0x7c8] sm:$0xf0] }
 0x51b   :  { %4317 = vmatpush.bf16.msrb.mxu0 %v7115_v24  ;;  %4500 = vmatpush.bf16.msrb.mxu2 %v7263_v12  ;;  %v7254_v24 = vld [vmem:[#allocation5 + $0x750] sm:$0xf] }
 0x51c   :  { %v7255_v27 = vor.u32 %v8103_v20, %v7254_v24  ;;  %v7155_v24 = vor.u32 %v8140_v17, %v7152_v21  ;;  %v8113_v21 = vld [vmem:[#allocation5 + $0x7a4] sm:$0xf0] }
 0x51d   :  { %4304 = vmatpush.bf16.msra.mxu3 %v7175_v32  ;;  %v8095_v32 = vld [vmem:[#allocation5 + $0x714] sm:$0xf0] }
 0x51e   :  { %4333 = vmatpush.bf16.msrb.mxu1 %v7155_v24  ;;  %v7223_v37 = vor.u32 %v8095_v32, %v7222_v56  ;;  %v7296_v24 = vld [vmem:[#allocation5 + $0x7a8] sm:$0xf0]  ;;  %v8111_v32 = vld [vmem:[#allocation5 + $0x794] sm:$0xf0] }
 0x51f   :  { %4318 = vmatpush.bf16.msrb.mxu0 %v7107_v30  ;;  %4501 = vmatpush.bf16.msrb.mxu2 %v7255_v27  ;;  %v8122_v27 = vld [vmem:[#allocation5 + $0x7f4] sm:$0xf] }
 0x521   :  { %4305 = vmatpush.bf16.msra.mxu3 %v7167_v50 }
 0x523   :  { %4319 = vmatpush.bf16.msrb.mxu0 %v7099_v47  ;;  %v8100_v47 = vld [vmem:[#allocation5 + $0x744] sm:$0xf]  ;;  %4502 = vmatpush.bf16.msrb.mxu2 %v7247_v45 }
 0x524   :  { %v7251_v55 = vor.u32 %v8100_v47, %v7248_v51  ;;  %v8120_v45 = vld [vmem:[#allocation5 + $0x7e4] sm:$0xf]  ;;  %v8093_v47 = vld [vmem:[#allocation5 + $0x704] sm:$0xf0] }
 0x525   :  { %4306 = vmatpush.bf16.msra.mxu3 %v7159_v3  ;;  %v7215_v50 = vor.u32 %v8093_v47, %v7214_v46  ;;  %v8092_v51 = vld [vmem:[#allocation5 + $0x704] sm:$0xf] }
 0x526   :  { %v7219_v57 = vor.u32 %v8092_v51, %v7216_v53 }
 0x527   :  { %4320 = vmatpush.bf16.msrb.mxu0 %v7091_v0  ;;  %v8098_v0 = vld [vmem:[#allocation5 + $0x734] sm:$0xf]  ;;  %4503 = vmatpush.bf16.msrb.mxu2 %v7239_v61  ;;  %v7319_v61 = vor.u32 %v8119_v60, %v7318_v59  ;;  %v7426_v60 = vld [vmem:[#allocation7 + $0x228] sm:$0xf] }
 0x528   :  { %v7243_v14 = vor.u32 %v8098_v0, %v7240_v4  ;;  %v7323_v0 = vor.u32 %v8118_v62, %v7320_v63  ;;  %v7310_v4 = vld [vmem:[#allocation5 + $0x7c0] sm:$0xf]  ;;  %v8178_v62 = vld [vmem:[#allocation7 + $0x230] sm:$0xf0]  ;;  %v7428_v63 = vld [vmem:[#allocation7 + $0x234] sm:$0xf0] }
 0x529   :  { %4307 = vmatpush.bf16.msra.mxu3 %v7151_v13  ;;  %v7311_v15 = vor.u32 %v8117_v9, %v7310_v4  ;;  %v8630_v13 = vld [vmem:[#allocation10 + $0x25] ss:$8 sm:$0x3]  ;;  %v7427_v9 = vor.u32 %v8178_v62, %v7426_v60  ;;  %v7356_v62 = vld [vmem:[#allocation7 + $0x1a4] sm:$0xf0] }
 0x52a   :  { %v8160_v60 = vld [vmem:[#allocation7 + $0x1a0] sm:$0xf0] }
 0x52b   :  { %4525 = vmatpush.bf16.msra.mxu0 %v7275_v25  ;;  %v7230_v25 = vld [vmem:[#allocation5 + $0x720] sm:$0xf] }
 0x52c   :  { %v7231_v8 = vor.u32 %v8097_v42, %v7230_v25 }
 0x52e   :  { %4504 = vmatpush.bf16.msrb.mxu2 %v7231_v8  ;;  %v7302_v8 = vld [vmem:[#allocation5 + $0x7b0] sm:$0xf] }
 0x52f   :  { %4526 = vmatpush.bf16.msra.mxu0 %v7267_v23  ;;  %v8123_v23 = vld [vmem:[#allocation5 + $0x7f4] sm:$0xf0]  ;;  %v7303_v10 = vor.u32 %v8115_v52, %v7302_v8  ;;  %v8175_v8 = vld [vmem:[#allocation7 + $0x218] sm:$0xf0]  ;;  %v8174_v52 = vld [vmem:[#allocation7 + $0x214] sm:$0xf] }
 0x530   :  { %v7335_v20 = vor.u32 %v8123_v23, %v7334_v22  ;;  %v3549_v22 = vperm.slane %v8630_v13, 1 }
 0x532   :  { %4512 = vmatpush.bf16.msrb.mxu3 %v7335_v20  ;;  %4505 = vmatpush.bf16.msrb.mxu2 %v7223_v37  ;;  %v8633_v20 = vld [vmem:[#allocation10 + $0x26] ss:$8 sm:$0xf] }
 0x533   :  { %4527 = vmatpush.bf16.msra.mxu0 %v7259_v38  ;;  %v7227_v38 = vor.u32 %v8094_v33, %v7224_v35  ;;  %v7288_v37 = vld [vmem:[#allocation5 + $0x798] sm:$0xf0]  ;;  %v3625_v46 = vperm.slane %v8633_v20, 2  ;;  %v3623_v4 = vperm.slane %v8633_v20, 0 }
 0x536   :  { %4513 = vmatpush.bf16.msrb.mxu3 %v7327_v41  ;;  %4506 = vmatpush.bf16.msrb.mxu2 %v7215_v50  ;;  %v7278_v41 = vld [vmem:[#allocation5 + $0x780] sm:$0xf]  ;;  %v8108_v50 = vld [vmem:[#allocation5 + $0x784] sm:$0xf] }
 0x537   :  { %4528 = vmatpush.bf16.msra.mxu0 %v7251_v55 }
 0x539   :  { %v8614_v5 = vpop.f32.mrf.mxu1 }
 0x53a   :  { %4514 = vmatpush.bf16.msrb.mxu3 %v7319_v61 }
 0x53b   :  { %4529 = vmatpush.bf16.msra.mxu0 %v7243_v14  ;;  %v8116_v14 = vld [vmem:[#allocation5 + $0x7c4] sm:$0xf] }
 0x53c   :  { %v7315_v25 = vor.u32 %v8116_v14, %v7312_v7  ;;  %v7414_v14 = vld [vmem:[#allocation7 + $0x210] sm:$0xf] }
 0x53e   :  { %4515 = vmatpush.bf16.msrb.mxu3 %v7311_v15 }
 0x53f   :  { %4530 = vmatpush.bf16.msra.mxu0 %v7235_v18  ;;  %v7294_v18 = vld [vmem:[#allocation5 + $0x7a0] sm:$0xf] }
 0x540   :  { %v7295_v23 = vor.u32 %v8113_v21, %v7294_v18  ;;  %v8172_v18 = vld [vmem:[#allocation7 + $0x200] sm:$0xf0] }
 0x541   :  { %v3543_v30 = vpop.f32.mrf.mxu1 }
 0x542   :  { %v7339_v30 = vor.u32 %v8122_v27, %v7336_v54  ;;  %4516 = vmatpush.bf16.msrb.mxu3 %v7303_v10  ;;  %v3624_v54 = vperm.slane %v8633_v20, 1  ;;  %v7416_v10 = vld [vmem:[#allocation7 + $0x21c] sm:$0xf0] }
 0x543   :  { %4531 = vmatpush.bf16.msra.mxu0 %v7227_v38 }
 0x544   :  { %4538 = vmatpush.bf16.msra.mxu1 %v7339_v30  ;;  %v7286_v30 = vld [vmem:[#allocation5 + $0x790] sm:$0xf] }
 0x545   :  { %v7287_v35 = vor.u32 %v8111_v32, %v7286_v30 }
 0x546   :  { %4517 = vmatpush.bf16.msrb.mxu3 %v7295_v23 }
 0x547   :  { %v8616_v58 = vpop.f32.mrf.mxu0  ;;  %4532 = vmatpush.bf16.msra.mxu0 %v7219_v57 }
 0x548   :  { %v3410_v7 = vadd.f32 %v8603_v43, %v8616_v58  ;;  %v8171_v43 = vld [vmem:[#allocation7 + $0x1fc] sm:$0xf]  ;;  %v7404_v58 = vld [vmem:[#allocation7 + $0x204] sm:$0xf0] }
 0x549   :  { %v8618_v1 = vpop.f32.mrf.mxu1  ;;  %v7407_v23 = vor.u32 %v8171_v43, %v7404_v58  ;;  %v8196_v43 = vld [vmem:[#allocation7 + $0x2c0] sm:$0xf0]  ;;  %v8195_v58 = vld [vmem:[#allocation7 + $0x2bc] sm:$0xf] }
 0x54a   :  { %4518 = vmatpush.bf16.msrb.mxu3 %v7287_v35  ;;  %v8165_v35 = vld [vmem:[#allocation7 + $0x1cc] sm:$0xf] }
 0x54d   :  { %v3422_v12 = vpop.f32.mrf.mxu2 }
 0x54e   :  { %v3436_v6 = vadd.f32 %v8605_v26, %v3422_v12  ;;  %v7304_v12 = vld [vmem:[#allocation5 + $0x7b8] sm:$0xf0] }
 0x54f   :  { %v3398_v2 = vpop.f32.mrf.mxu0  ;;  %v7307_v17 = vor.u32 %v8114_v11, %v7304_v12  ;;  %v3548_v12 = vperm.slane %v8630_v13, 0 }
 0x550   :  { %v8622_v29 = vadd.f32 %v8614_v5, %v3436_v6  ;;  %v7331_v5 = vor.u32 %v8120_v45, %v7328_v49  ;;  %v8112_v2 = vld [vmem:[#allocation5 + $0x7a4] sm:$0xf]  ;;  %v8109_v45 = vld [vmem:[#allocation5 + $0x784] sm:$0xf0] }
 0x551   :  { %v4001_v26 = vpop.f32.mrf.mxu1  ;;  %v7299_v27 = vor.u32 %v8112_v2, %v7296_v24  ;;  %v7279_v47 = vor.u32 %v8109_v45, %v7278_v41  ;;  %v8169_v2 = vld [vmem:[#allocation7 + $0x1e8] sm:$0xf0]  ;;  %v8168_v24 = vld [vmem:[#allocation7 + $0x1e4] sm:$0xf]  ;;  %v8163_v45 = vld [vmem:[#allocation7 + $0x1b8] sm:$0xf0] }
 0x552   :  { %4539 = vmatpush.bf16.msra.mxu1 %v7331_v5  ;;  %v3553_v33 = vadd.f32 %v3549_v22, %v8622_v29  ;;  %v8110_v26 = vld [vmem:[#allocation5 + $0x794] sm:$0xf]  ;;  %v7280_v29 = vld [vmem:[#allocation5 + $0x788] sm:$0xf0] }
 0x553   :  { %v7291_v40 = vor.u32 %v8110_v26, %v7288_v37  ;;  %v7283_v51 = vor.u32 %v8108_v50, %v7280_v29  ;;  %4519 = vmatpush.bf16.msrb.mxu3 %v7279_v47  ;;  %v7380_v26 = vld [vmem:[#allocation7 + $0x1d4] sm:$0xf0]  ;;  %v3626_v37 = vperm.slane %v8633_v20, 3  ;;  %v7522_v47 = vld [vmem:[#allocation7 + $0x2e8] sm:$0xf] }
 0x554   :  { %v3555_v49 = vmax.f32 %v3553_v33, 0.0  ;;  %v8166_v33 = vld [vmem:[#allocation7 + $0x1d0] sm:$0xf0] }
 0x555   :  { %v3424_v55 = vpop.f32.mrf.mxu2  ;;  %v8202_v50 = vld [vmem:[#allocation7 + $0x2f0] sm:$0xf0] }
 0x556   :  { %4540 = vmatpush.bf16.msra.mxu1 %v7323_v0 }
 0x557   :  { %v8624_v19 = vpop.f32.mrf.mxu0 }
 0x559   :  { %v8626_v3 = vpop.f32.mrf.mxu1 }
 0x55a   :  { %4541 = vmatpush.bf16.msra.mxu1 %v7315_v25 }
 0x55d   :  { %v8628_v42 = vpop.f32.mrf.mxu2 }
 0x55e   :  { %4542 = vmatpush.bf16.msra.mxu1 %v7307_v17  ;;  %v7402_v17 = vld [vmem:[#allocation7 + $0x1f8] sm:$0xf] }
 0x55f   :  { %v3530_v16 = vpop.f32.mrf.mxu0  ;;  %v7403_v22 = vor.u32 %v8172_v18, %v7402_v17  ;;  %v7498_v17 = vld [vmem:[#allocation7 + $0x2b8] sm:$0xf] }
 0x560   :  { %v7419_v16 = vor.u32 %v8174_v52, %v7416_v10  ;;  %v8157_v10 = vld [vmem:[#allocation7 + $0x188] sm:$0xf0] }
 0x561   :  { %v4053_v6 = vpop.f32.mrf.mxu1 }
 0x562   :  { %4543 = vmatpush.bf16.msra.mxu1 %v7299_v27  ;;  %v3961_v6 = vadd.f32 %v8628_v42, %v3623_v4  ;;  %v7392_v27 = vld [vmem:[#allocation7 + $0x1ec] sm:$0xf0]  ;;  %v7378_v42 = vld [vmem:[#allocation7 + $0x1c8] sm:$0xf] }
 0x563   :  { %v7395_v30 = vor.u32 %v8168_v24, %v7392_v27  ;;  %v7510_v4 = vld [vmem:[#allocation7 + $0x2d0] sm:$0xf]  ;;  %v7486_v24 = vld [vmem:[#allocation7 + $0x2a0] sm:$0xf]  ;;  %v8193_v27 = vld [vmem:[#allocation7 + $0x2a8] sm:$0xf0] }
 0x564   :  { %v3974_v13 = vadd.f32 %v8609_v44, %v3961_v6  ;;  %v7366_v44 = vld [vmem:[#allocation7 + $0x1b0] sm:$0xf] }
 0x565   :  { %v3962_v56 = vpop.f32.mrf.mxu2  ;;  %v7367_v20 = vor.u32 %v8163_v45, %v7366_v44 }
 0x566   :  { %4544 = vmatpush.bf16.msra.mxu1 %v7291_v40  ;;  %v7383_v40 = vor.u32 %v8165_v35, %v7380_v26  ;;  %v7474_v26 = vld [vmem:[#allocation7 + $0x288] sm:$0xf] }
 0x567   :  { %v3986_v38 = vpop.f32.mrf.mxu0 }
 0x568   :  { %v3987_v28 = vadd.f32 %v3986_v38, %v3624_v54  ;;  %v7379_v38 = vor.u32 %v8166_v33, %v7378_v42  ;;  %v7410_v42 = vld [vmem:[#allocation7 + $0x200] sm:$0xf]  ;;  %v7487_v33 = vor.u32 %v8193_v27, %v7486_v24  ;;  %v7482_v24 = vld [vmem:[#allocation7 + $0x290] sm:$0xf]  ;;  %v8191_v27 = vld [vmem:[#allocation7 + $0x298] sm:$0xf0] }
 0x56a   :  { %v4000_v5 = vadd.f32 %v8618_v1, %v3987_v28  ;;  %4545 = vmatpush.bf16.msra.mxu1 %v7283_v51  ;;  %v8177_v1 = vld [vmem:[#allocation7 + $0x22c] sm:$0xf] }
 0x56b   :  { %v7431_v15 = vor.u32 %v8177_v1, %v7428_v63  ;;  %v7523_v63 = vor.u32 %v8202_v50, %v7522_v47  ;;  %v8187_v47 = vld [vmem:[#allocation7 + $0x278] sm:$0xf0]  ;;  %v8186_v50 = vld [vmem:[#allocation7 + $0x274] sm:$0xf] }
 0x56c   :  { %v8639_v53 = vadd.f32 %v4000_v5, %v3555_v49  ;;  %v8162_v49 = vld [vmem:[#allocation7 + $0x1b4] sm:$0xf]  ;;  %v7368_v5 = vld [vmem:[#allocation7 + $0x1bc] sm:$0xf0] }
 0x56d   :  { %v4012_v55 = vpop.f32.mrf.mxu2  ;;  %v7371_v51 = vor.u32 %v8162_v49, %v7368_v5  ;;  %v7462_v5 = vld [vmem:[#allocation7 + $0x270] sm:$0xf] }
 0x56e   :  { %v4013_v57 = vadd.f32 %v4012_v55, %v3625_v46  ;;  %v8201_v55 = vld [vmem:[#allocation7 + $0x2ec] sm:$0xf] }
 0x56f   :  { %v3988_v59 = vpop.f32.mrf.mxu0 }
 0x570   :  { %v4026_v61 = vadd.f32 %v8611_v48, %v4013_v57  ;;  %v3529_v48 = vadd.f32 %v8624_v19, %v3410_v7  ;;  %v7390_v19 = vld [vmem:[#allocation7 + $0x1e0] sm:$0xf]  ;;  %v7524_v57 = vld [vmem:[#allocation7 + $0x2f4] sm:$0xf0]  ;;  %v8198_v7 = vld [vmem:[#allocation7 + $0x2d4] sm:$0xf] }
 0x571   :  { %v7391_v56 = vor.u32 %v8169_v2, %v7390_v19  ;;  %v7354_v59 = vld [vmem:[#allocation7 + $0x198] sm:$0xf]  ;;  %v8176_v19 = vld [vmem:[#allocation7 + $0x220] sm:$0xf0] }
 0x572   :  { %v4057_v0 = vadd.f32 %v4026_v61, %v8504_v31  ;;  %v7415_v31 = vor.u32 %v8175_v8, %v7414_v14  ;;  %v3552_v21 = vadd.f32 %v3548_v12, %v3529_v48  ;;  %v8159_v61 = vld [vmem:[#allocation7 + $0x19c] sm:$0xf]  ;;  %v7342_v8 = vld [vmem:[#allocation7 + $0x180] sm:$0xf]  ;;  %v7344_v48 = vld [vmem:[#allocation7 + $0x18c] sm:$0xf0] }
 0x573   :  { %v7359_v14 = vor.u32 %v8159_v61, %v7356_v62  ;;  %v7434_v12 = vld [vmem:[#allocation7 + $0x230] sm:$0xf]  ;;  %v7343_v6 = vor.u32 %v8157_v10, %v7342_v8  ;;  %v8184_v61 = vld [vmem:[#allocation7 + $0x260] sm:$0xf0]  ;;  %v8183_v62 = vld [vmem:[#allocation7 + $0x25c] sm:$0xf] }
 0x574   :  { %v4125_v25 = vpack.c.bf16 %v4057_v0, %v4057_v0  ;;  %v3554_v54 = vmax.f32 %v3552_v21, 0.0  ;;  %v7527_v0 = vor.u32 %v8201_v55, %v7524_v57  ;;  %v7500_v21 = vld [vmem:[#allocation7 + $0x2c4] sm:$0xf0]  ;;  %v8167_v55 = vld [vmem:[#allocation7 + $0x1d8] sm:$0xf0]  ;;  %v7463_v57 = vor.u32 %v8187_v47, %v7462_v5  ;;  %v8210_v5 = vld [vmem:[#allocation2 + $0x430] sm:$0xff] }
 0x575   :  { %v4014_v11 = vpop.f32.mrf.mxu2  ;;  %v7503_v2 = vor.u32 %v8195_v58, %v7500_v21  ;;  %v7530_v8 = vld [vmem:[#allocation7 + $0x2f0] sm:$0xf]  ;;  %v7362_v10 = vld [vmem:[#allocation7 + $0x1a0] sm:$0xf]  ;;  %v8209_v47 = vld [vmem:[#allocation2 + $0x428] sm:$0xff] }
 0x576   :  { %4295 = vmatmul.bf16.vlgmr.msra.gmra.mxu2 %v4125_v25  ;;  %4321 = vmatmul.bf16.vlgmr.msrb.gmra.mxu0 %v4125_v25  ;;  %v4055_v32 = vadd.f32 %v3974_v13, %v3554_v54  ;;  %v7512_v25 = vld [vmem:[#allocation7 + $0x2dc] sm:$0xf0]  ;;  %v8156_v11 = vld [vmem:[#allocation7 + $0x184] sm:$0xf]  ;;  %v7499_v13 = vor.u32 %v8196_v43, %v7498_v17 }
 0x577   :  { %4891 = vmatpush.bf16.msra.mxu2 %v7427_v9  ;;  %4917 = vmatpush.bf16.msrb.mxu0 %v7431_v15  ;;  %v8199_v9 = vld [vmem:[#allocation7 + $0x2d8] sm:$0xf0]  ;;  %v7347_v18 = vor.u32 %v8156_v11, %v7344_v48  ;;  %v8192_v54 = vld [vmem:[#allocation7 + $0x2a4] sm:$0xf]  ;;  %v8161_v11 = vld [vmem:[#allocation7 + $0x1a8] sm:$0xf0] }
 0x578   :  { %v4091_v28 = vpack.c.bf16 %v4055_v32, %v4055_v32  ;;  %v8173_v32 = vld [vmem:[#allocation7 + $0x208] sm:$0xf0]  ;;  %v8200_v17 = vld [vmem:[#allocation7 + $0x2e0] sm:$0xf0]  ;;  %v7506_v21 = vld [vmem:[#allocation7 + $0x2c0] sm:$0xf] }
 0x579   :  { %v7411_v44 = vor.u32 %v8173_v32, %v7410_v42  ;;  %v7458_v32 = vld [vmem:[#allocation7 + $0x260] sm:$0xf] }
 0x57b   :  { %4892 = vmatpush.bf16.msra.mxu2 %v7415_v31  ;;  %4918 = vmatpush.bf16.msrb.mxu0 %v7419_v16  ;;  %v7511_v31 = vor.u32 %v8199_v9, %v7510_v4  ;;  %v7515_v16 = vor.u32 %v8198_v7, %v7512_v25  ;;  %v7440_v7 = vld [vmem:[#allocation7 + $0x24c] sm:$0xf0] }
 0x57f   :  { %4893 = vmatpush.bf16.msra.mxu2 %v7403_v22  ;;  %4919 = vmatpush.bf16.msrb.mxu0 %v7407_v23  ;;  %v7422_v23 = vld [vmem:[#allocation7 + $0x218] sm:$0xf] }
 0x583   :  { %4894 = vmatpush.bf16.msra.mxu2 %v7391_v56  ;;  %4920 = vmatpush.bf16.msrb.mxu0 %v7395_v30  ;;  %v7488_v56 = vld [vmem:[#allocation7 + $0x2ac] sm:$0xf0]  ;;  %v7423_v30 = vor.u32 %v8176_v19, %v7422_v23  ;;  %v7494_v19 = vld [vmem:[#allocation7 + $0x2a8] sm:$0xf] }
 0x584   :  { %v7491_v35 = vor.u32 %v8192_v54, %v7488_v56  ;;  %v7483_v54 = vor.u32 %v8191_v27, %v7482_v24  ;;  %v7470_v56 = vld [vmem:[#allocation7 + $0x278] sm:$0xf] }
 0x586   :  { %4507 = vmatmul.bf16.vlgmr.msrb.gmra.mxu2 %v4091_v28  ;;  %4533 = vmatmul.bf16.vlgmr.msra.gmra.mxu0 %v4091_v28  ;;  %v7398_v28 = vld [vmem:[#allocation7 + $0x1e8] sm:$0xf] }
 0x587   :  { %v4038_v41 = vpop.f32.mrf.mxu0  ;;  %4895 = vmatpush.bf16.msra.mxu2 %v7379_v38  ;;  %4921 = vmatpush.bf16.msrb.mxu0 %v7383_v40  ;;  %v8189_v38 = vld [vmem:[#allocation7 + $0x28c] sm:$0xf]  ;;  %v7476_v40 = vld [vmem:[#allocation7 + $0x294] sm:$0xf0] }
 0x588   :  { %v4039_v46 = vadd.f32 %v4038_v41, %v3626_v37  ;;  %v8190_v37 = vld [vmem:[#allocation7 + $0x290] sm:$0xf0]  ;;  %v7479_v49 = vor.u32 %v8189_v38, %v7476_v40 }
 0x589   :  { %v8170_v41 = vld [vmem:[#allocation7 + $0x1f0] sm:$0xf0]  ;;  %v7475_v45 = vor.u32 %v8190_v37, %v7474_v26  ;;  %v7446_v26 = vld [vmem:[#allocation7 + $0x248] sm:$0xf] }
 0x58a   :  { %v4052_v29 = vadd.f32 %v8626_v3, %v4039_v46  ;;  %v7355_v3 = vor.u32 %v8160_v60, %v7354_v59  ;;  %v4092_v46 = vpack.c.bf16 %v8639_v53, %v8639_v53  ;;  %v7450_v60 = vld [vmem:[#allocation7 + $0x258] sm:$0xf]  ;;  %v8182_v37 = vld [vmem:[#allocation7 + $0x250] sm:$0xf0] }
 0x58b   :  { %4896 = vmatpush.bf16.msra.mxu2 %v7367_v20  ;;  %4922 = vmatpush.bf16.msrb.mxu0 %v7371_v51  ;;  %v7399_v20 = vor.u32 %v8170_v41, %v7398_v28  ;;  %v7386_v51 = vld [vmem:[#allocation7 + $0x1d0] sm:$0xf]  ;;  %v7374_v53 = vld [vmem:[#allocation7 + $0x1b8] sm:$0xf]  ;;  %v7451_v4 = vor.u32 %v8184_v61, %v7450_v60  ;;  %v7447_v38 = vor.u32 %v8182_v37, %v7446_v26 }
 0x58c   :  { %v4058_v1 = vadd.f32 %v4052_v29, %v8508_v36  ;;  %v8179_v36 = vld [vmem:[#allocation7 + $0x238] sm:$0xf0]  ;;  %v7464_v29 = vld [vmem:[#allocation7 + $0x27c] sm:$0xf0] }
 0x58d   :  { %v7435_v22 = vor.u32 %v8179_v36, %v7434_v12  ;;  %v7467_v59 = vor.u32 %v8186_v50, %v7464_v29  ;;  %v8211_v28 = vld [vmem:[#allocation2 + $0x438] sm:$0xff] }
 0x58e   :  { %v4126_v15 = vpack.c.bf16 %v4058_v1, %v4058_v1  ;;  %v7452_v1 = vld [vmem:[#allocation7 + $0x264] sm:$0xf0]  ;;  %v8215_v29 = vld [vmem:[#allocation2 + $0x458] sm:$0xff] }
 0x58f   :  { %v4040_v52 = vpop.f32.mrf.mxu0  ;;  %4897 = vmatpush.bf16.msra.mxu2 %v7355_v3  ;;  %4923 = vmatpush.bf16.msrb.mxu0 %v7359_v14  ;;  %v7455_v9 = vor.u32 %v8183_v62, %v7452_v1  ;;  %v8181_v3 = vld [vmem:[#allocation7 + $0x248] sm:$0xf0]  ;;  %v8180_v14 = vld [vmem:[#allocation7 + $0x244] sm:$0xf]  ;;  %v8206_v62 = vld [vmem:[#allocation2 + $0x410] sm:$0xff] }
 0x590   :  { %4308 = vmatmul.bf16.vlgmr.msra.gmra.mxu3 %v4126_v15  ;;  %4334 = vmatmul.bf16.vlgmr.msrb.gmra.mxu1 %v4126_v15  ;;  %v7438_v15 = vld [vmem:[#allocation7 + $0x240] sm:$0xf]  ;;  %v8203_v52 = vld [vmem:[#allocation7 + $0x2f8] sm:$0xf0]  ;;  %v7443_v12 = vor.u32 %v8180_v14, %v7440_v7  ;;  %v8226_v14 = vld [vmem:[#allocation2 + $0x4b0] sm:$0xff] }
 0x591   :  { %4904 = vmatpush.bf16.msra.mxu3 %v7523_v63  ;;  %4930 = vmatpush.bf16.msrb.mxu1 %v7527_v0  ;;  %v7387_v63 = vor.u32 %v8167_v55, %v7386_v51  ;;  %v8164_v0 = vld [vmem:[#allocation7 + $0x1c0] sm:$0xf0]  ;;  %v7439_v48 = vor.u32 %v8181_v3, %v7438_v15  ;;  %v7531_v36 = vor.u32 %v8203_v52, %v7530_v8  ;;  %v8214_v51 = vld [vmem:[#allocation2 + $0x450] sm:$0xff]  ;;  %v8207_v55 = vld [vmem:[#allocation2 + $0x418] sm:$0xff] }
 0x592   :  { %v7375_v25 = vor.u32 %v8164_v0, %v7374_v53  ;;  %v8212_v1 = vld [vmem:[#allocation2 + $0x440] sm:$0xff] }
 0x593   :  { %4898 = vmatpush.bf16.msra.mxu2 %v7343_v6  ;;  %4924 = vmatpush.bf16.msrb.mxu0 %v7347_v18  ;;  %v7350_v6 = vld [vmem:[#allocation7 + $0x188] sm:$0xf]  ;;  %v8158_v18 = vld [vmem:[#allocation7 + $0x190] sm:$0xf0]  ;;  %v8204_v15 = vld [vmem:[#allocation2 + $0x400] sm:$0xff] }
 0x594   :  { %v7351_v58 = vor.u32 %v8158_v18, %v7350_v6 }
 0x595   :  { %4905 = vmatpush.bf16.msra.mxu3 %v7511_v31  ;;  %4931 = vmatpush.bf16.msrb.mxu1 %v7515_v16  ;;  %v7363_v31 = vor.u32 %v8161_v11, %v7362_v10  ;;  %v7518_v16 = vld [vmem:[#allocation7 + $0x2d8] sm:$0xf] }
 0x596   :  { %4899 = vmatmul.bf16.vlgmr.msra.gmra.mxu2 %v8487_v34  ;;  %4925 = vmatmul.bf16.vlgmr.msrb.gmra.mxu0 %v8487_v34  ;;  %v7519_v43 = vor.u32 %v8200_v17, %v7518_v16  ;;  %v8223_v16 = vld [vmem:[#allocation2 + $0x498] sm:$0xff]  ;;  %v4627_v17 = vld [vmem:[#allocation10 + $0x40] ss:$8 sm:$0x7] }
 0x597   :  { %4943 = vmatpush.bf16.msrb.mxu2 %v7435_v22  ;;  %v8197_v22 = vld [vmem:[#allocation7 + $0x2c8] sm:$0xf0] }
 0x598   :  { %v7507_v23 = vor.u32 %v8197_v22, %v7506_v21  ;;  %v4630_v22 = vperm.slane %v4627_v17, 1 }
 0x599   :  { %4906 = vmatpush.bf16.msra.mxu3 %v7499_v13  ;;  %4932 = vmatpush.bf16.msrb.mxu1 %v7503_v2  ;;  %v8194_v13 = vld [vmem:[#allocation7 + $0x2b0] sm:$0xf0] }
 0x59a   :  { %v7495_v2 = vor.u32 %v8194_v13, %v7494_v19 }
 0x59b   :  { %4944 = vmatpush.bf16.msrb.mxu2 %v7423_v30  ;;  %v8188_v30 = vld [vmem:[#allocation7 + $0x280] sm:$0xf0] }
 0x59c   :  { %v7471_v42 = vor.u32 %v8188_v30, %v7470_v56 }
 0x59d   :  { %4907 = vmatpush.bf16.msra.mxu3 %v7487_v33  ;;  %4933 = vmatpush.bf16.msrb.mxu1 %v7491_v35  ;;  %v8185_v33 = vld [vmem:[#allocation7 + $0x268] sm:$0xf0] }
 0x59e   :  { %v7459_v35 = vor.u32 %v8185_v33, %v7458_v32  ;;  %v8221_v33 = vld [vmem:[#allocation2 + $0x488] sm:$0xff] }
 0x59f   :  { %4945 = vmatpush.bf16.msrb.mxu2 %v7411_v44  ;;  %v8218_v44 = vld [vmem:[#allocation2 + $0x470] sm:$0xff] }
 0x5a0   :  { %4520 = vmatmul.bf16.vlgmr.msrb.gmra.mxu3 %v4092_v46  ;;  %4546 = vmatmul.bf16.vlgmr.msra.gmra.mxu1 %v4092_v46  ;;  %v8216_v46 = vld [vmem:[#allocation2 + $0x460] sm:$0xff] }
 0x5a1   :  { %4908 = vmatpush.bf16.msra.mxu3 %v7475_v45  ;;  %4934 = vmatpush.bf16.msrb.mxu1 %v7479_v49  ;;  %v8217_v45 = vld [vmem:[#allocation2 + $0x468] sm:$0xff] }
 0x5a3   :  { %4946 = vmatpush.bf16.msrb.mxu2 %v7399_v20  ;;  %v8208_v20 = vld [vmem:[#allocation2 + $0x420] sm:$0xff] }
 0x5a5   :  { %4909 = vmatpush.bf16.msra.mxu3 %v7463_v57  ;;  %4935 = vmatpush.bf16.msrb.mxu1 %v7467_v59  ;;  %v8213_v59 = vld [vmem:[#allocation2 + $0x448] sm:$0xff] }
 0x5a7   :  { %4947 = vmatpush.bf16.msrb.mxu2 %v7387_v63  ;;  %v8205_v63 = vld [vmem:[#allocation2 + $0x408] sm:$0xff] }
 0x5a9   :  { %4910 = vmatpush.bf16.msra.mxu3 %v7451_v4  ;;  %4936 = vmatpush.bf16.msrb.mxu1 %v7455_v9  ;;  %v8227_v9 = vld [vmem:[#allocation2 + $0x4b8] sm:$0xff] }
 0x5aa   :  { %5071 = vmatpush.bf16.msra.mxu0 %v8227_v9 }
 0x5ab   :  { %4948 = vmatpush.bf16.msrb.mxu2 %v7375_v25  ;;  %v8225_v25 = vld [vmem:[#allocation2 + $0x4a8] sm:$0xff] }
 0x5ad   :  { %4911 = vmatpush.bf16.msra.mxu3 %v7439_v48  ;;  %4937 = vmatpush.bf16.msrb.mxu1 %v7443_v12  ;;  %v8224_v48 = vld [vmem:[#allocation2 + $0x4a0] sm:$0xff] }
 0x5ae   :  { %5072 = vmatpush.bf16.msra.mxu0 %v8226_v14  ;;  %v4552_v12 = vld [vmem:[#allocation10 + $0x27] ss:$8 sm:$0x3] }
 0x5af   :  { %4949 = vmatpush.bf16.msrb.mxu2 %v7363_v31  ;;  %v4555_v21 = vperm.slane %v4552_v12, 1 }
 0x5b0   :  { %4912 = vmatmul.bf16.vlgmr.msra.gmra.mxu3 %v8489_v39  ;;  %4938 = vmatmul.bf16.vlgmr.msrb.gmra.mxu1 %v8489_v39 }
 0x5b1   :  { %4956 = vmatpush.bf16.msrb.mxu3 %v7531_v36  ;;  %5180 = vmatpush.bf16.msra.mxu1 %v8211_v28 }
 0x5b2   :  { %5073 = vmatpush.bf16.msra.mxu0 %v8225_v25 }
 0x5b3   :  { %4950 = vmatpush.bf16.msrb.mxu2 %v7351_v58 }
 0x5b5   :  { %4957 = vmatpush.bf16.msrb.mxu3 %v7519_v43  ;;  %5181 = vmatpush.bf16.msra.mxu1 %v8210_v5 }
 0x5b6   :  { %4951 = vmatmul.bf16.vlgmr.msrb.gmra.mxu2 %v8487_v34  ;;  %v8219_v34 = vld [vmem:[#allocation2 + $0x478] sm:$0xff]  ;;  %5074 = vmatpush.bf16.msra.mxu0 %v8224_v48 }
 0x5b7   :  { %5193 = vmatpush.bf16.msra.mxu2 %v8219_v34  ;;  %v8220_v34 = vld [vmem:[#allocation2 + $0x480] sm:$0xff] }
 0x5b9   :  { %4958 = vmatpush.bf16.msrb.mxu3 %v7507_v23  ;;  %5182 = vmatpush.bf16.msra.mxu1 %v8209_v47  ;;  %v8222_v23 = vld [vmem:[#allocation2 + $0x490] sm:$0xff] }
 0x5ba   :  { %5075 = vmatpush.bf16.msra.mxu0 %v8223_v16 }
 0x5bb   :  { %5194 = vmatpush.bf16.msra.mxu2 %v8218_v44 }
 0x5bd   :  { %4959 = vmatpush.bf16.msrb.mxu3 %v7495_v2  ;;  %5183 = vmatpush.bf16.msra.mxu1 %v8208_v20 }
 0x5be   :  { %5076 = vmatpush.bf16.msra.mxu0 %v8222_v23 }
 0x5bf   :  { %5195 = vmatpush.bf16.msra.mxu2 %v8217_v45 }
 0x5c1   :  { %4960 = vmatpush.bf16.msrb.mxu3 %v7483_v54  ;;  %5184 = vmatpush.bf16.msra.mxu1 %v8207_v55  ;;  %v4554_v54 = vperm.slane %v4552_v12, 0 }
 0x5c2   :  { %5077 = vmatpush.bf16.msra.mxu0 %v8221_v33 }
 0x5c3   :  { %5196 = vmatpush.bf16.msra.mxu2 %v8216_v46 }
 0x5c5   :  { %4961 = vmatpush.bf16.msrb.mxu3 %v7471_v42  ;;  %5185 = vmatpush.bf16.msra.mxu1 %v8206_v62  ;;  %v4629_v42 = vperm.slane %v4627_v17, 0 }
 0x5c6   :  { %5078 = vmatpush.bf16.msra.mxu0 %v8220_v34 }
 0x5c7   :  { %5197 = vmatpush.bf16.msra.mxu2 %v8215_v29 }
 0x5c9   :  { %4962 = vmatpush.bf16.msrb.mxu3 %v7459_v35  ;;  %5186 = vmatpush.bf16.msra.mxu1 %v8205_v63 }
 0x5cb   :  { %5198 = vmatpush.bf16.msra.mxu2 %v8214_v51  ;;  %v8244_v51 = vld [vmem:[%s8667_s0] sm:$0xff] }
 0x5cd   :  { %4963 = vmatpush.bf16.msrb.mxu3 %v7447_v38  ;;  %5187 = vmatpush.bf16.msra.mxu1 %v8204_v15 }
 0x5cf   :  { %5199 = vmatpush.bf16.msra.mxu2 %v8213_v59 }
 0x5d0   :  { %4964 = vmatmul.bf16.vlgmr.msrb.gmra.mxu3 %v8489_v39 }
 0x5d3   :  { %5200 = vmatpush.bf16.msra.mxu2 %v8212_v1 }
 0x5f3   :  { %v4322_v40 = vpop.f32.mrf.mxu0 }
 0x5f9   :  { %v4296_v41 = vpop.f32.mrf.mxu2 }
 0x5fb   :  { %v4324_v49 = vpop.f32.mrf.mxu0 }
 0x601   :  { %v4298_v50 = vpop.f32.mrf.mxu2 }
 0x602   :  { %v4631_v50 = vperm.slane %v4627_v17, 2 }
 0x603   :  { %v4534_v39 = vpop.f32.mrf.mxu0 }
 0x609   :  { %v4508_v57 = vpop.f32.mrf.mxu2 }
 0x60b   :  { %v4536_v61 = vpop.f32.mrf.mxu0 }
 0x60d   :  { %v4335_v60 = vpop.f32.mrf.mxu1 }
 0x60e   :  { %v4336_v11 = vadd.f32 %v4335_v60, %v4322_v40 }
 0x610   :  { %v4535_v31 = vadd.f32 %v4534_v39, %v4336_v11 }
 0x611   :  { %v4510_v0 = vpop.f32.mrf.mxu2 }
 0x612   :  { %v5206_v0 = vld [vmem:[#allocation10 + $0x41] ss:$0 sm:$0xff] }
 0x613   :  { %v4309_v53 = vpop.f32.mrf.mxu3  ;;  %v4926_v3 = vpop.f32.mrf.mxu0 }
 0x614   :  { %v4310_v43 = vadd.f32 %v4309_v53, %v4296_v41  ;;  %v4927_v24 = vadd.f32 %v4926_v3, %v4630_v22 }
 0x615   :  { %v4337_v4 = vpop.f32.mrf.mxu1 }
 0x616   :  { %v4509_v13 = vadd.f32 %v4508_v57, %v4310_v43 }
 0x619   :  { %v4900_v52 = vpop.f32.mrf.mxu2 }
 0x61a   :  { %v4901_v37 = vadd.f32 %v4900_v52, %v4629_v42 }
 0x61b   :  { %v4311_v7 = vpop.f32.mrf.mxu3  ;;  %v4928_v10 = vpop.f32.mrf.mxu0 }
 0x61d   :  { %v4547_v8 = vpop.f32.mrf.mxu1 }
 0x61e   :  { %v4548_v58 = vadd.f32 %v4547_v8, %v4535_v31 }
 0x620   :  { %v4559_v19 = vadd.f32 %v4555_v21, %v4548_v58 }
 0x621   :  { %v4902_v18 = vpop.f32.mrf.mxu2 }
 0x622   :  { %v4561_v30 = vmax.f32 %v4559_v19, 0.0 }
 0x623   :  { %v4521_v36 = vpop.f32.mrf.mxu3 }
 0x624   :  { %v4522_v27 = vadd.f32 %v4521_v36, %v4509_v13 }
 0x625   :  { %v4549_v6 = vpop.f32.mrf.mxu1 }
 0x626   :  { %v4558_v35 = vadd.f32 %v4554_v54, %v4522_v27 }
 0x628   :  { %v4560_v44 = vmax.f32 %v4558_v35, 0.0 }
 0x62b   :  { %v4523_v2 = vpop.f32.mrf.mxu3 }
 0x62d   :  { %v4939_v56 = vpop.f32.mrf.mxu1 }
 0x62e   :  { %v4940_v32 = vadd.f32 %v4939_v56, %v4927_v24 }
 0x630   :  { %v4970_v26 = vadd.f32 %v4940_v32, %v4561_v30 }
 0x632   :  { %v5005_v38 = vpack.c.bf16 %v4970_v26, %v4970_v26 }
 0x633   :  { %v4913_v40 = vpop.f32.mrf.mxu3 }
 0x634   :  { %v4914_v28 = vadd.f32 %v4913_v40, %v4901_v37  ;;  %5201 = vmatmul.bf16.vlgmr.msra.gmra.mxu2 %v5005_v38 }
 0x635   :  { %v4941_v41 = vpop.f32.mrf.mxu1 }
 0x636   :  { %v4969_v45 = vadd.f32 %v4914_v28, %v4560_v44 }
 0x638   :  { %v5004_v49 = vpack.c.bf16 %v4969_v45, %v4969_v45 }
 0x639   :  { %v4952_v5 = vpop.f32.mrf.mxu2 }
 0x63a   :  { %5188 = vmatmul.bf16.vlgmr.msra.gmra.mxu1 %v5004_v49  ;;  %v4953_v29 = vadd.f32 %v4952_v5, %v4631_v50 }
 0x63b   :  { %v4915_v46 = vpop.f32.mrf.mxu3 }
 0x641   :  { %v4954_v47 = vpop.f32.mrf.mxu2 }
 0x653   :  { %v4965_v39 = vpop.f32.mrf.mxu3 }
 0x654   :  { %v4966_v20 = vadd.f32 %v4965_v39, %v4953_v29 }
 0x656   :  { %v4971_v55 = vadd.f32 %v8244_v51, %v4966_v20 }
 0x658   :  { %v5022_v57 = vpack.c.bf16 %v4971_v55, %v4971_v55 }
 0x65a   :  { %5079 = vmatmul.bf16.vlgmr.msra.gmra.mxu0 %v5022_v57 }
 0x65b   :  { %v4967_v59 = vpop.f32.mrf.mxu3 }
 0x6b7   :  { %v5189_v60 = vpop.f32.mrf.mxu1  ;;  %v5202_v61 = vpop.f32.mrf.mxu2 }
 0x6bf   :  { %v5191_v62 = vpop.f32.mrf.mxu1  ;;  %v5204_v1 = vpop.f32.mrf.mxu2 }
 0x6d7   :  { %v5080_v63 = vpop.f32.mrf.mxu0 }
 0x6d8   :  { %v5190_v53 = vadd.f32 %v5189_v60, %v5080_v63 }
 0x6da   :  { %v5203_v4 = vadd.f32 %v5202_v61, %v5190_v53 }
 0x6dc   :  { %v5207_v9 = vadd.f32 %v5206_v0, %v5203_v4 }
 0x6de   :  { %5208 = vst [vmem:[#allocation11] sm:$0xff] %v5207_v9 }
 0x6df   :  { %v5082_v15 = vpop.f32.mrf.mxu0  ;;  %5219 = dma.vmem_to_hbm [thread:$0]  %s5215_s25, 128, %s5217_s7, [#allocation4]  }
 0x6e0   :  { %8395 = dma.done.wait [#allocation4], 128  }
 0x6e1   :  { %8396 = vsyncadd [#allocation4], 4294967168 }
 0x6e2   :  { %5224 = vsyncpa [#allocation3], 1 }
 0x6e3   :  { %5225 = vsyncpa [#allocation6], 1 }
 0x6e4   :  { %5226 = vsyncpa [#allocation9], 1 }
 0x6e5   :  { %5227 = vsyncpa [#allocation4], 1 }

</bundles_post_ra>
